<compile_context>
chip_gen: v5e
topology: v5e:2x2
jax: 0.10.0
libtpu: 0.0.40
codegen_flags: <defaults>
</compile_context>

<pallas_src>
import functools

import jax
import jax.numpy as jnp
from jax.experimental import pallas as pl
from jax.experimental.pallas import tpu as pltpu


def mu_network_kernel(x_ref, w1_ref, b1_ref, w2_ref, b2_ref, out_ref):
    # Layer 1: (bb, n_input) @ (n_input, n_features) on the MXU, f32 accumulate.
    h = jnp.dot(x_ref[...], w1_ref[...], preferred_element_type=jnp.float32)
    # Bias add on the VPU, tanh on the EUP (all f32).
    h = jnp.tanh(h + b1_ref[...])
    # Layer 2: (bb, n_features) @ (n_features, n_output).  The output block's
    # last dim equals the full (unpadded) n_output, so only real bytes go back
    # to HBM.
    mu = jnp.dot(h, w2_ref[...], preferred_element_type=jnp.float32)
    out_ref[...] = (mu + b2_ref[...]).astype(out_ref.dtype)


def _round_up(x, m):
    return ((x + m - 1) // m) * m


def _pick_batch_tile(batch, block_b):
    """Row-tile size: big (amortize per-step overhead), multiple of 8, and
    giving an even grid length when possible (v7x has 2 TensorCores)."""
    if batch <= 8:
        return batch                                   # single full-array block
    half_steps = max(1, pl.cdiv(batch, 2 * block_b))   # target grid = 2*half_steps
    bb = _round_up(pl.cdiv(batch, 2 * half_steps), 8)
    return min(bb, block_b)


def prepare_params(w1_torch_layout, b1, w2_torch_layout, b2):
    """One-time parameter prep (NOT in the per-forward hot path).

    Takes PyTorch-Linear-layout weights (fan_out, fan_in) and biases (fan_out,)
    and returns weights pre-transposed to (fan_in, fan_out) plus (1, fan_out)
    biases, so the kernel does plain row-major matmuls (y = x @ W.T + b).
    """
    w1 = jnp.asarray(w1_torch_layout, jnp.float32).T
    w2 = jnp.asarray(w2_torch_layout, jnp.float32).T
    b1 = jnp.asarray(b1, jnp.float32).reshape(1, -1)
    b2 = jnp.asarray(b2, jnp.float32).reshape(1, -1)
    return w1, b1, w2, b2


@functools.partial(jax.jit, static_argnames=("block_b", "vmem_limit_bytes"))
def mu_network_forward(state, w1, b1, w2, b2, *, block_b=2048,
                       vmem_limit_bytes=None):
    """state: (B, n_input); w1: (n_input, n_features); b1: (1, n_features);
    w2: (n_features, n_output); b2: (1, n_output).  Returns (B, n_output)."""
    B, n_input = state.shape
    n_features = w1.shape[1]
    n_output = w2.shape[1]

    bb = _pick_batch_tile(B, _round_up(block_b, 8))
    grid = (pl.cdiv(B, bb),)

    f32 = jnp.dtype(jnp.float32).itemsize
    cost = pl.CostEstimate(
        flops=2 * B * (n_input * n_features + n_features * n_output),
        transcendentals=B * n_features,
        bytes_accessed=f32 * (B * (n_input + n_output)
                              + n_input * n_features + n_features
                              + n_features * n_output + n_output),
    )

    cp_kwargs = dict(dimension_semantics=("parallel",))
    if vmem_limit_bytes is not None:
        cp_kwargs["vmem_limit_bytes"] = vmem_limit_bytes

    return pl.pallas_call(
        mu_network_kernel,
        out_shape=jax.ShapeDtypeStruct((B, n_output), jnp.float32),
        grid=grid,
        in_specs=[
            pl.BlockSpec((bb, n_input), lambda i: (i, 0)),           # x row tile
            pl.BlockSpec((n_input, n_features), lambda i: (0, 0)),   # W1 (VMEM-resident)
            pl.BlockSpec((1, n_features), lambda i: (0, 0)),         # b1 (resident)
            pl.BlockSpec((n_features, n_output), lambda i: (0, 0)),  # W2 (resident)
            pl.BlockSpec((1, n_output), lambda i: (0, 0)),           # b2 (resident)
        ],
        out_specs=pl.BlockSpec((bb, n_output), lambda i: (i, 0)),
        compiler_params=pltpu.CompilerParams(**cp_kwargs),
        cost_estimate=cost,
    )(state, w1, b1, w2, b2)


def xavier_uniform(key, fan_out, fan_in, dtype=jnp.float32):
    # torch.nn.init.xavier_uniform_ (gain=1.0) for a (fan_out, fan_in) weight.
    limit = float(jnp.sqrt(6.0 / (fan_in + fan_out)))
    return jax.random.uniform(key, (fan_out, fan_in), dtype=dtype,
                              minval=-limit, maxval=limit)


if __name__ == "__main__":
    # Module config: input_shape=(n_input,), output_shape=(n_output,), n_features.
    n_input, n_features, n_output = 8, 32, 4
    B = 4096   # two grid steps at the default 2048-row tile (even grid for v7x)

    key = jax.random.PRNGKey(0)
    k_x, k_w1, k_b1, k_w2, k_b2 = jax.random.split(key, 5)

    state = jax.random.normal(k_x, (B, n_input), dtype=jnp.float32)

    # Parameters in PyTorch Linear layout: weight (fan_out, fan_in), bias (fan_out,).
    w1_t = xavier_uniform(k_w1, n_features, n_input)
    w2_t = xavier_uniform(k_w2, n_output, n_features)
    b1_t = jax.random.uniform(k_b1, (n_features,), dtype=jnp.float32,
                              minval=-1.0 / float(jnp.sqrt(n_input)),
                              maxval=1.0 / float(jnp.sqrt(n_input)))
    b2_t = jax.random.uniform(k_b2, (n_output,), dtype=jnp.float32,
                              minval=-1.0 / float(jnp.sqrt(n_features)),
                              maxval=1.0 / float(jnp.sqrt(n_features)))

    # One-time prep (transpose to (in, out), reshape biases) — not in the hot path.
    w1, b1, w2, b2 = prepare_params(w1_t, b1_t, w2_t, b2_t)

    # Main check: B divisible by the tile -> even, fully dense grid of 2.
    mu = mu_network_forward(state, w1, b1, w2, b2)
    jax.block_until_ready(mu)

    ref = jnp.tanh(state @ w1 + b1) @ w2 + b2
    assert mu.shape == (B, n_output)
    assert jnp.allclose(mu, ref, atol=1e-4, rtol=1e-4), "mismatch vs reference"

    # Ragged-batch check: B not a multiple of the chosen tile (heuristic picks a
    # 56-row tile -> grid of 2); the last block reads past the end but those
    # rows are never written back, so results stay exact for the real rows.
    B2 = 100
    state2 = state[:B2]
    mu2 = mu_network_forward(state2, w1, b1, w2, b2)
    jax.block_until_ready(mu2)
    ref2 = jnp.tanh(state2 @ w1 + b1) @ w2 + b2
    assert mu2.shape == (B2, n_output)
    assert jnp.allclose(mu2, ref2, atol=1e-4, rtol=1e-4), "ragged-batch mismatch"

    print("KERNEL_OK")
</pallas_src>

<mosaic_0001>
module attributes {stable_mosaic.version = 11 : i64} {
  func.func @mu_network_kernel(%arg0: i32, %arg1: memref<2048x8xf32, #tpu.memory_space<vmem>>, %arg2: memref<8x32xf32, #tpu.memory_space<vmem>>, %arg3: memref<1x32xf32, #tpu.memory_space<vmem>>, %arg4: memref<32x4xf32, #tpu.memory_space<vmem>>, %arg5: memref<1x4xf32, #tpu.memory_space<vmem>>, %arg6: memref<2048x4xf32, #tpu.memory_space<vmem>>) attributes {dimension_semantics = [#tpu.dimension_semantics<parallel>], iteration_bounds = array<i64: 2>, scalar_prefetch = 0 : i64, scratch_operands = 0 : i64, tpu.core_type = #tpu.core_type<tc>, window_params = [{transform_indices = @transform_0, window_bounds = array<i64: 2048, 8>}, {pipeline_mode = #tpu.pipeline_mode<synchronous>, transform_indices = @transform_1, window_bounds = array<i64: 8, 32>}, {pipeline_mode = #tpu.pipeline_mode<synchronous>, transform_indices = @transform_2, window_bounds = array<i64: 1, 32>}, {pipeline_mode = #tpu.pipeline_mode<synchronous>, transform_indices = @transform_3, window_bounds = array<i64: 32, 4>}, {pipeline_mode = #tpu.pipeline_mode<synchronous>, transform_indices = @transform_4, window_bounds = array<i64: 1, 4>}, {transform_indices = @transform_5, window_bounds = array<i64: 2048, 4>}]} {
    %c0 = arith.constant 0 : index
    %c0_0 = arith.constant 0 : index
    %0 = vector.load %arg1[%c0, %c0_0] : memref<2048x8xf32, #tpu.memory_space<vmem>>, vector<2048x8xf32>
    %c0_1 = arith.constant 0 : index
    %c0_2 = arith.constant 0 : index
    %1 = vector.load %arg2[%c0_1, %c0_2] : memref<8x32xf32, #tpu.memory_space<vmem>>, vector<8x32xf32>
    %cst = arith.constant dense<0.000000e+00> : vector<2048x32xf32>
    %2 = tpu.matmul %0, %1, %cst {dimension_numbers = #tpu.dot_dimension_numbers<[1], [0], [0], [1], [0, 0, 1, 1], [], []>} : vector<2048x8xf32>, vector<8x32xf32>, vector<2048x32xf32> -> vector<2048x32xf32>
    %c0_3 = arith.constant 0 : index
    %c0_4 = arith.constant 0 : index
    %3 = vector.load %arg3[%c0_3, %c0_4] : memref<1x32xf32, #tpu.memory_space<vmem>>, vector<1x32xf32>
    %4 = vector.broadcast %3 : vector<1x32xf32> to vector<2048x32xf32>
    %5 = arith.addf %2, %4 : vector<2048x32xf32>
    %6 = math.tanh %5 : vector<2048x32xf32>
    %c0_5 = arith.constant 0 : index
    %c0_6 = arith.constant 0 : index
    %7 = vector.load %arg4[%c0_5, %c0_6] : memref<32x4xf32, #tpu.memory_space<vmem>>, vector<32x4xf32>
    %cst_7 = arith.constant dense<0.000000e+00> : vector<2048x4xf32>
    %8 = tpu.matmul %6, %7, %cst_7 {dimension_numbers = #tpu.dot_dimension_numbers<[1], [0], [0], [1], [0, 0, 1, 1], [], []>} : vector<2048x32xf32>, vector<32x4xf32>, vector<2048x4xf32> -> vector<2048x4xf32>
    %c0_8 = arith.constant 0 : index
    %c0_9 = arith.constant 0 : index
    %9 = vector.load %arg5[%c0_8, %c0_9] : memref<1x4xf32, #tpu.memory_space<vmem>>, vector<1x4xf32>
    %10 = vector.broadcast %9 : vector<1x4xf32> to vector<2048x4xf32>
    %11 = arith.addf %8, %10 : vector<2048x4xf32>
    %c0_10 = arith.constant 0 : index
    %c0_11 = arith.constant 0 : index
    %12 = vector.load %arg6[%c0_10, %c0_11] : memref<2048x4xf32, #tpu.memory_space<vmem>>, vector<2048x4xf32>
    tpu.vector_store %arg6[%c0_10, %c0_11], %11 {strides = array<i32>} : memref<2048x4xf32, #tpu.memory_space<vmem>>, vector<2048x4xf32>,
    return
  }
  func.func @transform_0(%arg0: i32) -> (i32, i32) {
    %c0_i32 = arith.constant 0 : i32
    %c0_i32_0 = arith.constant 0 : i32
    return %arg0, %c0_i32 : i32, i32
  }
  func.func @transform_1(%arg0: i32) -> (i32, i32) {
    %c0_i32 = arith.constant 0 : i32
    %c0_i32_0 = arith.constant 0 : i32
    %c0_i32_1 = arith.constant 0 : i32
    return %c0_i32, %c0_i32_0 : i32, i32
  }
  func.func @transform_2(%arg0: i32) -> (i32, i32) {
    %c0_i32 = arith.constant 0 : i32
    %c0_i32_0 = arith.constant 0 : i32
    %c0_i32_1 = arith.constant 0 : i32
    return %c0_i32, %c0_i32_0 : i32, i32
  }
  func.func @transform_3(%arg0: i32) -> (i32, i32) {
    %c0_i32 = arith.constant 0 : i32
    %c0_i32_0 = arith.constant 0 : i32
    %c0_i32_1 = arith.constant 0 : i32
    return %c0_i32, %c0_i32_0 : i32, i32
  }
  func.func @transform_4(%arg0: i32) -> (i32, i32) {
    %c0_i32 = arith.constant 0 : i32
    %c0_i32_0 = arith.constant 0 : i32
    %c0_i32_1 = arith.constant 0 : i32
    return %c0_i32, %c0_i32_0 : i32, i32
  }
  func.func @transform_5(%arg0: i32) -> (i32, i32) {
    %c0_i32 = arith.constant 0 : i32
    %c0_i32_0 = arith.constant 0 : i32
    return %arg0, %c0_i32 : i32, i32
  }
}

</mosaic_0001>

<bundles_post_ra>
// kernel: mu_network_forward.1
= control target key start
LH: loop header
LB: loop body
LE: loop exit
PB: predicated region body
PF: predicated region fallthrough
CT: control target
= control target key end

     0   :  { %s5270_s18 = smov 0   ;;  %s7155_s0 = inlined_call_operand.vmem [shape: f32[4096,8], index: 0, kind: input, shape index: {}]   ;;  %s7156_s1 = inlined_call_operand.vmem [shape: f32[8,32], index: 1, kind: input, shape index: {}]   ;;  %s7157_s2 = inlined_call_operand.vmem [shape: f32[1,32], index: 2, kind: input, shape index: {}]   ;;  %s7158_s3 = inlined_call_operand.vmem [shape: f32[32,4], index: 3, kind: input, shape index: {}]   ;;  %s7159_s4 = inlined_call_operand.vmem [shape: f32[1,4], index: 4, kind: input, shape index: {}]   ;;  %s7160_s5 = inlined_call_operand.vmem [shape: f32[4096,4], index: 5, kind: output, shape index: {}]  }
   0x1 LB: > { %s4174_s19 = sadd.s32 4294967295, %s5238_s18   ;;  %p4178_p0 = scmp.ge.s32.totalorder %s5238_s18, 1  ;;  %s5238_s18 = sphi %s5270_s18, %s15_s18  }
   0x2   : > { %p188_p1 = scmp.lt.s32.totalorder %s5238_s18, 3 }
   0x4   : > { %p189_p2 = pnand %p4178_p0, %p188_p1 }
   0x5   : > { %s4179_s22 = sshll.u32 (!%p189_p2), %s4174_s19, 8 }
   0x6   : > { %192 = sbr.rel (%p189_p2) target bundleno = 2325 (0x915), region = 40  ;;  %p217_p3 = scmp.lt.s32.totalorder (!%p189_p2), %s4179_s22, 511 }
   0xb   : > { %v484_v0 = vld [vmem:[%s7156_s1] sm:$0xff]  ;;  %s7162_s22 = smov (!%p217_p3, %s4179_s22), 511  ;;  %vm489_vm0 = vcmask 64512   ;;  %v2302_v14 = vld [vmem:[%s7158_s3 + $0x18] sm:$0xff]  ;;  %v2301_v15 = vld [vmem:[%s7158_s3 + $0x10] sm:$0xff]  ;;  %vm2307_vm1 = vcmask 261120  }
   0xc   : > { %1273 = vmatpush.msra.mxu0 %v484_v0  ;;  %4697 = vmatpush.msra.mxu3 %v484_v0  ;;  %s4180_s23 = sshll.u32 %s7162_s22, 3  ;;  %v2300_v16 = vld [vmem:[%s7158_s3 + $0x8] sm:$0xff]  ;;  %v2299_v18 = vld [vmem:[%s7158_s3] sm:$0xff]  ;;  %vm3861_vm2 = vcmask 31744  }
   0xd   : > { %s5289_s26 = scalar_lea.vmem %s7155_s0, %s4180_s23  ;;  %3088 = vmatpush.msra.mxu1 %v2302_v14  ;;  %4698 = vmatpush.msra.mxu2 %v2302_v14  ;;  %v5338_v21 = vld [vmem:[%s7157_s2] ss:$0 sm:$0xff]  ;;  %s5417_s16 = scalar_lea.vmem %s7160_s5, %s4180_s23 }
   0xe   : > { %v228_v1 = vld [vmem:[%s5289_s26] sm:$0xff]  ;;  %v229_v2 = vld [vmem:[%s5289_s26 + $0x8] sm:$0xff]  ;;  %v230_v3 = vld [vmem:[%s5289_s26 + $0x10] sm:$0xff] }
   0xf   : > { %4183 = vmatmul.msk.f32.vlgmr.msra.gmra.mxu0 %vm489_vm0, %v228_v1  ;;  %v231_v4 = vld [vmem:[%s5289_s26 + $0x18] sm:$0xff]  ;;  %v232_v5 = vld [vmem:[%s5289_s26 + $0x20] sm:$0xff]  ;;  %v233_v6 = vld [vmem:[%s5289_s26 + $0x28] sm:$0xff]  ;;  %3089 = vmatpush.msra.mxu1 %v2301_v15 }
  0x10   : > { %v234_v7 = vld [vmem:[%s5289_s26 + $0x30] sm:$0xff]  ;;  %v235_v8 = vld [vmem:[%s5289_s26 + $0x38] sm:$0xff]  ;;  %v236_v9 = vld [vmem:[%s5289_s26 + $0x40] sm:$0xff]  ;;  %4699 = vmatpush.msra.mxu2 %v2301_v15 }
  0x11   : > { %v237_v10 = vld [vmem:[%s5289_s26 + $0x48] sm:$0xff]  ;;  %v238_v11 = vld [vmem:[%s5289_s26 + $0x50] sm:$0xff]  ;;  %v239_v12 = vld [vmem:[%s5289_s26 + $0x58] sm:$0xff]  ;;  %3090 = vmatpush.msra.mxu1 %v2300_v16 }
  0x12   : > { %v240_v13 = vld [vmem:[%s5289_s26 + $0x60] sm:$0xff]  ;;  %v241_v17 = vld [vmem:[%s5289_s26 + $0x68] sm:$0xff]  ;;  %4700 = vmatpush.msra.mxu2 %v2300_v16  ;;  %v242_v19 = vld [vmem:[%s5289_s26 + $0x70] sm:$0xff] }
  0x13   : > { %3091 = vmatpush.msra.mxu1 %v2299_v18  ;;  %v243_v20 = vld [vmem:[%s5289_s26 + $0x78] sm:$0xff]  ;;  %v244_v23 = vld [vmem:[%s5289_s26 + $0x80] sm:$0xff]  ;;  %v245_v26 = vld [vmem:[%s5289_s26 + $0x88] sm:$0xff] }
  0x14   : > { %4701 = vmatpush.msra.mxu2 %v2299_v18  ;;  %v246_v30 = vld [vmem:[%s5289_s26 + $0x90] sm:$0xff]  ;;  %v247_v34 = vld [vmem:[%s5289_s26 + $0x98] sm:$0xff]  ;;  %v248_v38 = vld [vmem:[%s5289_s26 + $0xa0] sm:$0xff] }
  0x15   : > { %v249_v42 = vld [vmem:[%s5289_s26 + $0xa8] sm:$0xff]  ;;  %v250_v46 = vld [vmem:[%s5289_s26 + $0xb0] sm:$0xff]  ;;  %v251_v50 = vld [vmem:[%s5289_s26 + $0xb8] sm:$0xff] }
  0x16   : > { %v252_v54 = vld [vmem:[%s5289_s26 + $0xc0] sm:$0xff]  ;;  %v253_v58 = vld [vmem:[%s5289_s26 + $0xc8] sm:$0xff]  ;;  %v254_v62 = vld [vmem:[%s5289_s26 + $0xd0] sm:$0xff] }
  0x17   : > { %4184 = vmatmul.msk.f32.gmra.mxu0 %vm489_vm0, %v229_v2  ;;  %v255_v2 = vld [vmem:[%s5289_s26 + $0xd8] sm:$0xff]  ;;  %v258_v14 = vld [vmem:[%s5289_s26 + $0xf0] sm:$0xff] }
  0x18   : > { %v259_v18 = vld [vmem:[%s5289_s26 + $0xf8] sm:$0xff] }
  0x1f   : > { %4185 = vmatmul.msk.f32.gmra.mxu0 %vm489_vm0, %v230_v3 }
  0x27   : > { %4186 = vmatmul.msk.f32.gmra.mxu0 %vm489_vm0, %v231_v4 }
  0x2f   : > { %4187 = vmatmul.msk.f32.gmra.mxu0 %vm489_vm0, %v232_v5 }
  0x37   : > { %4188 = vmatmul.msk.f32.gmra.mxu0 %vm489_vm0, %v233_v6  ;;  %v256_v6 = vld [vmem:[%s5289_s26 + $0xe0] sm:$0xff] }
  0x3f   : > { %4189 = vmatmul.msk.f32.gmra.mxu0 %vm489_vm0, %v234_v7 }
  0x47   : > { %4190 = vmatmul.msk.f32.gmra.mxu0 %vm489_vm0, %v235_v8 }
  0x4f   : > { %4191 = vmatmul.msk.f32.gmra.mxu0 %vm489_vm0, %v236_v9 }
  0x57   : > { %4192 = vmatmul.msk.f32.gmra.mxu0 %vm489_vm0, %v237_v10  ;;  %v257_v10 = vld [vmem:[%s5289_s26 + $0xe8] sm:$0xff] }
  0x5f   : > { %4193 = vmatmul.msk.f32.gmra.mxu0 %vm489_vm0, %v238_v11 }
  0x67   : > { %4194 = vmatmul.msk.f32.gmra.mxu0 %vm489_vm0, %v239_v12 }
  0x6f   : > { %4195 = vmatmul.msk.f32.gmra.mxu0 %vm489_vm0, %v240_v13 }
  0x77   : > { %4196 = vmatmul.msk.f32.gmra.mxu0 %vm489_vm0, %v241_v17 }
  0x7f   : > { %4197 = vmatmul.msk.f32.gmra.mxu0 %vm489_vm0, %v242_v19 }
  0x87   : > { %4198 = vmatmul.msk.f32.gmra.mxu0 %vm489_vm0, %v243_v20 }
  0x8c   : > { %v1275_v22 = vpop.f32.mrf.mxu0 }
  0x8d   : > { %v1276_v24 = vadd.f32 %v5338_v21, %v1275_v22 }
  0x8f   : > { %4712 = vtanh.f32 %v1276_v24  ;;  %4199 = vmatmul.msk.f32.gmra.mxu0 %vm489_vm0, %v244_v23  ;;  %v260_v23 = vld [vmem:[%s5289_s26 + $0x100] sm:$0xff] }
  0x94   : > { %v1278_v25 = vpop.f32.mrf.mxu0 }
  0x95   : > { %v4713_v27 = vpop.eup %4712  ;;  %v1279_v28 = vadd.f32 %v5338_v21, %v1278_v25 }
  0x96   : > { %4439 = vmatmul.msk.f32.vlgmr.msra.gmra.mxu1 %vm2307_vm1, %v4713_v27 }
  0x97   : > { %4714 = vtanh.f32 %v1279_v28  ;;  %4200 = vmatmul.msk.f32.gmra.mxu0 %vm489_vm0, %v245_v26  ;;  %v5410_v26 = vld [vmem:[%s7159_s4] ss:$0 sm:$0xff] }
  0x9c   : > { %v1281_v29 = vpop.f32.mrf.mxu0 }
  0x9d   : > { %v4715_v31 = vpop.eup %4714  ;;  %v1282_v32 = vadd.f32 %v5338_v21, %v1281_v29 }
  0x9e   : > { %4440 = vmatmul.msk.f32.gmra.mxu1 %vm2307_vm1, %v4715_v31 }
  0x9f   : > { %4716 = vtanh.f32 %v1282_v32  ;;  %4201 = vmatmul.msk.f32.gmra.mxu0 %vm489_vm0, %v246_v30  ;;  %v261_v30 = vld [vmem:[%s5289_s26 + $0x108] sm:$0xff] }
  0xa4   : > { %v1284_v33 = vpop.f32.mrf.mxu0 }
  0xa5   : > { %v4717_v35 = vpop.eup %4716  ;;  %v1285_v36 = vadd.f32 %v5338_v21, %v1284_v33 }
  0xa6   : > { %4441 = vmatmul.msk.f32.gmra.mxu1 %vm2307_vm1, %v4717_v35 }
  0xa7   : > { %4718 = vtanh.f32 %v1285_v36  ;;  %4202 = vmatmul.msk.f32.gmra.mxu0 %vm489_vm0, %v247_v34  ;;  %v262_v36 = vld [vmem:[%s5289_s26 + $0x110] sm:$0xff] }
  0xac   : > { %v1287_v37 = vpop.f32.mrf.mxu0 }
  0xad   : > { %v4719_v39 = vpop.eup %4718  ;;  %v1288_v40 = vadd.f32 %v5338_v21, %v1287_v37 }
  0xae   : > { %4442 = vmatmul.msk.f32.gmra.mxu1 %vm2307_vm1, %v4719_v39 }
  0xaf   : > { %4720 = vtanh.f32 %v1288_v40  ;;  %4203 = vmatmul.msk.f32.gmra.mxu0 %vm489_vm0, %v248_v38 }
  0xb4   : > { %v1290_v41 = vpop.f32.mrf.mxu0 }
  0xb5   : > { %v4721_v43 = vpop.eup %4720  ;;  %v1291_v44 = vadd.f32 %v5338_v21, %v1290_v41 }
  0xb6   : > { %4443 = vmatmul.msk.f32.gmra.mxu1 %vm2307_vm1, %v4721_v43 }
  0xb7   : > { %4722 = vtanh.f32 %v1291_v44  ;;  %4204 = vmatmul.msk.f32.gmra.mxu0 %vm489_vm0, %v249_v42  ;;  %v263_v42 = vld [vmem:[%s5289_s26 + $0x118] sm:$0xff] }
  0xbc   : > { %v1293_v45 = vpop.f32.mrf.mxu0 }
  0xbd   : > { %v4723_v47 = vpop.eup %4722  ;;  %v1294_v48 = vadd.f32 %v5338_v21, %v1293_v45 }
  0xbe   : > { %4444 = vmatmul.msk.f32.gmra.mxu1 %vm2307_vm1, %v4723_v47 }
  0xbf   : > { %4724 = vtanh.f32 %v1294_v48  ;;  %4205 = vmatmul.msk.f32.gmra.mxu0 %vm489_vm0, %v250_v46  ;;  %v264_v48 = vld [vmem:[%s5289_s26 + $0x120] sm:$0xff] }
  0xc4   : > { %v1296_v49 = vpop.f32.mrf.mxu0 }
  0xc5   : > { %v4725_v51 = vpop.eup %4724  ;;  %v1297_v52 = vadd.f32 %v5338_v21, %v1296_v49 }
  0xc6   : > { %4445 = vmatmul.msk.f32.gmra.mxu1 %vm2307_vm1, %v4725_v51 }
  0xc7   : > { %4726 = vtanh.f32 %v1297_v52  ;;  %4206 = vmatmul.msk.f32.gmra.mxu0 %vm489_vm0, %v251_v50 }
  0xcc   : > { %v1299_v53 = vpop.f32.mrf.mxu0 }
  0xcd   : > { %v4727_v55 = vpop.eup %4726  ;;  %v1300_v56 = vadd.f32 %v5338_v21, %v1299_v53 }
  0xce   : > { %4446 = vmatmul.msk.f32.gmra.mxu1 %vm2307_vm1, %v4727_v55 }
  0xcf   : > { %4728 = vtanh.f32 %v1300_v56  ;;  %4207 = vmatmul.msk.f32.gmra.mxu0 %vm489_vm0, %v252_v54  ;;  %v265_v54 = vld [vmem:[%s5289_s26 + $0x128] sm:$0xff] }
  0xd4   : > { %v1302_v57 = vpop.f32.mrf.mxu0 }
  0xd5   : > { %v4729_v59 = vpop.eup %4728  ;;  %v1303_v60 = vadd.f32 %v5338_v21, %v1302_v57 }
  0xd6   : > { %4447 = vmatmul.msk.f32.gmra.mxu1 %vm2307_vm1, %v4729_v59 }
  0xd7   : > { %4730 = vtanh.f32 %v1303_v60  ;;  %4208 = vmatmul.msk.f32.gmra.mxu0 %vm489_vm0, %v253_v58  ;;  %v266_v60 = vld [vmem:[%s5289_s26 + $0x130] sm:$0xff] }
  0xdc   : > { %v1305_v61 = vpop.f32.mrf.mxu0 }
  0xdd   : > { %v4731_v63 = vpop.eup %4730  ;;  %v1306_v0 = vadd.f32 %v5338_v21, %v1305_v61 }
  0xde   : > { %4448 = vmatmul.msk.f32.gmra.mxu1 %vm2307_vm1, %v4731_v63 }
  0xdf   : > { %4732 = vtanh.f32 %v1306_v0  ;;  %4209 = vmatmul.msk.f32.gmra.mxu0 %vm489_vm0, %v254_v62 }
  0xe4   : > { %v1308_v1 = vpop.f32.mrf.mxu0 }
  0xe5   : > { %v4733_v3 = vpop.eup %4732  ;;  %v1309_v4 = vadd.f32 %v5338_v21, %v1308_v1 }
  0xe6   : > { %4449 = vmatmul.msk.f32.gmra.mxu1 %vm2307_vm1, %v4733_v3 }
  0xe7   : > { %4734 = vtanh.f32 %v1309_v4  ;;  %4210 = vmatmul.msk.f32.gmra.mxu0 %vm489_vm0, %v255_v2  ;;  %v267_v2 = vld [vmem:[%s5289_s26 + $0x138] sm:$0xff] }
  0xec   : > { %v1311_v5 = vpop.f32.mrf.mxu0 }
  0xed   : > { %v4735_v7 = vpop.eup %4734  ;;  %v1312_v8 = vadd.f32 %v5338_v21, %v1311_v5 }
  0xee   : > { %4450 = vmatmul.msk.f32.gmra.mxu1 %vm2307_vm1, %v4735_v7 }
  0xef   : > { %4736 = vtanh.f32 %v1312_v8  ;;  %4211 = vmatmul.msk.f32.gmra.mxu0 %vm489_vm0, %v256_v6  ;;  %v268_v8 = vld [vmem:[%s5289_s26 + $0x140] sm:$0xff] }
  0xf4   : > { %v1314_v9 = vpop.f32.mrf.mxu0 }
  0xf5   : > { %v4737_v11 = vpop.eup %4736  ;;  %v1315_v12 = vadd.f32 %v5338_v21, %v1314_v9 }
  0xf6   : > { %4451 = vmatmul.msk.f32.gmra.mxu1 %vm2307_vm1, %v4737_v11 }
  0xf7   : > { %4738 = vtanh.f32 %v1315_v12  ;;  %4212 = vmatmul.msk.f32.gmra.mxu0 %vm489_vm0, %v257_v10 }
  0xfc   : > { %v1317_v13 = vpop.f32.mrf.mxu0 }
  0xfd   : > { %v4739_v15 = vpop.eup %4738  ;;  %v1318_v16 = vadd.f32 %v5338_v21, %v1317_v13 }
  0xfe   : > { %4452 = vmatmul.msk.f32.gmra.mxu1 %vm2307_vm1, %v4739_v15 }
  0xff   : > { %4740 = vtanh.f32 %v1318_v16  ;;  %4213 = vmatmul.msk.f32.gmra.mxu0 %vm489_vm0, %v258_v14  ;;  %v269_v14 = vld [vmem:[%s5289_s26 + $0x148] sm:$0xff] }
 0x104   : > { %v1320_v17 = vpop.f32.mrf.mxu0 }
 0x105   : > { %v4741_v19 = vpop.eup %4740  ;;  %v1321_v20 = vadd.f32 %v5338_v21, %v1320_v17 }
 0x106   : > { %4453 = vmatmul.msk.f32.gmra.mxu1 %vm2307_vm1, %v4741_v19 }
 0x107   : > { %4742 = vtanh.f32 %v1321_v20  ;;  %4214 = vmatmul.msk.f32.gmra.mxu0 %vm489_vm0, %v259_v18  ;;  %v270_v20 = vld [vmem:[%s5289_s26 + $0x150] sm:$0xff] }
 0x10c   : > { %v1323_v22 = vpop.f32.mrf.mxu0 }
 0x10d   : > { %v4743_v24 = vpop.eup %4742  ;;  %v1324_v25 = vadd.f32 %v5338_v21, %v1323_v22 }
 0x10e   : > { %4454 = vmatmul.msk.f32.gmra.mxu1 %vm2307_vm1, %v4743_v24 }
 0x10f   : > { %4744 = vtanh.f32 %v1324_v25  ;;  %4215 = vmatmul.msk.f32.gmra.mxu0 %vm489_vm0, %v260_v23 }
 0x113   : > { %v3093_v27 = vpop.f32.mrf.mxu1 }
 0x114   : > { %v3094_v28 = vadd.f32 %v5410_v26, %v3093_v27  ;;  %v1326_v29 = vpop.f32.mrf.mxu0 }
 0x115   : > { %v4745_v31 = vpop.eup %4744  ;;  %v1327_v32 = vadd.f32 %v5338_v21, %v1326_v29 }
 0x116   : > { %3862 = vst.msk [vmem:[%s5417_s16] sm:$0xff] %vm3861_vm2, %v3094_v28  ;;  %4455 = vmatmul.msk.f32.gmra.mxu1 %vm2307_vm1, %v4745_v31  ;;  %v271_v28 = vld [vmem:[%s5289_s26 + $0x158] sm:$0xff] }
 0x117   : > { %4746 = vtanh.f32 %v1327_v32  ;;  %4216 = vmatmul.msk.f32.gmra.mxu0 %vm489_vm0, %v261_v30 }
 0x11b   : > { %v3096_v33 = vpop.f32.mrf.mxu1 }
 0x11c   : > { %v3097_v34 = vadd.f32 %v5410_v26, %v3096_v33  ;;  %v1329_v35 = vpop.f32.mrf.mxu0 }
 0x11d   : > { %v4747_v37 = vpop.eup %4746  ;;  %v1330_v38 = vadd.f32 %v5338_v21, %v1329_v35 }
 0x11e   : > { %3863 = vst.msk [vmem:[%s5417_s16 + $0x8] sm:$0xff] %vm3861_vm2, %v3097_v34  ;;  %4456 = vmatmul.msk.f32.gmra.mxu1 %vm2307_vm1, %v4747_v37  ;;  %v272_v34 = vld [vmem:[%s5289_s26 + $0x160] sm:$0xff] }
 0x11f   : > { %4748 = vtanh.f32 %v1330_v38  ;;  %4217 = vmatmul.msk.f32.gmra.mxu0 %vm489_vm0, %v262_v36 }
 0x123   : > { %v3099_v39 = vpop.f32.mrf.mxu1 }
 0x124   : > { %v3100_v40 = vadd.f32 %v5410_v26, %v3099_v39  ;;  %v1332_v41 = vpop.f32.mrf.mxu0 }
 0x125   : > { %v4749_v43 = vpop.eup %4748  ;;  %v1333_v44 = vadd.f32 %v5338_v21, %v1332_v41 }
 0x126   : > { %3864 = vst.msk [vmem:[%s5417_s16 + $0x10] sm:$0xff] %vm3861_vm2, %v3100_v40  ;;  %4457 = vmatmul.msk.f32.gmra.mxu1 %vm2307_vm1, %v4749_v43  ;;  %v273_v40 = vld [vmem:[%s5289_s26 + $0x168] sm:$0xff] }
 0x127   : > { %4750 = vtanh.f32 %v1333_v44  ;;  %4218 = vmatmul.msk.f32.gmra.mxu0 %vm489_vm0, %v263_v42 }
 0x12b   : > { %v3102_v45 = vpop.f32.mrf.mxu1 }
 0x12c   : > { %v3103_v46 = vadd.f32 %v5410_v26, %v3102_v45  ;;  %v1335_v47 = vpop.f32.mrf.mxu0 }
 0x12d   : > { %v4751_v49 = vpop.eup %4750  ;;  %v1336_v50 = vadd.f32 %v5338_v21, %v1335_v47 }
 0x12e   : > { %3865 = vst.msk [vmem:[%s5417_s16 + $0x18] sm:$0xff] %vm3861_vm2, %v3103_v46  ;;  %4458 = vmatmul.msk.f32.gmra.mxu1 %vm2307_vm1, %v4751_v49  ;;  %v274_v46 = vld [vmem:[%s5289_s26 + $0x170] sm:$0xff] }
 0x12f   : > { %4752 = vtanh.f32 %v1336_v50  ;;  %4219 = vmatmul.msk.f32.gmra.mxu0 %vm489_vm0, %v264_v48 }
 0x133   : > { %v3105_v51 = vpop.f32.mrf.mxu1 }
 0x134   : > { %v3106_v52 = vadd.f32 %v5410_v26, %v3105_v51  ;;  %v1338_v53 = vpop.f32.mrf.mxu0 }
 0x135   : > { %v4753_v55 = vpop.eup %4752  ;;  %v1339_v56 = vadd.f32 %v5338_v21, %v1338_v53 }
 0x136   : > { %3866 = vst.msk [vmem:[%s5417_s16 + $0x20] sm:$0xff] %vm3861_vm2, %v3106_v52  ;;  %4459 = vmatmul.msk.f32.gmra.mxu1 %vm2307_vm1, %v4753_v55  ;;  %v275_v52 = vld [vmem:[%s5289_s26 + $0x178] sm:$0xff] }
 0x137   : > { %4754 = vtanh.f32 %v1339_v56  ;;  %4220 = vmatmul.msk.f32.gmra.mxu0 %vm489_vm0, %v265_v54 }
 0x13b   : > { %v3108_v57 = vpop.f32.mrf.mxu1 }
 0x13c   : > { %v3109_v58 = vadd.f32 %v5410_v26, %v3108_v57  ;;  %v1341_v59 = vpop.f32.mrf.mxu0 }
 0x13d   : > { %v4755_v61 = vpop.eup %4754  ;;  %v1342_v62 = vadd.f32 %v5338_v21, %v1341_v59 }
 0x13e   : > { %3867 = vst.msk [vmem:[%s5417_s16 + $0x28] sm:$0xff] %vm3861_vm2, %v3109_v58  ;;  %4460 = vmatmul.msk.f32.gmra.mxu1 %vm2307_vm1, %v4755_v61  ;;  %v276_v58 = vld [vmem:[%s5289_s26 + $0x180] sm:$0xff] }
 0x13f   : > { %4756 = vtanh.f32 %v1342_v62  ;;  %4221 = vmatmul.msk.f32.gmra.mxu0 %vm489_vm0, %v266_v60 }
 0x143   : > { %v3111_v63 = vpop.f32.mrf.mxu1 }
 0x144   : > { %v3112_v0 = vadd.f32 %v5410_v26, %v3111_v63  ;;  %v1344_v1 = vpop.f32.mrf.mxu0 }
 0x145   : > { %v4757_v3 = vpop.eup %4756  ;;  %v1345_v4 = vadd.f32 %v5338_v21, %v1344_v1 }
 0x146   : > { %3868 = vst.msk [vmem:[%s5417_s16 + $0x30] sm:$0xff] %vm3861_vm2, %v3112_v0  ;;  %4461 = vmatmul.msk.f32.gmra.mxu1 %vm2307_vm1, %v4757_v3  ;;  %v277_v0 = vld [vmem:[%s5289_s26 + $0x188] sm:$0xff] }
 0x147   : > { %4758 = vtanh.f32 %v1345_v4  ;;  %4222 = vmatmul.msk.f32.gmra.mxu0 %vm489_vm0, %v267_v2 }
 0x14b   : > { %v3114_v5 = vpop.f32.mrf.mxu1 }
 0x14c   : > { %v3115_v6 = vadd.f32 %v5410_v26, %v3114_v5  ;;  %v1347_v7 = vpop.f32.mrf.mxu0 }
 0x14d   : > { %v4759_v9 = vpop.eup %4758  ;;  %v1348_v10 = vadd.f32 %v5338_v21, %v1347_v7 }
 0x14e   : > { %3869 = vst.msk [vmem:[%s5417_s16 + $0x38] sm:$0xff] %vm3861_vm2, %v3115_v6  ;;  %4462 = vmatmul.msk.f32.gmra.mxu1 %vm2307_vm1, %v4759_v9  ;;  %v278_v6 = vld [vmem:[%s5289_s26 + $0x190] sm:$0xff] }
 0x14f   : > { %4760 = vtanh.f32 %v1348_v10  ;;  %4223 = vmatmul.msk.f32.gmra.mxu0 %vm489_vm0, %v268_v8 }
 0x153   : > { %v3117_v11 = vpop.f32.mrf.mxu1 }
 0x154   : > { %v3118_v12 = vadd.f32 %v5410_v26, %v3117_v11  ;;  %v1350_v13 = vpop.f32.mrf.mxu0 }
 0x155   : > { %v4761_v15 = vpop.eup %4760  ;;  %v1351_v16 = vadd.f32 %v5338_v21, %v1350_v13 }
 0x156   : > { %3870 = vst.msk [vmem:[%s5417_s16 + $0x40] sm:$0xff] %vm3861_vm2, %v3118_v12  ;;  %4463 = vmatmul.msk.f32.gmra.mxu1 %vm2307_vm1, %v4761_v15  ;;  %v279_v12 = vld [vmem:[%s5289_s26 + $0x198] sm:$0xff] }
 0x157   : > { %4762 = vtanh.f32 %v1351_v16  ;;  %4224 = vmatmul.msk.f32.gmra.mxu0 %vm489_vm0, %v269_v14 }
 0x15b   : > { %v3120_v17 = vpop.f32.mrf.mxu1 }
 0x15c   : > { %v3121_v18 = vadd.f32 %v5410_v26, %v3120_v17  ;;  %v1353_v19 = vpop.f32.mrf.mxu0 }
 0x15d   : > { %v4763_v22 = vpop.eup %4762  ;;  %v1354_v23 = vadd.f32 %v5338_v21, %v1353_v19 }
 0x15e   : > { %3871 = vst.msk [vmem:[%s5417_s16 + $0x48] sm:$0xff] %vm3861_vm2, %v3121_v18  ;;  %4464 = vmatmul.msk.f32.gmra.mxu1 %vm2307_vm1, %v4763_v22  ;;  %v280_v18 = vld [vmem:[%s5289_s26 + $0x1a0] sm:$0xff] }
 0x15f   : > { %4764 = vtanh.f32 %v1354_v23  ;;  %4225 = vmatmul.msk.f32.gmra.mxu0 %vm489_vm0, %v270_v20 }
 0x163   : > { %v3123_v24 = vpop.f32.mrf.mxu1 }
 0x164   : > { %v3124_v25 = vadd.f32 %v5410_v26, %v3123_v24  ;;  %v1356_v27 = vpop.f32.mrf.mxu0 }
 0x165   : > { %v4765_v29 = vpop.eup %4764  ;;  %v1357_v30 = vadd.f32 %v5338_v21, %v1356_v27 }
 0x166   : > { %3872 = vst.msk [vmem:[%s5417_s16 + $0x50] sm:$0xff] %vm3861_vm2, %v3124_v25  ;;  %4465 = vmatmul.msk.f32.gmra.mxu1 %vm2307_vm1, %v4765_v29  ;;  %v281_v25 = vld [vmem:[%s5289_s26 + $0x1a8] sm:$0xff] }
 0x167   : > { %4766 = vtanh.f32 %v1357_v30  ;;  %4226 = vmatmul.msk.f32.gmra.mxu0 %vm489_vm0, %v271_v28 }
 0x16b   : > { %v3126_v31 = vpop.f32.mrf.mxu1 }
 0x16c   : > { %v3127_v32 = vadd.f32 %v5410_v26, %v3126_v31  ;;  %v1359_v33 = vpop.f32.mrf.mxu0 }
 0x16d   : > { %v4767_v35 = vpop.eup %4766  ;;  %v1360_v36 = vadd.f32 %v5338_v21, %v1359_v33 }
 0x16e   : > { %3873 = vst.msk [vmem:[%s5417_s16 + $0x58] sm:$0xff] %vm3861_vm2, %v3127_v32  ;;  %4466 = vmatmul.msk.f32.gmra.mxu1 %vm2307_vm1, %v4767_v35  ;;  %v282_v32 = vld [vmem:[%s5289_s26 + $0x1b0] sm:$0xff] }
 0x16f   : > { %4768 = vtanh.f32 %v1360_v36  ;;  %4227 = vmatmul.msk.f32.gmra.mxu0 %vm489_vm0, %v272_v34 }
 0x173   : > { %v3129_v37 = vpop.f32.mrf.mxu1 }
 0x174   : > { %v3130_v38 = vadd.f32 %v5410_v26, %v3129_v37  ;;  %v1362_v39 = vpop.f32.mrf.mxu0 }
 0x175   : > { %v4769_v41 = vpop.eup %4768  ;;  %v1363_v42 = vadd.f32 %v5338_v21, %v1362_v39 }
 0x176   : > { %3874 = vst.msk [vmem:[%s5417_s16 + $0x60] sm:$0xff] %vm3861_vm2, %v3130_v38  ;;  %4467 = vmatmul.msk.f32.gmra.mxu1 %vm2307_vm1, %v4769_v41  ;;  %v283_v38 = vld [vmem:[%s5289_s26 + $0x1b8] sm:$0xff] }
 0x177   : > { %4770 = vtanh.f32 %v1363_v42  ;;  %4228 = vmatmul.msk.f32.gmra.mxu0 %vm489_vm0, %v273_v40 }
 0x17b   : > { %v3132_v43 = vpop.f32.mrf.mxu1 }
 0x17c   : > { %v3133_v44 = vadd.f32 %v5410_v26, %v3132_v43  ;;  %v1365_v45 = vpop.f32.mrf.mxu0 }
 0x17d   : > { %v4771_v47 = vpop.eup %4770  ;;  %v1366_v48 = vadd.f32 %v5338_v21, %v1365_v45 }
 0x17e   : > { %3875 = vst.msk [vmem:[%s5417_s16 + $0x68] sm:$0xff] %vm3861_vm2, %v3133_v44  ;;  %4468 = vmatmul.msk.f32.gmra.mxu1 %vm2307_vm1, %v4771_v47  ;;  %v284_v44 = vld [vmem:[%s5289_s26 + $0x1c0] sm:$0xff] }
 0x17f   : > { %4772 = vtanh.f32 %v1366_v48  ;;  %4229 = vmatmul.msk.f32.gmra.mxu0 %vm489_vm0, %v274_v46 }
 0x183   : > { %v3135_v49 = vpop.f32.mrf.mxu1 }
 0x184   : > { %v3136_v50 = vadd.f32 %v5410_v26, %v3135_v49  ;;  %v1368_v51 = vpop.f32.mrf.mxu0 }
 0x185   : > { %v4773_v53 = vpop.eup %4772  ;;  %v1369_v54 = vadd.f32 %v5338_v21, %v1368_v51 }
 0x186   : > { %3876 = vst.msk [vmem:[%s5417_s16 + $0x70] sm:$0xff] %vm3861_vm2, %v3136_v50  ;;  %4469 = vmatmul.msk.f32.gmra.mxu1 %vm2307_vm1, %v4773_v53  ;;  %v285_v50 = vld [vmem:[%s5289_s26 + $0x1c8] sm:$0xff] }
 0x187   : > { %4774 = vtanh.f32 %v1369_v54  ;;  %4230 = vmatmul.msk.f32.gmra.mxu0 %vm489_vm0, %v275_v52 }
 0x18b   : > { %v3138_v55 = vpop.f32.mrf.mxu1 }
 0x18c   : > { %v3139_v56 = vadd.f32 %v5410_v26, %v3138_v55  ;;  %v1371_v57 = vpop.f32.mrf.mxu0 }
 0x18d   : > { %v4775_v59 = vpop.eup %4774  ;;  %v1372_v60 = vadd.f32 %v5338_v21, %v1371_v57 }
 0x18e   : > { %3877 = vst.msk [vmem:[%s5417_s16 + $0x78] sm:$0xff] %vm3861_vm2, %v3139_v56  ;;  %4470 = vmatmul.msk.f32.gmra.mxu1 %vm2307_vm1, %v4775_v59  ;;  %v286_v56 = vld [vmem:[%s5289_s26 + $0x1d0] sm:$0xff] }
 0x18f   : > { %4776 = vtanh.f32 %v1372_v60  ;;  %4231 = vmatmul.msk.f32.gmra.mxu0 %vm489_vm0, %v276_v58 }
 0x193   : > { %v3141_v61 = vpop.f32.mrf.mxu1 }
 0x194   : > { %v3142_v62 = vadd.f32 %v5410_v26, %v3141_v61  ;;  %v1374_v63 = vpop.f32.mrf.mxu0 }
 0x195   : > { %v4777_v1 = vpop.eup %4776  ;;  %v1375_v2 = vadd.f32 %v5338_v21, %v1374_v63 }
 0x196   : > { %3878 = vst.msk [vmem:[%s5417_s16 + $0x80] sm:$0xff] %vm3861_vm2, %v3142_v62  ;;  %4471 = vmatmul.msk.f32.gmra.mxu1 %vm2307_vm1, %v4777_v1  ;;  %v287_v62 = vld [vmem:[%s5289_s26 + $0x1d8] sm:$0xff] }
 0x197   : > { %4778 = vtanh.f32 %v1375_v2  ;;  %4232 = vmatmul.msk.f32.gmra.mxu0 %vm489_vm0, %v277_v0 }
 0x19b   : > { %v3144_v3 = vpop.f32.mrf.mxu1 }
 0x19c   : > { %v3145_v4 = vadd.f32 %v5410_v26, %v3144_v3  ;;  %v1377_v5 = vpop.f32.mrf.mxu0 }
 0x19d   : > { %v4779_v7 = vpop.eup %4778  ;;  %v1378_v8 = vadd.f32 %v5338_v21, %v1377_v5 }
 0x19e   : > { %3879 = vst.msk [vmem:[%s5417_s16 + $0x88] sm:$0xff] %vm3861_vm2, %v3145_v4  ;;  %4472 = vmatmul.msk.f32.gmra.mxu1 %vm2307_vm1, %v4779_v7  ;;  %v288_v4 = vld [vmem:[%s5289_s26 + $0x1e0] sm:$0xff] }
 0x19f   : > { %4780 = vtanh.f32 %v1378_v8  ;;  %4233 = vmatmul.msk.f32.gmra.mxu0 %vm489_vm0, %v278_v6 }
 0x1a3   : > { %v3147_v9 = vpop.f32.mrf.mxu1 }
 0x1a4   : > { %v3148_v10 = vadd.f32 %v5410_v26, %v3147_v9  ;;  %v1380_v11 = vpop.f32.mrf.mxu0 }
 0x1a5   : > { %v4781_v13 = vpop.eup %4780  ;;  %v1381_v14 = vadd.f32 %v5338_v21, %v1380_v11 }
 0x1a6   : > { %3880 = vst.msk [vmem:[%s5417_s16 + $0x90] sm:$0xff] %vm3861_vm2, %v3148_v10  ;;  %4473 = vmatmul.msk.f32.gmra.mxu1 %vm2307_vm1, %v4781_v13  ;;  %v289_v10 = vld [vmem:[%s5289_s26 + $0x1e8] sm:$0xff] }
 0x1a7   : > { %4782 = vtanh.f32 %v1381_v14  ;;  %4234 = vmatmul.msk.f32.gmra.mxu0 %vm489_vm0, %v279_v12 }
 0x1ab   : > { %v3150_v15 = vpop.f32.mrf.mxu1 }
 0x1ac   : > { %v3151_v16 = vadd.f32 %v5410_v26, %v3150_v15  ;;  %v1383_v17 = vpop.f32.mrf.mxu0 }
 0x1ad   : > { %v4783_v19 = vpop.eup %4782  ;;  %v1384_v20 = vadd.f32 %v5338_v21, %v1383_v17 }
 0x1ae   : > { %3881 = vst.msk [vmem:[%s5417_s16 + $0x98] sm:$0xff] %vm3861_vm2, %v3151_v16  ;;  %4474 = vmatmul.msk.f32.gmra.mxu1 %vm2307_vm1, %v4783_v19  ;;  %v290_v16 = vld [vmem:[%s5289_s26 + $0x1f0] sm:$0xff] }
 0x1af   : > { %4784 = vtanh.f32 %v1384_v20  ;;  %4235 = vmatmul.msk.f32.gmra.mxu0 %vm489_vm0, %v280_v18 }
 0x1b3   : > { %v3153_v22 = vpop.f32.mrf.mxu1 }
 0x1b4   : > { %v3154_v23 = vadd.f32 %v5410_v26, %v3153_v22  ;;  %v1386_v24 = vpop.f32.mrf.mxu0 }
 0x1b5   : > { %v4785_v27 = vpop.eup %4784  ;;  %v1387_v28 = vadd.f32 %v5338_v21, %v1386_v24 }
 0x1b6   : > { %3882 = vst.msk [vmem:[%s5417_s16 + $0xa0] sm:$0xff] %vm3861_vm2, %v3154_v23  ;;  %4475 = vmatmul.msk.f32.gmra.mxu1 %vm2307_vm1, %v4785_v27  ;;  %v291_v23 = vld [vmem:[%s5289_s26 + $0x1f8] sm:$0xff] }
 0x1b7   : > { %4786 = vtanh.f32 %v1387_v28  ;;  %4236 = vmatmul.msk.f32.gmra.mxu0 %vm489_vm0, %v281_v25 }
 0x1bb   : > { %v3156_v29 = vpop.f32.mrf.mxu1 }
 0x1bc   : > { %v3157_v30 = vadd.f32 %v5410_v26, %v3156_v29  ;;  %v1389_v31 = vpop.f32.mrf.mxu0 }
 0x1bd   : > { %v4787_v33 = vpop.eup %4786  ;;  %v1390_v34 = vadd.f32 %v5338_v21, %v1389_v31 }
 0x1be   : > { %3883 = vst.msk [vmem:[%s5417_s16 + $0xa8] sm:$0xff] %vm3861_vm2, %v3157_v30  ;;  %4476 = vmatmul.msk.f32.gmra.mxu1 %vm2307_vm1, %v4787_v33  ;;  %v292_v30 = vld [vmem:[%s5289_s26 + $0x200] sm:$0xff] }
 0x1bf   : > { %4788 = vtanh.f32 %v1390_v34  ;;  %4237 = vmatmul.msk.f32.gmra.mxu0 %vm489_vm0, %v282_v32 }
 0x1c3   : > { %v3159_v35 = vpop.f32.mrf.mxu1 }
 0x1c4   : > { %v3160_v36 = vadd.f32 %v5410_v26, %v3159_v35  ;;  %v1392_v37 = vpop.f32.mrf.mxu0 }
 0x1c5   : > { %v4789_v39 = vpop.eup %4788  ;;  %v1393_v40 = vadd.f32 %v5338_v21, %v1392_v37 }
 0x1c6   : > { %3884 = vst.msk [vmem:[%s5417_s16 + $0xb0] sm:$0xff] %vm3861_vm2, %v3160_v36  ;;  %4477 = vmatmul.msk.f32.gmra.mxu1 %vm2307_vm1, %v4789_v39  ;;  %v293_v36 = vld [vmem:[%s5289_s26 + $0x208] sm:$0xff] }
 0x1c7   : > { %4790 = vtanh.f32 %v1393_v40  ;;  %4238 = vmatmul.msk.f32.gmra.mxu0 %vm489_vm0, %v283_v38 }
 0x1cb   : > { %v3162_v41 = vpop.f32.mrf.mxu1 }
 0x1cc   : > { %v3163_v42 = vadd.f32 %v5410_v26, %v3162_v41  ;;  %v1395_v43 = vpop.f32.mrf.mxu0 }
 0x1cd   : > { %v4791_v45 = vpop.eup %4790  ;;  %v1396_v46 = vadd.f32 %v5338_v21, %v1395_v43 }
 0x1ce   : > { %3885 = vst.msk [vmem:[%s5417_s16 + $0xb8] sm:$0xff] %vm3861_vm2, %v3163_v42  ;;  %4478 = vmatmul.msk.f32.gmra.mxu1 %vm2307_vm1, %v4791_v45  ;;  %v294_v42 = vld [vmem:[%s5289_s26 + $0x210] sm:$0xff] }
 0x1cf   : > { %4792 = vtanh.f32 %v1396_v46  ;;  %4239 = vmatmul.msk.f32.gmra.mxu0 %vm489_vm0, %v284_v44 }
 0x1d3   : > { %v3165_v47 = vpop.f32.mrf.mxu1 }
 0x1d4   : > { %v3166_v48 = vadd.f32 %v5410_v26, %v3165_v47  ;;  %v1398_v49 = vpop.f32.mrf.mxu0 }
 0x1d5   : > { %v4793_v51 = vpop.eup %4792  ;;  %v1399_v52 = vadd.f32 %v5338_v21, %v1398_v49 }
 0x1d6   : > { %3886 = vst.msk [vmem:[%s5417_s16 + $0xc0] sm:$0xff] %vm3861_vm2, %v3166_v48  ;;  %4479 = vmatmul.msk.f32.gmra.mxu1 %vm2307_vm1, %v4793_v51  ;;  %v295_v48 = vld [vmem:[%s5289_s26 + $0x218] sm:$0xff] }
 0x1d7   : > { %4794 = vtanh.f32 %v1399_v52  ;;  %4240 = vmatmul.msk.f32.gmra.mxu0 %vm489_vm0, %v285_v50 }
 0x1db   : > { %v3168_v53 = vpop.f32.mrf.mxu1 }
 0x1dc   : > { %v3169_v54 = vadd.f32 %v5410_v26, %v3168_v53  ;;  %v1401_v55 = vpop.f32.mrf.mxu0 }
 0x1dd   : > { %v4795_v57 = vpop.eup %4794  ;;  %v1402_v58 = vadd.f32 %v5338_v21, %v1401_v55 }
 0x1de   : > { %3887 = vst.msk [vmem:[%s5417_s16 + $0xc8] sm:$0xff] %vm3861_vm2, %v3169_v54  ;;  %4480 = vmatmul.msk.f32.gmra.mxu1 %vm2307_vm1, %v4795_v57  ;;  %v296_v54 = vld [vmem:[%s5289_s26 + $0x220] sm:$0xff] }
 0x1df   : > { %4796 = vtanh.f32 %v1402_v58  ;;  %4241 = vmatmul.msk.f32.gmra.mxu0 %vm489_vm0, %v286_v56 }
 0x1e3   : > { %v3171_v59 = vpop.f32.mrf.mxu1 }
 0x1e4   : > { %v3172_v60 = vadd.f32 %v5410_v26, %v3171_v59  ;;  %v1404_v61 = vpop.f32.mrf.mxu0 }
 0x1e5   : > { %v4797_v63 = vpop.eup %4796  ;;  %v1405_v0 = vadd.f32 %v5338_v21, %v1404_v61 }
 0x1e6   : > { %3888 = vst.msk [vmem:[%s5417_s16 + $0xd0] sm:$0xff] %vm3861_vm2, %v3172_v60  ;;  %4481 = vmatmul.msk.f32.gmra.mxu1 %vm2307_vm1, %v4797_v63  ;;  %v297_v60 = vld [vmem:[%s5289_s26 + $0x228] sm:$0xff] }
 0x1e7   : > { %4798 = vtanh.f32 %v1405_v0  ;;  %4242 = vmatmul.msk.f32.gmra.mxu0 %vm489_vm0, %v287_v62 }
 0x1eb   : > { %v3174_v1 = vpop.f32.mrf.mxu1 }
 0x1ec   : > { %v3175_v2 = vadd.f32 %v5410_v26, %v3174_v1  ;;  %v1407_v3 = vpop.f32.mrf.mxu0 }
 0x1ed   : > { %v4799_v5 = vpop.eup %4798  ;;  %v1408_v6 = vadd.f32 %v5338_v21, %v1407_v3 }
 0x1ee   : > { %3889 = vst.msk [vmem:[%s5417_s16 + $0xd8] sm:$0xff] %vm3861_vm2, %v3175_v2  ;;  %4482 = vmatmul.msk.f32.gmra.mxu1 %vm2307_vm1, %v4799_v5  ;;  %v298_v2 = vld [vmem:[%s5289_s26 + $0x230] sm:$0xff] }
 0x1ef   : > { %4800 = vtanh.f32 %v1408_v6  ;;  %4243 = vmatmul.msk.f32.gmra.mxu0 %vm489_vm0, %v288_v4 }
 0x1f3   : > { %v3177_v7 = vpop.f32.mrf.mxu1 }
 0x1f4   : > { %v3178_v8 = vadd.f32 %v5410_v26, %v3177_v7  ;;  %v1410_v9 = vpop.f32.mrf.mxu0 }
 0x1f5   : > { %v4801_v11 = vpop.eup %4800  ;;  %v1411_v12 = vadd.f32 %v5338_v21, %v1410_v9 }
 0x1f6   : > { %3890 = vst.msk [vmem:[%s5417_s16 + $0xe0] sm:$0xff] %vm3861_vm2, %v3178_v8  ;;  %4483 = vmatmul.msk.f32.gmra.mxu1 %vm2307_vm1, %v4801_v11  ;;  %v299_v8 = vld [vmem:[%s5289_s26 + $0x238] sm:$0xff] }
 0x1f7   : > { %4802 = vtanh.f32 %v1411_v12  ;;  %4244 = vmatmul.msk.f32.gmra.mxu0 %vm489_vm0, %v289_v10 }
 0x1fb   : > { %v3180_v13 = vpop.f32.mrf.mxu1 }
 0x1fc   : > { %v3181_v14 = vadd.f32 %v5410_v26, %v3180_v13  ;;  %v1413_v15 = vpop.f32.mrf.mxu0 }
 0x1fd   : > { %v4803_v17 = vpop.eup %4802  ;;  %v1414_v18 = vadd.f32 %v5338_v21, %v1413_v15 }
 0x1fe   : > { %3891 = vst.msk [vmem:[%s5417_s16 + $0xe8] sm:$0xff] %vm3861_vm2, %v3181_v14  ;;  %4484 = vmatmul.msk.f32.gmra.mxu1 %vm2307_vm1, %v4803_v17  ;;  %v300_v14 = vld [vmem:[%s5289_s26 + $0x240] sm:$0xff] }
 0x1ff   : > { %4804 = vtanh.f32 %v1414_v18  ;;  %4245 = vmatmul.msk.f32.gmra.mxu0 %vm489_vm0, %v290_v16  ;;  %v5697_v16 = vld [vmem:[%s7157_s2] ss:$0 sm:$0xff] }
 0x203   : > { %v3183_v19 = vpop.f32.mrf.mxu1 }
 0x204   : > { %v3184_v20 = vadd.f32 %v5410_v26, %v3183_v19  ;;  %v1416_v22 = vpop.f32.mrf.mxu0 }
 0x205   : > { %v4805_v24 = vpop.eup %4804  ;;  %v1417_v25 = vadd.f32 %v5338_v21, %v1416_v22 }
 0x206   : > { %3892 = vst.msk [vmem:[%s5417_s16 + $0xf0] sm:$0xff] %vm3861_vm2, %v3184_v20  ;;  %4485 = vmatmul.msk.f32.gmra.mxu1 %vm2307_vm1, %v4805_v24  ;;  %v301_v20 = vld [vmem:[%s5289_s26 + $0x248] sm:$0xff] }
 0x207   : > { %4806 = vtanh.f32 %v1417_v25  ;;  %4246 = vmatmul.msk.f32.gmra.mxu0 %vm489_vm0, %v291_v23 }
 0x20b   : > { %v3186_v27 = vpop.f32.mrf.mxu1 }
 0x20c   : > { %v3187_v28 = vadd.f32 %v5410_v26, %v3186_v27  ;;  %v1419_v29 = vpop.f32.mrf.mxu0 }
 0x20d   : > { %v4807_v31 = vpop.eup %4806  ;;  %v1420_v32 = vadd.f32 %v5338_v21, %v1419_v29 }
 0x20e   : > { %3893 = vst.msk [vmem:[%s5417_s16 + $0xf8] sm:$0xff] %vm3861_vm2, %v3187_v28  ;;  %4486 = vmatmul.msk.f32.gmra.mxu1 %vm2307_vm1, %v4807_v31  ;;  %v302_v28 = vld [vmem:[%s5289_s26 + $0x250] sm:$0xff] }
 0x20f   : > { %4808 = vtanh.f32 %v1420_v32  ;;  %4247 = vmatmul.msk.f32.gmra.mxu0 %vm489_vm0, %v292_v30 }
 0x213   : > { %v3189_v33 = vpop.f32.mrf.mxu1 }
 0x214   : > { %v3190_v34 = vadd.f32 %v5410_v26, %v3189_v33  ;;  %v1422_v35 = vpop.f32.mrf.mxu0 }
 0x215   : > { %v4809_v37 = vpop.eup %4808  ;;  %v1423_v38 = vadd.f32 %v5338_v21, %v1422_v35 }
 0x216   : > { %3894 = vst.msk [vmem:[%s5417_s16 + $0x100] sm:$0xff] %vm3861_vm2, %v3190_v34  ;;  %4487 = vmatmul.msk.f32.gmra.mxu1 %vm2307_vm1, %v4809_v37  ;;  %v303_v34 = vld [vmem:[%s5289_s26 + $0x258] sm:$0xff] }
 0x217   : > { %4810 = vtanh.f32 %v1423_v38  ;;  %4248 = vmatmul.msk.f32.gmra.mxu0 %vm489_vm0, %v293_v36 }
 0x21b   : > { %v3192_v39 = vpop.f32.mrf.mxu1 }
 0x21c   : > { %v3193_v40 = vadd.f32 %v5410_v26, %v3192_v39  ;;  %v1425_v41 = vpop.f32.mrf.mxu0 }
 0x21d   : > { %v4811_v43 = vpop.eup %4810  ;;  %v1426_v44 = vadd.f32 %v5338_v21, %v1425_v41 }
 0x21e   : > { %3895 = vst.msk [vmem:[%s5417_s16 + $0x108] sm:$0xff] %vm3861_vm2, %v3193_v40  ;;  %4488 = vmatmul.msk.f32.gmra.mxu1 %vm2307_vm1, %v4811_v43  ;;  %v304_v40 = vld [vmem:[%s5289_s26 + $0x260] sm:$0xff] }
 0x21f   : > { %4812 = vtanh.f32 %v1426_v44  ;;  %4249 = vmatmul.msk.f32.gmra.mxu0 %vm489_vm0, %v294_v42 }
 0x223   : > { %v3195_v45 = vpop.f32.mrf.mxu1 }
 0x224   : > { %v3196_v46 = vadd.f32 %v5410_v26, %v3195_v45  ;;  %v1428_v47 = vpop.f32.mrf.mxu0 }
 0x225   : > { %v4813_v49 = vpop.eup %4812  ;;  %v1429_v50 = vadd.f32 %v5338_v21, %v1428_v47 }
 0x226   : > { %3896 = vst.msk [vmem:[%s5417_s16 + $0x110] sm:$0xff] %vm3861_vm2, %v3196_v46  ;;  %4489 = vmatmul.msk.f32.gmra.mxu1 %vm2307_vm1, %v4813_v49  ;;  %v305_v46 = vld [vmem:[%s5289_s26 + $0x268] sm:$0xff] }
 0x227   : > { %4814 = vtanh.f32 %v1429_v50  ;;  %4250 = vmatmul.msk.f32.gmra.mxu0 %vm489_vm0, %v295_v48 }
 0x22b   : > { %v3198_v51 = vpop.f32.mrf.mxu1 }
 0x22c   : > { %v3199_v52 = vadd.f32 %v5410_v26, %v3198_v51  ;;  %v1431_v53 = vpop.f32.mrf.mxu0 }
 0x22d   : > { %v4815_v55 = vpop.eup %4814  ;;  %v1432_v56 = vadd.f32 %v5338_v21, %v1431_v53 }
 0x22e   : > { %3897 = vst.msk [vmem:[%s5417_s16 + $0x118] sm:$0xff] %vm3861_vm2, %v3199_v52  ;;  %4490 = vmatmul.msk.f32.gmra.mxu1 %vm2307_vm1, %v4815_v55  ;;  %v306_v52 = vld [vmem:[%s5289_s26 + $0x270] sm:$0xff] }
 0x22f   : > { %4816 = vtanh.f32 %v1432_v56  ;;  %4251 = vmatmul.msk.f32.gmra.mxu0 %vm489_vm0, %v296_v54 }
 0x233   : > { %v3201_v57 = vpop.f32.mrf.mxu1 }
 0x234   : > { %v3202_v58 = vadd.f32 %v5410_v26, %v3201_v57  ;;  %v1434_v59 = vpop.f32.mrf.mxu0 }
 0x235   : > { %v4817_v61 = vpop.eup %4816  ;;  %v1435_v62 = vadd.f32 %v5338_v21, %v1434_v59 }
 0x236   : > { %3898 = vst.msk [vmem:[%s5417_s16 + $0x120] sm:$0xff] %vm3861_vm2, %v3202_v58  ;;  %4491 = vmatmul.msk.f32.gmra.mxu1 %vm2307_vm1, %v4817_v61  ;;  %v307_v58 = vld [vmem:[%s5289_s26 + $0x278] sm:$0xff] }
 0x237   : > { %4818 = vtanh.f32 %v1435_v62  ;;  %4252 = vmatmul.msk.f32.gmra.mxu0 %vm489_vm0, %v297_v60 }
 0x23b   : > { %v3204_v63 = vpop.f32.mrf.mxu1 }
 0x23c   : > { %v3205_v0 = vadd.f32 %v5410_v26, %v3204_v63  ;;  %v1437_v1 = vpop.f32.mrf.mxu0 }
 0x23d   : > { %v4819_v3 = vpop.eup %4818  ;;  %v1438_v4 = vadd.f32 %v5338_v21, %v1437_v1 }
 0x23e   : > { %3899 = vst.msk [vmem:[%s5417_s16 + $0x128] sm:$0xff] %vm3861_vm2, %v3205_v0  ;;  %4492 = vmatmul.msk.f32.gmra.mxu1 %vm2307_vm1, %v4819_v3  ;;  %v308_v0 = vld [vmem:[%s5289_s26 + $0x280] sm:$0xff] }
 0x23f   : > { %4820 = vtanh.f32 %v1438_v4  ;;  %4253 = vmatmul.msk.f32.gmra.mxu0 %vm489_vm0, %v298_v2 }
 0x243   : > { %v3207_v5 = vpop.f32.mrf.mxu1 }
 0x244   : > { %v3208_v6 = vadd.f32 %v5410_v26, %v3207_v5  ;;  %v1440_v7 = vpop.f32.mrf.mxu0 }
 0x245   : > { %v4821_v9 = vpop.eup %4820  ;;  %v1441_v10 = vadd.f32 %v5338_v21, %v1440_v7 }
 0x246   : > { %3900 = vst.msk [vmem:[%s5417_s16 + $0x130] sm:$0xff] %vm3861_vm2, %v3208_v6  ;;  %4493 = vmatmul.msk.f32.gmra.mxu1 %vm2307_vm1, %v4821_v9  ;;  %v309_v6 = vld [vmem:[%s5289_s26 + $0x288] sm:$0xff] }
 0x247   : > { %4822 = vtanh.f32 %v1441_v10  ;;  %4254 = vmatmul.msk.f32.gmra.mxu0 %vm489_vm0, %v299_v8 }
 0x24b   : > { %v3210_v11 = vpop.f32.mrf.mxu1 }
 0x24c   : > { %v3211_v12 = vadd.f32 %v5410_v26, %v3210_v11  ;;  %v1443_v13 = vpop.f32.mrf.mxu0 }
 0x24d   : > { %v4823_v15 = vpop.eup %4822  ;;  %v1444_v21 = vadd.f32 %v5697_v16, %v1443_v13 }
 0x24e   : > { %3901 = vst.msk [vmem:[%s5417_s16 + $0x138] sm:$0xff] %vm3861_vm2, %v3211_v12  ;;  %4494 = vmatmul.msk.f32.gmra.mxu1 %vm2307_vm1, %v4823_v15  ;;  %v310_v12 = vld [vmem:[%s5289_s26 + $0x290] sm:$0xff] }
 0x24f   : > { %4824 = vtanh.f32 %v1444_v21  ;;  %4255 = vmatmul.msk.f32.gmra.mxu0 %vm489_vm0, %v300_v14 }
 0x253   : > { %v3213_v17 = vpop.f32.mrf.mxu1 }
 0x254   : > { %v3214_v18 = vadd.f32 %v5410_v26, %v3213_v17  ;;  %v1446_v19 = vpop.f32.mrf.mxu0 }
 0x255   : > { %v4825_v22 = vpop.eup %4824  ;;  %v1447_v23 = vadd.f32 %v5697_v16, %v1446_v19 }
 0x256   : > { %3902 = vst.msk [vmem:[%s5417_s16 + $0x140] sm:$0xff] %vm3861_vm2, %v3214_v18  ;;  %4495 = vmatmul.msk.f32.gmra.mxu1 %vm2307_vm1, %v4825_v22  ;;  %v311_v18 = vld [vmem:[%s5289_s26 + $0x298] sm:$0xff] }
 0x257   : > { %4826 = vtanh.f32 %v1447_v23  ;;  %4256 = vmatmul.msk.f32.gmra.mxu0 %vm489_vm0, %v301_v20  ;;  %v5784_v23 = vld [vmem:[%s7159_s4] ss:$0 sm:$0xff] }
 0x25b   : > { %v3216_v24 = vpop.f32.mrf.mxu1 }
 0x25c   : > { %v3217_v25 = vadd.f32 %v5410_v26, %v3216_v24  ;;  %v1449_v27 = vpop.f32.mrf.mxu0 }
 0x25d   : > { %v4827_v29 = vpop.eup %4826  ;;  %v1450_v30 = vadd.f32 %v5697_v16, %v1449_v27 }
 0x25e   : > { %3903 = vst.msk [vmem:[%s5417_s16 + $0x148] sm:$0xff] %vm3861_vm2, %v3217_v25  ;;  %4496 = vmatmul.msk.f32.gmra.mxu1 %vm2307_vm1, %v4827_v29  ;;  %v312_v25 = vld [vmem:[%s5289_s26 + $0x2a0] sm:$0xff] }
 0x25f   : > { %4828 = vtanh.f32 %v1450_v30  ;;  %4257 = vmatmul.msk.f32.gmra.mxu0 %vm489_vm0, %v302_v28 }
 0x263   : > { %v3219_v31 = vpop.f32.mrf.mxu1 }
 0x264   : > { %v3220_v32 = vadd.f32 %v5410_v26, %v3219_v31  ;;  %v1452_v33 = vpop.f32.mrf.mxu0 }
 0x265   : > { %v4829_v35 = vpop.eup %4828  ;;  %v1453_v36 = vadd.f32 %v5697_v16, %v1452_v33 }
 0x266   : > { %3904 = vst.msk [vmem:[%s5417_s16 + $0x150] sm:$0xff] %vm3861_vm2, %v3220_v32  ;;  %4497 = vmatmul.msk.f32.gmra.mxu1 %vm2307_vm1, %v4829_v35  ;;  %v313_v32 = vld [vmem:[%s5289_s26 + $0x2a8] sm:$0xff] }
 0x267   : > { %4830 = vtanh.f32 %v1453_v36  ;;  %4258 = vmatmul.msk.f32.gmra.mxu0 %vm489_vm0, %v303_v34 }
 0x26b   : > { %v3222_v37 = vpop.f32.mrf.mxu1 }
 0x26c   : > { %v3223_v38 = vadd.f32 %v5410_v26, %v3222_v37  ;;  %v1455_v39 = vpop.f32.mrf.mxu0 }
 0x26d   : > { %v4831_v41 = vpop.eup %4830  ;;  %v1456_v42 = vadd.f32 %v5697_v16, %v1455_v39 }
 0x26e   : > { %3905 = vst.msk [vmem:[%s5417_s16 + $0x158] sm:$0xff] %vm3861_vm2, %v3223_v38  ;;  %4498 = vmatmul.msk.f32.gmra.mxu1 %vm2307_vm1, %v4831_v41  ;;  %v314_v38 = vld [vmem:[%s5289_s26 + $0x2b0] sm:$0xff] }
 0x26f   : > { %4832 = vtanh.f32 %v1456_v42  ;;  %4259 = vmatmul.msk.f32.gmra.mxu0 %vm489_vm0, %v304_v40 }
 0x273   : > { %v3225_v43 = vpop.f32.mrf.mxu1 }
 0x274   : > { %v3226_v44 = vadd.f32 %v5410_v26, %v3225_v43  ;;  %v1458_v45 = vpop.f32.mrf.mxu0 }
 0x275   : > { %v4833_v47 = vpop.eup %4832  ;;  %v1459_v48 = vadd.f32 %v5697_v16, %v1458_v45 }
 0x276   : > { %3906 = vst.msk [vmem:[%s5417_s16 + $0x160] sm:$0xff] %vm3861_vm2, %v3226_v44  ;;  %4499 = vmatmul.msk.f32.gmra.mxu1 %vm2307_vm1, %v4833_v47  ;;  %v315_v44 = vld [vmem:[%s5289_s26 + $0x2b8] sm:$0xff] }
 0x277   : > { %4834 = vtanh.f32 %v1459_v48  ;;  %4260 = vmatmul.msk.f32.gmra.mxu0 %vm489_vm0, %v305_v46 }
 0x27b   : > { %v3228_v49 = vpop.f32.mrf.mxu1 }
 0x27c   : > { %v3229_v50 = vadd.f32 %v5410_v26, %v3228_v49  ;;  %v1461_v51 = vpop.f32.mrf.mxu0 }
 0x27d   : > { %v4835_v53 = vpop.eup %4834  ;;  %v1462_v54 = vadd.f32 %v5697_v16, %v1461_v51 }
 0x27e   : > { %3907 = vst.msk [vmem:[%s5417_s16 + $0x168] sm:$0xff] %vm3861_vm2, %v3229_v50  ;;  %4500 = vmatmul.msk.f32.gmra.mxu1 %vm2307_vm1, %v4835_v53  ;;  %v316_v50 = vld [vmem:[%s5289_s26 + $0x2c0] sm:$0xff] }
 0x27f   : > { %4836 = vtanh.f32 %v1462_v54  ;;  %4261 = vmatmul.msk.f32.gmra.mxu0 %vm489_vm0, %v306_v52 }
 0x283   : > { %v3231_v55 = vpop.f32.mrf.mxu1 }
 0x284   : > { %v3232_v56 = vadd.f32 %v5410_v26, %v3231_v55  ;;  %v1464_v57 = vpop.f32.mrf.mxu0 }
 0x285   : > { %v4837_v59 = vpop.eup %4836  ;;  %v1465_v60 = vadd.f32 %v5697_v16, %v1464_v57 }
 0x286   : > { %3908 = vst.msk [vmem:[%s5417_s16 + $0x170] sm:$0xff] %vm3861_vm2, %v3232_v56  ;;  %4501 = vmatmul.msk.f32.gmra.mxu1 %vm2307_vm1, %v4837_v59  ;;  %v317_v56 = vld [vmem:[%s5289_s26 + $0x2c8] sm:$0xff] }
 0x287   : > { %4838 = vtanh.f32 %v1465_v60  ;;  %4262 = vmatmul.msk.f32.gmra.mxu0 %vm489_vm0, %v307_v58 }
 0x28b   : > { %v3234_v61 = vpop.f32.mrf.mxu1 }
 0x28c   : > { %v3235_v62 = vadd.f32 %v5410_v26, %v3234_v61  ;;  %v1467_v63 = vpop.f32.mrf.mxu0 }
 0x28d   : > { %v4839_v1 = vpop.eup %4838  ;;  %v1468_v2 = vadd.f32 %v5697_v16, %v1467_v63 }
 0x28e   : > { %3909 = vst.msk [vmem:[%s5417_s16 + $0x178] sm:$0xff] %vm3861_vm2, %v3235_v62  ;;  %4502 = vmatmul.msk.f32.gmra.mxu1 %vm2307_vm1, %v4839_v1  ;;  %v318_v62 = vld [vmem:[%s5289_s26 + $0x2d0] sm:$0xff] }
 0x28f   : > { %4840 = vtanh.f32 %v1468_v2  ;;  %4263 = vmatmul.msk.f32.gmra.mxu0 %vm489_vm0, %v308_v0 }
 0x293   : > { %v3237_v3 = vpop.f32.mrf.mxu1 }
 0x294   : > { %v3238_v4 = vadd.f32 %v5410_v26, %v3237_v3  ;;  %v1470_v5 = vpop.f32.mrf.mxu0 }
 0x295   : > { %v4841_v7 = vpop.eup %4840  ;;  %v1471_v8 = vadd.f32 %v5697_v16, %v1470_v5 }
 0x296   : > { %3910 = vst.msk [vmem:[%s5417_s16 + $0x180] sm:$0xff] %vm3861_vm2, %v3238_v4  ;;  %4503 = vmatmul.msk.f32.gmra.mxu1 %vm2307_vm1, %v4841_v7  ;;  %v319_v4 = vld [vmem:[%s5289_s26 + $0x2d8] sm:$0xff] }
 0x297   : > { %4842 = vtanh.f32 %v1471_v8  ;;  %4264 = vmatmul.msk.f32.gmra.mxu0 %vm489_vm0, %v309_v6 }
 0x29b   : > { %v3240_v9 = vpop.f32.mrf.mxu1 }
 0x29c   : > { %v3241_v10 = vadd.f32 %v5410_v26, %v3240_v9  ;;  %v1473_v11 = vpop.f32.mrf.mxu0 }
 0x29d   : > { %v4843_v13 = vpop.eup %4842  ;;  %v1474_v14 = vadd.f32 %v5697_v16, %v1473_v11 }
 0x29e   : > { %3911 = vst.msk [vmem:[%s5417_s16 + $0x188] sm:$0xff] %vm3861_vm2, %v3241_v10  ;;  %4504 = vmatmul.msk.f32.gmra.mxu1 %vm2307_vm1, %v4843_v13  ;;  %v320_v10 = vld [vmem:[%s5289_s26 + $0x2e0] sm:$0xff] }
 0x29f   : > { %4844 = vtanh.f32 %v1474_v14  ;;  %4265 = vmatmul.msk.f32.gmra.mxu0 %vm489_vm0, %v310_v12 }
 0x2a3   : > { %v3243_v15 = vpop.f32.mrf.mxu1 }
 0x2a4   : > { %v3244_v21 = vadd.f32 %v5410_v26, %v3243_v15  ;;  %v1476_v17 = vpop.f32.mrf.mxu0 }
 0x2a5   : > { %v4845_v19 = vpop.eup %4844  ;;  %v1477_v20 = vadd.f32 %v5697_v16, %v1476_v17 }
 0x2a6   : > { %3912 = vst.msk [vmem:[%s5417_s16 + $0x190] sm:$0xff] %vm3861_vm2, %v3244_v21  ;;  %4505 = vmatmul.msk.f32.gmra.mxu1 %vm2307_vm1, %v4845_v19  ;;  %v321_v21 = vld [vmem:[%s5289_s26 + $0x2e8] sm:$0xff] }
 0x2a7   : > { %4846 = vtanh.f32 %v1477_v20  ;;  %4266 = vmatmul.msk.f32.gmra.mxu0 %vm489_vm0, %v311_v18 }
 0x2ab   : > { %v3246_v22 = vpop.f32.mrf.mxu1 }
 0x2ac   : > { %v3247_v26 = vadd.f32 %v5784_v23, %v3246_v22  ;;  %v1479_v24 = vpop.f32.mrf.mxu0 }
 0x2ad   : > { %v4847_v27 = vpop.eup %4846  ;;  %v1480_v28 = vadd.f32 %v5697_v16, %v1479_v24 }
 0x2ae   : > { %3913 = vst.msk [vmem:[%s5417_s16 + $0x198] sm:$0xff] %vm3861_vm2, %v3247_v26  ;;  %4506 = vmatmul.msk.f32.gmra.mxu1 %vm2307_vm1, %v4847_v27  ;;  %v322_v26 = vld [vmem:[%s5289_s26 + $0x2f0] sm:$0xff] }
 0x2af   : > { %4848 = vtanh.f32 %v1480_v28  ;;  %4267 = vmatmul.msk.f32.gmra.mxu0 %vm489_vm0, %v312_v25 }
 0x2b3   : > { %v3249_v29 = vpop.f32.mrf.mxu1 }
 0x2b4   : > { %v3250_v30 = vadd.f32 %v5784_v23, %v3249_v29  ;;  %v1482_v31 = vpop.f32.mrf.mxu0 }
 0x2b5   : > { %v4849_v33 = vpop.eup %4848  ;;  %v1483_v34 = vadd.f32 %v5697_v16, %v1482_v31 }
 0x2b6   : > { %3914 = vst.msk [vmem:[%s5417_s16 + $0x1a0] sm:$0xff] %vm3861_vm2, %v3250_v30  ;;  %4507 = vmatmul.msk.f32.gmra.mxu1 %vm2307_vm1, %v4849_v33  ;;  %v323_v30 = vld [vmem:[%s5289_s26 + $0x2f8] sm:$0xff] }
 0x2b7   : > { %4850 = vtanh.f32 %v1483_v34  ;;  %4268 = vmatmul.msk.f32.gmra.mxu0 %vm489_vm0, %v313_v32 }
 0x2bb   : > { %v3252_v35 = vpop.f32.mrf.mxu1 }
 0x2bc   : > { %v3253_v36 = vadd.f32 %v5784_v23, %v3252_v35  ;;  %v1485_v37 = vpop.f32.mrf.mxu0 }
 0x2bd   : > { %v4851_v39 = vpop.eup %4850  ;;  %v1486_v40 = vadd.f32 %v5697_v16, %v1485_v37 }
 0x2be   : > { %3915 = vst.msk [vmem:[%s5417_s16 + $0x1a8] sm:$0xff] %vm3861_vm2, %v3253_v36  ;;  %4508 = vmatmul.msk.f32.gmra.mxu1 %vm2307_vm1, %v4851_v39  ;;  %v324_v36 = vld [vmem:[%s5289_s26 + $0x300] sm:$0xff] }
 0x2bf   : > { %4852 = vtanh.f32 %v1486_v40  ;;  %4269 = vmatmul.msk.f32.gmra.mxu0 %vm489_vm0, %v314_v38 }
 0x2c3   : > { %v3255_v41 = vpop.f32.mrf.mxu1 }
 0x2c4   : > { %v3256_v42 = vadd.f32 %v5784_v23, %v3255_v41  ;;  %v1488_v43 = vpop.f32.mrf.mxu0 }
 0x2c5   : > { %v4853_v45 = vpop.eup %4852  ;;  %v1489_v46 = vadd.f32 %v5697_v16, %v1488_v43 }
 0x2c6   : > { %3916 = vst.msk [vmem:[%s5417_s16 + $0x1b0] sm:$0xff] %vm3861_vm2, %v3256_v42  ;;  %4509 = vmatmul.msk.f32.gmra.mxu1 %vm2307_vm1, %v4853_v45  ;;  %v325_v42 = vld [vmem:[%s5289_s26 + $0x308] sm:$0xff] }
 0x2c7   : > { %4854 = vtanh.f32 %v1489_v46  ;;  %4270 = vmatmul.msk.f32.gmra.mxu0 %vm489_vm0, %v315_v44 }
 0x2cb   : > { %v3258_v47 = vpop.f32.mrf.mxu1 }
 0x2cc   : > { %v3259_v48 = vadd.f32 %v5784_v23, %v3258_v47  ;;  %v1491_v49 = vpop.f32.mrf.mxu0 }
 0x2cd   : > { %v4855_v51 = vpop.eup %4854  ;;  %v1492_v52 = vadd.f32 %v5697_v16, %v1491_v49 }
 0x2ce   : > { %3917 = vst.msk [vmem:[%s5417_s16 + $0x1b8] sm:$0xff] %vm3861_vm2, %v3259_v48  ;;  %4510 = vmatmul.msk.f32.gmra.mxu1 %vm2307_vm1, %v4855_v51  ;;  %v326_v48 = vld [vmem:[%s5289_s26 + $0x310] sm:$0xff] }
 0x2cf   : > { %4856 = vtanh.f32 %v1492_v52  ;;  %4271 = vmatmul.msk.f32.gmra.mxu0 %vm489_vm0, %v316_v50 }
 0x2d3   : > { %v3261_v53 = vpop.f32.mrf.mxu1 }
 0x2d4   : > { %v3262_v54 = vadd.f32 %v5784_v23, %v3261_v53  ;;  %v1494_v55 = vpop.f32.mrf.mxu0 }
 0x2d5   : > { %v4857_v57 = vpop.eup %4856  ;;  %v1495_v58 = vadd.f32 %v5697_v16, %v1494_v55 }
 0x2d6   : > { %3918 = vst.msk [vmem:[%s5417_s16 + $0x1c0] sm:$0xff] %vm3861_vm2, %v3262_v54  ;;  %4511 = vmatmul.msk.f32.gmra.mxu1 %vm2307_vm1, %v4857_v57  ;;  %v327_v54 = vld [vmem:[%s5289_s26 + $0x318] sm:$0xff] }
 0x2d7   : > { %4858 = vtanh.f32 %v1495_v58  ;;  %4272 = vmatmul.msk.f32.gmra.mxu0 %vm489_vm0, %v317_v56 }
 0x2db   : > { %v3264_v59 = vpop.f32.mrf.mxu1 }
 0x2dc   : > { %v3265_v60 = vadd.f32 %v5784_v23, %v3264_v59  ;;  %v1497_v61 = vpop.f32.mrf.mxu0 }
 0x2dd   : > { %v4859_v63 = vpop.eup %4858  ;;  %v1498_v0 = vadd.f32 %v5697_v16, %v1497_v61 }
 0x2de   : > { %3919 = vst.msk [vmem:[%s5417_s16 + $0x1c8] sm:$0xff] %vm3861_vm2, %v3265_v60  ;;  %4512 = vmatmul.msk.f32.gmra.mxu1 %vm2307_vm1, %v4859_v63  ;;  %v328_v60 = vld [vmem:[%s5289_s26 + $0x320] sm:$0xff] }
 0x2df   : > { %4860 = vtanh.f32 %v1498_v0  ;;  %4273 = vmatmul.msk.f32.gmra.mxu0 %vm489_vm0, %v318_v62 }
 0x2e3   : > { %v3267_v1 = vpop.f32.mrf.mxu1 }
 0x2e4   : > { %v3268_v2 = vadd.f32 %v5784_v23, %v3267_v1  ;;  %v1500_v3 = vpop.f32.mrf.mxu0 }
 0x2e5   : > { %v4861_v5 = vpop.eup %4860  ;;  %v1501_v6 = vadd.f32 %v5697_v16, %v1500_v3 }
 0x2e6   : > { %3920 = vst.msk [vmem:[%s5417_s16 + $0x1d0] sm:$0xff] %vm3861_vm2, %v3268_v2  ;;  %4513 = vmatmul.msk.f32.gmra.mxu1 %vm2307_vm1, %v4861_v5  ;;  %v329_v2 = vld [vmem:[%s5289_s26 + $0x328] sm:$0xff] }
 0x2e7   : > { %4862 = vtanh.f32 %v1501_v6  ;;  %4274 = vmatmul.msk.f32.gmra.mxu0 %vm489_vm0, %v319_v4 }
 0x2eb   : > { %v3270_v7 = vpop.f32.mrf.mxu1 }
 0x2ec   : > { %v3271_v8 = vadd.f32 %v5784_v23, %v3270_v7  ;;  %v1503_v9 = vpop.f32.mrf.mxu0 }
 0x2ed   : > { %v4863_v11 = vpop.eup %4862  ;;  %v1504_v12 = vadd.f32 %v5697_v16, %v1503_v9 }
 0x2ee   : > { %3921 = vst.msk [vmem:[%s5417_s16 + $0x1d8] sm:$0xff] %vm3861_vm2, %v3271_v8  ;;  %4514 = vmatmul.msk.f32.gmra.mxu1 %vm2307_vm1, %v4863_v11  ;;  %v330_v8 = vld [vmem:[%s5289_s26 + $0x330] sm:$0xff] }
 0x2ef   : > { %4864 = vtanh.f32 %v1504_v12  ;;  %4275 = vmatmul.msk.f32.gmra.mxu0 %vm489_vm0, %v320_v10 }
 0x2f3   : > { %v3273_v13 = vpop.f32.mrf.mxu1 }
 0x2f4   : > { %v3274_v14 = vadd.f32 %v5784_v23, %v3273_v13  ;;  %v1506_v15 = vpop.f32.mrf.mxu0 }
 0x2f5   : > { %v4865_v17 = vpop.eup %4864  ;;  %v1507_v18 = vadd.f32 %v5697_v16, %v1506_v15 }
 0x2f6   : > { %3922 = vst.msk [vmem:[%s5417_s16 + $0x1e0] sm:$0xff] %vm3861_vm2, %v3274_v14  ;;  %4515 = vmatmul.msk.f32.gmra.mxu1 %vm2307_vm1, %v4865_v17  ;;  %v331_v14 = vld [vmem:[%s5289_s26 + $0x338] sm:$0xff] }
 0x2f7   : > { %4866 = vtanh.f32 %v1507_v18  ;;  %4276 = vmatmul.msk.f32.gmra.mxu0 %vm489_vm0, %v321_v21 }
 0x2fb   : > { %v3276_v19 = vpop.f32.mrf.mxu1 }
 0x2fc   : > { %v3277_v20 = vadd.f32 %v5784_v23, %v3276_v19  ;;  %v1509_v22 = vpop.f32.mrf.mxu0 }
 0x2fd   : > { %v4867_v24 = vpop.eup %4866  ;;  %v1510_v25 = vadd.f32 %v5697_v16, %v1509_v22 }
 0x2fe   : > { %3923 = vst.msk [vmem:[%s5417_s16 + $0x1e8] sm:$0xff] %vm3861_vm2, %v3277_v20  ;;  %4516 = vmatmul.msk.f32.gmra.mxu1 %vm2307_vm1, %v4867_v24  ;;  %v332_v20 = vld [vmem:[%s5289_s26 + $0x340] sm:$0xff] }
 0x2ff   : > { %4868 = vtanh.f32 %v1510_v25  ;;  %4277 = vmatmul.msk.f32.gmra.mxu0 %vm489_vm0, %v322_v26 }
 0x303   : > { %v3279_v27 = vpop.f32.mrf.mxu1 }
 0x304   : > { %v3280_v28 = vadd.f32 %v5784_v23, %v3279_v27  ;;  %v1512_v29 = vpop.f32.mrf.mxu0 }
 0x305   : > { %v4869_v31 = vpop.eup %4868  ;;  %v1513_v32 = vadd.f32 %v5697_v16, %v1512_v29 }
 0x306   : > { %3924 = vst.msk [vmem:[%s5417_s16 + $0x1f0] sm:$0xff] %vm3861_vm2, %v3280_v28  ;;  %4517 = vmatmul.msk.f32.gmra.mxu1 %vm2307_vm1, %v4869_v31  ;;  %v333_v28 = vld [vmem:[%s5289_s26 + $0x348] sm:$0xff] }
 0x307   : > { %4870 = vtanh.f32 %v1513_v32  ;;  %4278 = vmatmul.msk.f32.gmra.mxu0 %vm489_vm0, %v323_v30 }
 0x30b   : > { %v3282_v33 = vpop.f32.mrf.mxu1 }
 0x30c   : > { %v3283_v34 = vadd.f32 %v5784_v23, %v3282_v33  ;;  %v1515_v35 = vpop.f32.mrf.mxu0 }
 0x30d   : > { %v4871_v37 = vpop.eup %4870  ;;  %v1516_v38 = vadd.f32 %v5697_v16, %v1515_v35 }
 0x30e   : > { %3925 = vst.msk [vmem:[%s5417_s16 + $0x1f8] sm:$0xff] %vm3861_vm2, %v3283_v34  ;;  %4518 = vmatmul.msk.f32.gmra.mxu1 %vm2307_vm1, %v4871_v37  ;;  %v334_v34 = vld [vmem:[%s5289_s26 + $0x350] sm:$0xff] }
 0x30f   : > { %4872 = vtanh.f32 %v1516_v38  ;;  %4279 = vmatmul.msk.f32.gmra.mxu0 %vm489_vm0, %v324_v36 }
 0x313   : > { %v3285_v39 = vpop.f32.mrf.mxu1 }
 0x314   : > { %v3286_v40 = vadd.f32 %v5784_v23, %v3285_v39  ;;  %v1518_v41 = vpop.f32.mrf.mxu0 }
 0x315   : > { %v4873_v43 = vpop.eup %4872  ;;  %v1519_v44 = vadd.f32 %v5697_v16, %v1518_v41 }
 0x316   : > { %3926 = vst.msk [vmem:[%s5417_s16 + $0x200] sm:$0xff] %vm3861_vm2, %v3286_v40  ;;  %4519 = vmatmul.msk.f32.gmra.mxu1 %vm2307_vm1, %v4873_v43  ;;  %v335_v40 = vld [vmem:[%s5289_s26 + $0x358] sm:$0xff] }
 0x317   : > { %4874 = vtanh.f32 %v1519_v44  ;;  %4280 = vmatmul.msk.f32.gmra.mxu0 %vm489_vm0, %v325_v42 }
 0x31b   : > { %v3288_v45 = vpop.f32.mrf.mxu1 }
 0x31c   : > { %v3289_v46 = vadd.f32 %v5784_v23, %v3288_v45  ;;  %v1521_v47 = vpop.f32.mrf.mxu0 }
 0x31d   : > { %v4875_v49 = vpop.eup %4874  ;;  %v1522_v50 = vadd.f32 %v5697_v16, %v1521_v47 }
 0x31e   : > { %3927 = vst.msk [vmem:[%s5417_s16 + $0x208] sm:$0xff] %vm3861_vm2, %v3289_v46  ;;  %4520 = vmatmul.msk.f32.gmra.mxu1 %vm2307_vm1, %v4875_v49  ;;  %v336_v46 = vld [vmem:[%s5289_s26 + $0x360] sm:$0xff] }
 0x31f   : > { %4876 = vtanh.f32 %v1522_v50  ;;  %4281 = vmatmul.msk.f32.gmra.mxu0 %vm489_vm0, %v326_v48 }
 0x323   : > { %v3291_v51 = vpop.f32.mrf.mxu1 }
 0x324   : > { %v3292_v52 = vadd.f32 %v5784_v23, %v3291_v51  ;;  %v1524_v53 = vpop.f32.mrf.mxu0 }
 0x325   : > { %v4877_v55 = vpop.eup %4876  ;;  %v1525_v56 = vadd.f32 %v5697_v16, %v1524_v53 }
 0x326   : > { %3928 = vst.msk [vmem:[%s5417_s16 + $0x210] sm:$0xff] %vm3861_vm2, %v3292_v52  ;;  %4521 = vmatmul.msk.f32.gmra.mxu1 %vm2307_vm1, %v4877_v55  ;;  %v337_v52 = vld [vmem:[%s5289_s26 + $0x368] sm:$0xff] }
 0x327   : > { %4878 = vtanh.f32 %v1525_v56  ;;  %4282 = vmatmul.msk.f32.gmra.mxu0 %vm489_vm0, %v327_v54 }
 0x32b   : > { %v3294_v57 = vpop.f32.mrf.mxu1 }
 0x32c   : > { %v3295_v58 = vadd.f32 %v5784_v23, %v3294_v57  ;;  %v1527_v59 = vpop.f32.mrf.mxu0 }
 0x32d   : > { %v4879_v61 = vpop.eup %4878  ;;  %v1528_v62 = vadd.f32 %v5697_v16, %v1527_v59 }
 0x32e   : > { %3929 = vst.msk [vmem:[%s5417_s16 + $0x218] sm:$0xff] %vm3861_vm2, %v3295_v58  ;;  %4522 = vmatmul.msk.f32.gmra.mxu1 %vm2307_vm1, %v4879_v61  ;;  %v338_v58 = vld [vmem:[%s5289_s26 + $0x370] sm:$0xff] }
 0x32f   : > { %4880 = vtanh.f32 %v1528_v62  ;;  %4283 = vmatmul.msk.f32.gmra.mxu0 %vm489_vm0, %v328_v60 }
 0x333   : > { %v3297_v63 = vpop.f32.mrf.mxu1 }
 0x334   : > { %v3298_v0 = vadd.f32 %v5784_v23, %v3297_v63  ;;  %v1530_v1 = vpop.f32.mrf.mxu0 }
 0x335   : > { %v4881_v3 = vpop.eup %4880  ;;  %v1531_v4 = vadd.f32 %v5697_v16, %v1530_v1 }
 0x336   : > { %3930 = vst.msk [vmem:[%s5417_s16 + $0x220] sm:$0xff] %vm3861_vm2, %v3298_v0  ;;  %4523 = vmatmul.msk.f32.gmra.mxu1 %vm2307_vm1, %v4881_v3  ;;  %v339_v0 = vld [vmem:[%s5289_s26 + $0x378] sm:$0xff] }
 0x337   : > { %4882 = vtanh.f32 %v1531_v4  ;;  %4284 = vmatmul.msk.f32.gmra.mxu0 %vm489_vm0, %v329_v2 }
 0x33b   : > { %v3300_v5 = vpop.f32.mrf.mxu1 }
 0x33c   : > { %v3301_v6 = vadd.f32 %v5784_v23, %v3300_v5  ;;  %v1533_v7 = vpop.f32.mrf.mxu0 }
 0x33d   : > { %v4883_v9 = vpop.eup %4882  ;;  %v1534_v10 = vadd.f32 %v5697_v16, %v1533_v7 }
 0x33e   : > { %3931 = vst.msk [vmem:[%s5417_s16 + $0x228] sm:$0xff] %vm3861_vm2, %v3301_v6  ;;  %4524 = vmatmul.msk.f32.gmra.mxu1 %vm2307_vm1, %v4883_v9  ;;  %v340_v6 = vld [vmem:[%s5289_s26 + $0x380] sm:$0xff] }
 0x33f   : > { %4884 = vtanh.f32 %v1534_v10  ;;  %4285 = vmatmul.msk.f32.gmra.mxu0 %vm489_vm0, %v330_v8 }
 0x343   : > { %v3303_v11 = vpop.f32.mrf.mxu1 }
 0x344   : > { %v3304_v12 = vadd.f32 %v5784_v23, %v3303_v11  ;;  %v1536_v13 = vpop.f32.mrf.mxu0 }
 0x345   : > { %v4885_v15 = vpop.eup %4884  ;;  %v1537_v21 = vadd.f32 %v5697_v16, %v1536_v13 }
 0x346   : > { %3932 = vst.msk [vmem:[%s5417_s16 + $0x230] sm:$0xff] %vm3861_vm2, %v3304_v12  ;;  %4525 = vmatmul.msk.f32.gmra.mxu1 %vm2307_vm1, %v4885_v15  ;;  %v341_v12 = vld [vmem:[%s5289_s26 + $0x388] sm:$0xff] }
 0x347   : > { %4886 = vtanh.f32 %v1537_v21  ;;  %4286 = vmatmul.msk.f32.gmra.mxu0 %vm489_vm0, %v331_v14 }
 0x34b   : > { %v3306_v17 = vpop.f32.mrf.mxu1 }
 0x34c   : > { %v3307_v18 = vadd.f32 %v5784_v23, %v3306_v17  ;;  %v1539_v19 = vpop.f32.mrf.mxu0 }
 0x34d   : > { %v4887_v22 = vpop.eup %4886  ;;  %v1540_v26 = vadd.f32 %v5697_v16, %v1539_v19 }
 0x34e   : > { %3933 = vst.msk [vmem:[%s5417_s16 + $0x238] sm:$0xff] %vm3861_vm2, %v3307_v18  ;;  %4526 = vmatmul.msk.f32.gmra.mxu1 %vm2307_vm1, %v4887_v22  ;;  %v342_v18 = vld [vmem:[%s5289_s26 + $0x390] sm:$0xff] }
 0x34f   : > { %4888 = vtanh.f32 %v1540_v26  ;;  %4287 = vmatmul.msk.f32.gmra.mxu0 %vm489_vm0, %v332_v20 }
 0x353   : > { %v3309_v24 = vpop.f32.mrf.mxu1 }
 0x354   : > { %v3310_v25 = vadd.f32 %v5784_v23, %v3309_v24  ;;  %v1542_v27 = vpop.f32.mrf.mxu0 }
 0x355   : > { %v4889_v29 = vpop.eup %4888  ;;  %v1543_v30 = vadd.f32 %v5697_v16, %v1542_v27 }
 0x356   : > { %3934 = vst.msk [vmem:[%s5417_s16 + $0x240] sm:$0xff] %vm3861_vm2, %v3310_v25  ;;  %4527 = vmatmul.msk.f32.gmra.mxu1 %vm2307_vm1, %v4889_v29  ;;  %v343_v25 = vld [vmem:[%s5289_s26 + $0x398] sm:$0xff] }
 0x357   : > { %4890 = vtanh.f32 %v1543_v30  ;;  %4288 = vmatmul.msk.f32.gmra.mxu0 %vm489_vm0, %v333_v28 }
 0x35b   : > { %v3312_v31 = vpop.f32.mrf.mxu1 }
 0x35c   : > { %v3313_v32 = vadd.f32 %v5784_v23, %v3312_v31  ;;  %v1545_v33 = vpop.f32.mrf.mxu0 }
 0x35d   : > { %v4891_v35 = vpop.eup %4890  ;;  %v1546_v36 = vadd.f32 %v5697_v16, %v1545_v33 }
 0x35e   : > { %3935 = vst.msk [vmem:[%s5417_s16 + $0x248] sm:$0xff] %vm3861_vm2, %v3313_v32  ;;  %4528 = vmatmul.msk.f32.gmra.mxu1 %vm2307_vm1, %v4891_v35  ;;  %v344_v32 = vld [vmem:[%s5289_s26 + $0x3a0] sm:$0xff] }
 0x35f   : > { %4892 = vtanh.f32 %v1546_v36  ;;  %4289 = vmatmul.msk.f32.gmra.mxu0 %vm489_vm0, %v334_v34 }
 0x363   : > { %v3315_v37 = vpop.f32.mrf.mxu1 }
 0x364   : > { %v3316_v38 = vadd.f32 %v5784_v23, %v3315_v37  ;;  %v1548_v39 = vpop.f32.mrf.mxu0 }
 0x365   : > { %v4893_v41 = vpop.eup %4892  ;;  %v1549_v42 = vadd.f32 %v5697_v16, %v1548_v39 }
 0x366   : > { %3936 = vst.msk [vmem:[%s5417_s16 + $0x250] sm:$0xff] %vm3861_vm2, %v3316_v38  ;;  %4529 = vmatmul.msk.f32.gmra.mxu1 %vm2307_vm1, %v4893_v41  ;;  %v345_v38 = vld [vmem:[%s5289_s26 + $0x3a8] sm:$0xff] }
 0x367   : > { %4894 = vtanh.f32 %v1549_v42  ;;  %4290 = vmatmul.msk.f32.gmra.mxu0 %vm489_vm0, %v335_v40 }
 0x36b   : > { %v3318_v43 = vpop.f32.mrf.mxu1 }
 0x36c   : > { %v3319_v44 = vadd.f32 %v5784_v23, %v3318_v43  ;;  %v1551_v45 = vpop.f32.mrf.mxu0 }
 0x36d   : > { %v4895_v47 = vpop.eup %4894  ;;  %v1552_v48 = vadd.f32 %v5697_v16, %v1551_v45 }
 0x36e   : > { %3937 = vst.msk [vmem:[%s5417_s16 + $0x258] sm:$0xff] %vm3861_vm2, %v3319_v44  ;;  %4530 = vmatmul.msk.f32.gmra.mxu1 %vm2307_vm1, %v4895_v47  ;;  %v346_v44 = vld [vmem:[%s5289_s26 + $0x3b0] sm:$0xff] }
 0x36f   : > { %4896 = vtanh.f32 %v1552_v48  ;;  %4291 = vmatmul.msk.f32.gmra.mxu0 %vm489_vm0, %v336_v46 }
 0x373   : > { %v3321_v49 = vpop.f32.mrf.mxu1 }
 0x374   : > { %v3322_v50 = vadd.f32 %v5784_v23, %v3321_v49  ;;  %v1554_v51 = vpop.f32.mrf.mxu0 }
 0x375   : > { %v4897_v53 = vpop.eup %4896  ;;  %v1555_v54 = vadd.f32 %v5697_v16, %v1554_v51 }
 0x376   : > { %3938 = vst.msk [vmem:[%s5417_s16 + $0x260] sm:$0xff] %vm3861_vm2, %v3322_v50  ;;  %4531 = vmatmul.msk.f32.gmra.mxu1 %vm2307_vm1, %v4897_v53  ;;  %v347_v50 = vld [vmem:[%s5289_s26 + $0x3b8] sm:$0xff] }
 0x377   : > { %4898 = vtanh.f32 %v1555_v54  ;;  %4292 = vmatmul.msk.f32.gmra.mxu0 %vm489_vm0, %v337_v52 }
 0x37b   : > { %v3324_v55 = vpop.f32.mrf.mxu1 }
 0x37c   : > { %v3325_v56 = vadd.f32 %v5784_v23, %v3324_v55  ;;  %v1557_v57 = vpop.f32.mrf.mxu0 }
 0x37d   : > { %v4899_v59 = vpop.eup %4898  ;;  %v1558_v60 = vadd.f32 %v5697_v16, %v1557_v57 }
 0x37e   : > { %3939 = vst.msk [vmem:[%s5417_s16 + $0x268] sm:$0xff] %vm3861_vm2, %v3325_v56  ;;  %4532 = vmatmul.msk.f32.gmra.mxu1 %vm2307_vm1, %v4899_v59  ;;  %v348_v56 = vld [vmem:[%s5289_s26 + $0x3c0] sm:$0xff] }
 0x37f   : > { %4900 = vtanh.f32 %v1558_v60  ;;  %4293 = vmatmul.msk.f32.gmra.mxu0 %vm489_vm0, %v338_v58 }
 0x383   : > { %v3327_v61 = vpop.f32.mrf.mxu1 }
 0x384   : > { %v3328_v62 = vadd.f32 %v5784_v23, %v3327_v61  ;;  %v1560_v63 = vpop.f32.mrf.mxu0 }
 0x385   : > { %v4901_v1 = vpop.eup %4900  ;;  %v1561_v2 = vadd.f32 %v5697_v16, %v1560_v63 }
 0x386   : > { %3940 = vst.msk [vmem:[%s5417_s16 + $0x270] sm:$0xff] %vm3861_vm2, %v3328_v62  ;;  %4533 = vmatmul.msk.f32.gmra.mxu1 %vm2307_vm1, %v4901_v1  ;;  %v349_v62 = vld [vmem:[%s5289_s26 + $0x3c8] sm:$0xff] }
 0x387   : > { %4902 = vtanh.f32 %v1561_v2  ;;  %4294 = vmatmul.msk.f32.gmra.mxu0 %vm489_vm0, %v339_v0 }
 0x38b   : > { %v3330_v3 = vpop.f32.mrf.mxu1 }
 0x38c   : > { %v3331_v4 = vadd.f32 %v5784_v23, %v3330_v3  ;;  %v1563_v5 = vpop.f32.mrf.mxu0 }
 0x38d   : > { %v4903_v7 = vpop.eup %4902  ;;  %v1564_v8 = vadd.f32 %v5697_v16, %v1563_v5 }
 0x38e   : > { %3941 = vst.msk [vmem:[%s5417_s16 + $0x278] sm:$0xff] %vm3861_vm2, %v3331_v4  ;;  %4534 = vmatmul.msk.f32.gmra.mxu1 %vm2307_vm1, %v4903_v7  ;;  %v350_v4 = vld [vmem:[%s5289_s26 + $0x3d0] sm:$0xff] }
 0x38f   : > { %4904 = vtanh.f32 %v1564_v8  ;;  %4295 = vmatmul.msk.f32.gmra.mxu0 %vm489_vm0, %v340_v6 }
 0x393   : > { %v3333_v9 = vpop.f32.mrf.mxu1 }
 0x394   : > { %v3334_v10 = vadd.f32 %v5784_v23, %v3333_v9  ;;  %v1566_v11 = vpop.f32.mrf.mxu0 }
 0x395   : > { %v4905_v13 = vpop.eup %4904  ;;  %v1567_v14 = vadd.f32 %v5697_v16, %v1566_v11 }
 0x396   : > { %3942 = vst.msk [vmem:[%s5417_s16 + $0x280] sm:$0xff] %vm3861_vm2, %v3334_v10  ;;  %4535 = vmatmul.msk.f32.gmra.mxu1 %vm2307_vm1, %v4905_v13  ;;  %v351_v10 = vld [vmem:[%s5289_s26 + $0x3d8] sm:$0xff] }
 0x397   : > { %4906 = vtanh.f32 %v1567_v14  ;;  %4296 = vmatmul.msk.f32.gmra.mxu0 %vm489_vm0, %v341_v12 }
 0x39b   : > { %v3336_v15 = vpop.f32.mrf.mxu1 }
 0x39c   : > { %v3337_v21 = vadd.f32 %v5784_v23, %v3336_v15  ;;  %v1569_v17 = vpop.f32.mrf.mxu0 }
 0x39d   : > { %v4907_v19 = vpop.eup %4906  ;;  %v1570_v20 = vadd.f32 %v5697_v16, %v1569_v17 }
 0x39e   : > { %3943 = vst.msk [vmem:[%s5417_s16 + $0x288] sm:$0xff] %vm3861_vm2, %v3337_v21  ;;  %4536 = vmatmul.msk.f32.gmra.mxu1 %vm2307_vm1, %v4907_v19  ;;  %v352_v21 = vld [vmem:[%s5289_s26 + $0x3e0] sm:$0xff]  ;;  %v357_v19 = vld [vmem:[%s5289_s26 + $0x408] sm:$0xff] }
 0x39f   : > { %4908 = vtanh.f32 %v1570_v20  ;;  %4297 = vmatmul.msk.f32.gmra.mxu0 %vm489_vm0, %v342_v18  ;;  %4312 = vmatmul.msk.f32.vlgmr.msra.gmra.mxu3 %vm489_vm0, %v357_v19 }
 0x3a3   : > { %v3339_v22 = vpop.f32.mrf.mxu1 }
 0x3a4   : > { %v3340_v26 = vadd.f32 %v5784_v23, %v3339_v22  ;;  %v1572_v24 = vpop.f32.mrf.mxu0 }
 0x3a5   : > { %v4909_v27 = vpop.eup %4908  ;;  %v1573_v28 = vadd.f32 %v5697_v16, %v1572_v24  ;;  %v353_v24 = vld [vmem:[%s5289_s26 + $0x3e8] sm:$0xff] }
 0x3a6   : > { %3944 = vst.msk [vmem:[%s5417_s16 + $0x290] sm:$0xff] %vm3861_vm2, %v3340_v26  ;;  %4537 = vmatmul.msk.f32.gmra.mxu1 %vm2307_vm1, %v4909_v27 }
 0x3a7   : > { %4910 = vtanh.f32 %v1573_v28  ;;  %4298 = vmatmul.msk.f32.gmra.mxu0 %vm489_vm0, %v343_v25  ;;  %v358_v28 = vld [vmem:[%s5289_s26 + $0x410] sm:$0xff] }
 0x3a8   : > { %4313 = vmatmul.msk.f32.gmra.mxu3 %vm489_vm0, %v358_v28 }
 0x3ab   : > { %v3342_v29 = vpop.f32.mrf.mxu1 }
 0x3ac   : > { %v3343_v30 = vadd.f32 %v5784_v23, %v3342_v29  ;;  %v1575_v31 = vpop.f32.mrf.mxu0 }
 0x3ad   : > { %v4911_v33 = vpop.eup %4910  ;;  %v1576_v34 = vadd.f32 %v5697_v16, %v1575_v31 }
 0x3ae   : > { %3945 = vst.msk [vmem:[%s5417_s16 + $0x298] sm:$0xff] %vm3861_vm2, %v3343_v30  ;;  %4538 = vmatmul.msk.f32.gmra.mxu1 %vm2307_vm1, %v4911_v33 }
 0x3af   : > { %4912 = vtanh.f32 %v1576_v34  ;;  %4299 = vmatmul.msk.f32.gmra.mxu0 %vm489_vm0, %v344_v32  ;;  %v354_v32 = vld [vmem:[%s5289_s26 + $0x3f0] sm:$0xff] }
 0x3b3   : > { %v3345_v35 = vpop.f32.mrf.mxu1 }
 0x3b4   : > { %v3346_v36 = vadd.f32 %v5784_v23, %v3345_v35  ;;  %v1578_v37 = vpop.f32.mrf.mxu0  ;;  %v359_v35 = vld [vmem:[%s5289_s26 + $0x418] sm:$0xff] }
 0x3b5   : > { %v4913_v39 = vpop.eup %4912  ;;  %v1579_v40 = vadd.f32 %v5697_v16, %v1578_v37  ;;  %4314 = vmatmul.msk.f32.gmra.mxu3 %vm489_vm0, %v359_v35  ;;  %v369_v35 = vld [vmem:[%s5289_s26 + $0x468] sm:$0xff] }
 0x3b6   : > { %3946 = vst.msk [vmem:[%s5417_s16 + $0x2a0] sm:$0xff] %vm3861_vm2, %v3346_v36  ;;  %4539 = vmatmul.msk.f32.gmra.mxu1 %vm2307_vm1, %v4913_v39  ;;  %v355_v39 = vld [vmem:[%s5289_s26 + $0x3f8] sm:$0xff] }
 0x3b7   : > { %4914 = vtanh.f32 %v1579_v40  ;;  %4300 = vmatmul.msk.f32.gmra.mxu0 %vm489_vm0, %v345_v38 }
 0x3bb   : > { %v3348_v41 = vpop.f32.mrf.mxu1 }
 0x3bc   : > { %v3349_v42 = vadd.f32 %v5784_v23, %v3348_v41  ;;  %v1581_v43 = vpop.f32.mrf.mxu0 }
 0x3bd   : > { %v4915_v45 = vpop.eup %4914  ;;  %v1582_v46 = vadd.f32 %v5697_v16, %v1581_v43 }
 0x3be   : > { %3947 = vst.msk [vmem:[%s5417_s16 + $0x2a8] sm:$0xff] %vm3861_vm2, %v3349_v42  ;;  %4540 = vmatmul.msk.f32.gmra.mxu1 %vm2307_vm1, %v4915_v45  ;;  %v360_v42 = vld [vmem:[%s5289_s26 + $0x420] sm:$0xff] }
 0x3bf   : > { %4916 = vtanh.f32 %v1582_v46  ;;  %4301 = vmatmul.msk.f32.gmra.mxu0 %vm489_vm0, %v346_v44  ;;  %4315 = vmatmul.msk.f32.gmra.mxu3 %vm489_vm0, %v360_v42  ;;  %v356_v46 = vld [vmem:[%s5289_s26 + $0x400] sm:$0xff] }
 0x3c3   : > { %v3351_v47 = vpop.f32.mrf.mxu1 }
 0x3c4   : > { %v3352_v48 = vadd.f32 %v5784_v23, %v3351_v47  ;;  %v1584_v49 = vpop.f32.mrf.mxu0 }
 0x3c5   : > { %v4917_v51 = vpop.eup %4916  ;;  %v1585_v52 = vadd.f32 %v5697_v16, %v1584_v49  ;;  %v361_v49 = vld [vmem:[%s5289_s26 + $0x428] sm:$0xff] }
 0x3c6   : > { %3948 = vst.msk [vmem:[%s5417_s16 + $0x2b0] sm:$0xff] %vm3861_vm2, %v3352_v48  ;;  %4541 = vmatmul.msk.f32.gmra.mxu1 %vm2307_vm1, %v4917_v51 }
 0x3c7   : > { %4918 = vtanh.f32 %v1585_v52  ;;  %4302 = vmatmul.msk.f32.gmra.mxu0 %vm489_vm0, %v347_v50  ;;  %4316 = vmatmul.msk.f32.gmra.mxu3 %vm489_vm0, %v361_v49 }
 0x3cb   : > { %v3354_v53 = vpop.f32.mrf.mxu1 }
 0x3cc   : > { %v3355_v54 = vadd.f32 %v5784_v23, %v3354_v53  ;;  %v1587_v55 = vpop.f32.mrf.mxu0 }
 0x3cd   : > { %v4919_v57 = vpop.eup %4918  ;;  %v1588_v58 = vadd.f32 %v5697_v16, %v1587_v55  ;;  %v362_v55 = vld [vmem:[%s5289_s26 + $0x430] sm:$0xff] }
 0x3ce   : > { %3949 = vst.msk [vmem:[%s5417_s16 + $0x2b8] sm:$0xff] %vm3861_vm2, %v3355_v54  ;;  %4542 = vmatmul.msk.f32.gmra.mxu1 %vm2307_vm1, %v4919_v57 }
 0x3cf   : > { %4920 = vtanh.f32 %v1588_v58  ;;  %4303 = vmatmul.msk.f32.gmra.mxu0 %vm489_vm0, %v348_v56  ;;  %4317 = vmatmul.msk.f32.gmra.mxu3 %vm489_vm0, %v362_v55 }
 0x3d3   : > { %v3357_v59 = vpop.f32.mrf.mxu1 }
 0x3d4   : > { %v3358_v60 = vadd.f32 %v5784_v23, %v3357_v59  ;;  %v1590_v61 = vpop.f32.mrf.mxu0 }
 0x3d5   : > { %v4921_v63 = vpop.eup %4920  ;;  %v1591_v0 = vadd.f32 %v5697_v16, %v1590_v61  ;;  %v363_v61 = vld [vmem:[%s5289_s26 + $0x438] sm:$0xff] }
 0x3d6   : > { %3950 = vst.msk [vmem:[%s5417_s16 + $0x2c0] sm:$0xff] %vm3861_vm2, %v3358_v60  ;;  %4543 = vmatmul.msk.f32.gmra.mxu1 %vm2307_vm1, %v4921_v63 }
 0x3d7   : > { %4922 = vtanh.f32 %v1591_v0  ;;  %4304 = vmatmul.msk.f32.gmra.mxu0 %vm489_vm0, %v349_v62  ;;  %4318 = vmatmul.msk.f32.gmra.mxu3 %vm489_vm0, %v363_v61 }
 0x3db   : > { %v3360_v1 = vpop.f32.mrf.mxu1 }
 0x3dc   : > { %v3361_v2 = vadd.f32 %v5784_v23, %v3360_v1  ;;  %v1593_v3 = vpop.f32.mrf.mxu0 }
 0x3dd   : > { %v4923_v5 = vpop.eup %4922  ;;  %v1594_v6 = vadd.f32 %v5697_v16, %v1593_v3  ;;  %v364_v3 = vld [vmem:[%s5289_s26 + $0x440] sm:$0xff] }
 0x3de   : > { %3951 = vst.msk [vmem:[%s5417_s16 + $0x2c8] sm:$0xff] %vm3861_vm2, %v3361_v2  ;;  %4544 = vmatmul.msk.f32.gmra.mxu1 %vm2307_vm1, %v4923_v5 }
 0x3df   : > { %4924 = vtanh.f32 %v1594_v6  ;;  %4305 = vmatmul.msk.f32.gmra.mxu0 %vm489_vm0, %v350_v4  ;;  %4319 = vmatmul.msk.f32.gmra.mxu3 %vm489_vm0, %v364_v3 }
 0x3e3   : > { %v3363_v7 = vpop.f32.mrf.mxu1 }
 0x3e4   : > { %v3364_v8 = vadd.f32 %v5784_v23, %v3363_v7  ;;  %v1596_v9 = vpop.f32.mrf.mxu0 }
 0x3e5   : > { %v4925_v11 = vpop.eup %4924  ;;  %v1597_v12 = vadd.f32 %v5697_v16, %v1596_v9  ;;  %v6071_v16 = vld [vmem:[%s7157_s2] ss:$0 sm:$0xff]  ;;  %v365_v9 = vld [vmem:[%s5289_s26 + $0x448] sm:$0xff] }
 0x3e6   : > { %3952 = vst.msk [vmem:[%s5417_s16 + $0x2d0] sm:$0xff] %vm3861_vm2, %v3364_v8  ;;  %4545 = vmatmul.msk.f32.gmra.mxu1 %vm2307_vm1, %v4925_v11 }
 0x3e7   : > { %4926 = vtanh.f32 %v1597_v12  ;;  %4306 = vmatmul.msk.f32.gmra.mxu0 %vm489_vm0, %v351_v10  ;;  %4320 = vmatmul.msk.f32.gmra.mxu3 %vm489_vm0, %v365_v9  ;;  %v375_v9 = vld [vmem:[%s5289_s26 + $0x498] sm:$0xff] }
 0x3eb   : > { %v3366_v13 = vpop.f32.mrf.mxu1 }
 0x3ec   : > { %v3367_v14 = vadd.f32 %v5784_v23, %v3366_v13  ;;  %v1599_v15 = vpop.f32.mrf.mxu0 }
 0x3ed   : > { %v4927_v17 = vpop.eup %4926  ;;  %v1600_v18 = vadd.f32 %v6071_v16, %v1599_v15  ;;  %v366_v15 = vld [vmem:[%s5289_s26 + $0x450] sm:$0xff] }
 0x3ee   : > { %3953 = vst.msk [vmem:[%s5417_s16 + $0x2d8] sm:$0xff] %vm3861_vm2, %v3367_v14  ;;  %4546 = vmatmul.msk.f32.gmra.mxu1 %vm2307_vm1, %v4927_v17 }
 0x3ef   : > { %4928 = vtanh.f32 %v1600_v18  ;;  %4307 = vmatmul.msk.f32.gmra.mxu0 %vm489_vm0, %v352_v21  ;;  %4321 = vmatmul.msk.f32.gmra.mxu3 %vm489_vm0, %v366_v15 }
 0x3f3   : > { %v3369_v20 = vpop.f32.mrf.mxu1 }
 0x3f4   : > { %v3370_v22 = vadd.f32 %v5784_v23, %v3369_v20  ;;  %v1602_v26 = vpop.f32.mrf.mxu0 }
 0x3f5   : > { %v4929_v25 = vpop.eup %4928  ;;  %v1603_v27 = vadd.f32 %v6071_v16, %v1602_v26 }
 0x3f6   : > { %3954 = vst.msk [vmem:[%s5417_s16 + $0x2e0] sm:$0xff] %vm3861_vm2, %v3370_v22  ;;  %4547 = vmatmul.msk.f32.gmra.mxu1 %vm2307_vm1, %v4929_v25  ;;  %v367_v22 = vld [vmem:[%s5289_s26 + $0x458] sm:$0xff] }
 0x3f7   : > { %4930 = vtanh.f32 %v1603_v27  ;;  %4308 = vmatmul.msk.f32.gmra.mxu0 %vm489_vm0, %v353_v24  ;;  %4322 = vmatmul.msk.f32.gmra.mxu3 %vm489_vm0, %v367_v22  ;;  %v6161_v24 = vld [vmem:[%s7159_s4] ss:$0 sm:$0xff] }
 0x3fb   : > { %v3372_v29 = vpop.f32.mrf.mxu1 }
 0x3fc   : > { %v3373_v30 = vadd.f32 %v5784_v23, %v3372_v29  ;;  %v1605_v31 = vpop.f32.mrf.mxu0  ;;  %v368_v29 = vld [vmem:[%s5289_s26 + $0x460] sm:$0xff] }
 0x3fd   : > { %v4931_v33 = vpop.eup %4930  ;;  %v1606_v34 = vadd.f32 %v6071_v16, %v1605_v31 }
 0x3fe   : > { %3955 = vst.msk [vmem:[%s5417_s16 + $0x2e8] sm:$0xff] %vm3861_vm2, %v3373_v30  ;;  %4548 = vmatmul.msk.f32.gmra.mxu1 %vm2307_vm1, %v4931_v33 }
 0x3ff   : > { %4932 = vtanh.f32 %v1606_v34  ;;  %4309 = vmatmul.msk.f32.gmra.mxu0 %vm489_vm0, %v354_v32  ;;  %4323 = vmatmul.msk.f32.gmra.mxu3 %vm489_vm0, %v368_v29 }
 0x403   : > { %v3375_v36 = vpop.f32.mrf.mxu1 }
 0x404   : > { %v3376_v37 = vadd.f32 %v5784_v23, %v3375_v36  ;;  %v1608_v38 = vpop.f32.mrf.mxu0 }
 0x405   : > { %v4933_v40 = vpop.eup %4932  ;;  %v1609_v41 = vadd.f32 %v6071_v16, %v1608_v38 }
 0x406   : > { %3956 = vst.msk [vmem:[%s5417_s16 + $0x2f0] sm:$0xff] %vm3861_vm2, %v3376_v37  ;;  %4549 = vmatmul.msk.f32.gmra.mxu1 %vm2307_vm1, %v4933_v40 }
 0x407   : > { %4934 = vtanh.f32 %v1609_v41  ;;  %4310 = vmatmul.msk.f32.gmra.mxu0 %vm489_vm0, %v355_v39  ;;  %4324 = vmatmul.msk.f32.gmra.mxu3 %vm489_vm0, %v369_v35  ;;  %v370_v41 = vld [vmem:[%s5289_s26 + $0x470] sm:$0xff] }
 0x40b   : > { %v3378_v43 = vpop.f32.mrf.mxu1 }
 0x40c   : > { %v3379_v44 = vadd.f32 %v5784_v23, %v3378_v43  ;;  %v1611_v45 = vpop.f32.mrf.mxu0 }
 0x40d   : > { %v4935_v47 = vpop.eup %4934  ;;  %v1612_v48 = vadd.f32 %v6071_v16, %v1611_v45 }
 0x40e   : > { %3957 = vst.msk [vmem:[%s5417_s16 + $0x2f8] sm:$0xff] %vm3861_vm2, %v3379_v44  ;;  %4550 = vmatmul.msk.f32.gmra.mxu1 %vm2307_vm1, %v4935_v47  ;;  %v371_v47 = vld [vmem:[%s5289_s26 + $0x478] sm:$0xff] }
 0x40f   : > { %4936 = vtanh.f32 %v1612_v48  ;;  %4311 = vmatmul.msk.f32.gmra.mxu0 %vm489_vm0, %v356_v46  ;;  %4325 = vmatmul.msk.f32.gmra.mxu3 %vm489_vm0, %v370_v41 }
 0x413   : > { %v3381_v50 = vpop.f32.mrf.mxu1 }
 0x414   : > { %v3382_v51 = vadd.f32 %v5784_v23, %v3381_v50  ;;  %v1614_v52 = vpop.f32.mrf.mxu0 }
 0x415   : > { %v4937_v53 = vpop.eup %4936  ;;  %v1615_v54 = vadd.f32 %v6071_v16, %v1614_v52 }
 0x416   : > { %3958 = vst.msk [vmem:[%s5417_s16 + $0x300] sm:$0xff] %vm3861_vm2, %v3382_v51  ;;  %4551 = vmatmul.msk.f32.gmra.mxu1 %vm2307_vm1, %v4937_v53  ;;  %v372_v53 = vld [vmem:[%s5289_s26 + $0x480] sm:$0xff] }
 0x417   : > { %4938 = vtanh.f32 %v1615_v54  ;;  %4326 = vmatmul.msk.f32.gmra.mxu3 %vm489_vm0, %v371_v47 }
 0x41b   : > { %v3384_v56 = vpop.f32.mrf.mxu1 }
 0x41c   : > { %v3385_v57 = vadd.f32 %v5784_v23, %v3384_v56  ;;  %v1617_v58 = vpop.f32.mrf.mxu0 }
 0x41d   : > { %v4939_v59 = vpop.eup %4938  ;;  %v1618_v60 = vadd.f32 %v6071_v16, %v1617_v58 }
 0x41e   : > { %3959 = vst.msk [vmem:[%s5417_s16 + $0x308] sm:$0xff] %vm3861_vm2, %v3385_v57  ;;  %4552 = vmatmul.msk.f32.gmra.mxu1 %vm2307_vm1, %v4939_v59  ;;  %v373_v59 = vld [vmem:[%s5289_s26 + $0x488] sm:$0xff] }
 0x41f   : > { %4940 = vtanh.f32 %v1618_v60  ;;  %4327 = vmatmul.msk.f32.gmra.mxu3 %vm489_vm0, %v372_v53 }
 0x423   : > { %v3387_v62 = vpop.f32.mrf.mxu1 }
 0x424   : > { %v3388_v63 = vadd.f32 %v5784_v23, %v3387_v62  ;;  %v1620_v0 = vpop.f32.mrf.mxu0 }
 0x425   : > { %v4941_v1 = vpop.eup %4940  ;;  %v1621_v2 = vadd.f32 %v6071_v16, %v1620_v0 }
 0x426   : > { %3960 = vst.msk [vmem:[%s5417_s16 + $0x310] sm:$0xff] %vm3861_vm2, %v3388_v63  ;;  %4553 = vmatmul.msk.f32.gmra.mxu1 %vm2307_vm1, %v4941_v1  ;;  %v1662_v63 = vpop.f32.mrf.mxu3 }
 0x427   : > { %4942 = vtanh.f32 %v1621_v2  ;;  %4328 = vmatmul.msk.f32.gmra.mxu3 %vm489_vm0, %v373_v59  ;;  %v374_v2 = vld [vmem:[%s5289_s26 + $0x490] sm:$0xff] }
 0x42b   : > { %v3390_v4 = vpop.f32.mrf.mxu1 }
 0x42c   : > { %v3391_v5 = vadd.f32 %v5784_v23, %v3390_v4  ;;  %v1623_v6 = vpop.f32.mrf.mxu0 }
 0x42d   : > { %v4943_v7 = vpop.eup %4942  ;;  %v1624_v8 = vadd.f32 %v6071_v16, %v1623_v6 }
 0x42e   : > { %3961 = vst.msk [vmem:[%s5417_s16 + $0x318] sm:$0xff] %vm3861_vm2, %v3391_v5  ;;  %4554 = vmatmul.msk.f32.gmra.mxu1 %vm2307_vm1, %v4943_v7  ;;  %v1665_v6 = vpop.f32.mrf.mxu3 }
 0x42f   : > { %4944 = vtanh.f32 %v1624_v8  ;;  %4329 = vmatmul.msk.f32.gmra.mxu3 %vm489_vm0, %v374_v2 }
 0x433   : > { %v3393_v10 = vpop.f32.mrf.mxu1 }
 0x434   : > { %v3394_v11 = vadd.f32 %v5784_v23, %v3393_v10  ;;  %v1626_v12 = vpop.f32.mrf.mxu0 }
 0x435   : > { %v4945_v13 = vpop.eup %4944  ;;  %v1627_v14 = vadd.f32 %v6071_v16, %v1626_v12 }
 0x436   : > { %3962 = vst.msk [vmem:[%s5417_s16 + $0x320] sm:$0xff] %vm3861_vm2, %v3394_v11  ;;  %4555 = vmatmul.msk.f32.gmra.mxu1 %vm2307_vm1, %v4945_v13 }
 0x437   : > { %4946 = vtanh.f32 %v1627_v14  ;;  %4330 = vmatmul.msk.f32.gmra.mxu3 %vm489_vm0, %v375_v9  ;;  %v385_v9 = vld [vmem:[%s5289_s26 + $0x4e8] sm:$0xff] }
 0x438   : > { %v1668_v13 = vpop.f32.mrf.mxu3 }
 0x43b   : > { %v3396_v21 = vpop.f32.mrf.mxu1 }
 0x43c   : > { %v3397_v17 = vadd.f32 %v5784_v23, %v3396_v21  ;;  %v1629_v18 = vpop.f32.mrf.mxu0  ;;  %v376_v21 = vld [vmem:[%s5289_s26 + $0x4a0] sm:$0xff] }
 0x43d   : > { %v4947_v19 = vpop.eup %4946  ;;  %v1630_v20 = vadd.f32 %v6071_v16, %v1629_v18 }
 0x43e   : > { %3963 = vst.msk [vmem:[%s5417_s16 + $0x328] sm:$0xff] %vm3861_vm2, %v3397_v17  ;;  %4556 = vmatmul.msk.f32.gmra.mxu1 %vm2307_vm1, %v4947_v19 }
 0x43f   : > { %4948 = vtanh.f32 %v1630_v20  ;;  %4331 = vmatmul.msk.f32.gmra.mxu3 %vm489_vm0, %v376_v21 }
 0x442   : > { %v1671_v20 = vpop.f32.mrf.mxu3 }
 0x443   : > { %v3399_v26 = vpop.f32.mrf.mxu1 }
 0x444   : > { %v3400_v23 = vadd.f32 %v6161_v24, %v3399_v26  ;;  %v1632_v25 = vpop.f32.mrf.mxu0 }
 0x445   : > { %v4949_v27 = vpop.eup %4948  ;;  %v1633_v28 = vadd.f32 %v6071_v16, %v1632_v25  ;;  %v1663_v25 = vadd.f32 %v6071_v16, %v1662_v63 }
 0x446   : > { %3964 = vst.msk [vmem:[%s5417_s16 + $0x330] sm:$0xff] %vm3861_vm2, %v3400_v23  ;;  %4557 = vmatmul.msk.f32.gmra.mxu1 %vm2307_vm1, %v4949_v27  ;;  %v377_v23 = vld [vmem:[%s5289_s26 + $0x4a8] sm:$0xff] }
 0x447   : > { %4950 = vtanh.f32 %v1633_v28  ;;  %4332 = vmatmul.msk.f32.gmra.mxu3 %vm489_vm0, %v377_v23 }
 0x44a   : > { %v1674_v29 = vpop.f32.mrf.mxu3 }
 0x44b   : > { %v3402_v30 = vpop.f32.mrf.mxu1 }
 0x44c   : > { %v3403_v31 = vadd.f32 %v6161_v24, %v3402_v30  ;;  %v1635_v32 = vpop.f32.mrf.mxu0 }
 0x44d   : > { %v4951_v33 = vpop.eup %4950  ;;  %v1636_v34 = vadd.f32 %v6071_v16, %v1635_v32  ;;  %v1666_v32 = vadd.f32 %v6071_v16, %v1665_v6 }
 0x44e   : > { %3965 = vst.msk [vmem:[%s5417_s16 + $0x338] sm:$0xff] %vm3861_vm2, %v3403_v31  ;;  %4558 = vmatmul.msk.f32.gmra.mxu1 %vm2307_vm1, %v4951_v33  ;;  %v378_v31 = vld [vmem:[%s5289_s26 + $0x4b0] sm:$0xff] }
 0x44f   : > { %4952 = vtanh.f32 %v1636_v34  ;;  %4333 = vmatmul.msk.f32.gmra.mxu3 %vm489_vm0, %v378_v31 }
 0x453   : > { %v3405_v36 = vpop.f32.mrf.mxu1 }
 0x454   : > { %v3406_v37 = vadd.f32 %v6161_v24, %v3405_v36  ;;  %v1638_v38 = vpop.f32.mrf.mxu0  ;;  %v1677_v36 = vpop.f32.mrf.mxu3 }
 0x455   : > { %v4953_v39 = vpop.eup %4952  ;;  %v1639_v40 = vadd.f32 %v6071_v16, %v1638_v38  ;;  %v1669_v38 = vadd.f32 %v6071_v16, %v1668_v13 }
 0x456   : > { %3966 = vst.msk [vmem:[%s5417_s16 + $0x340] sm:$0xff] %vm3861_vm2, %v3406_v37  ;;  %4559 = vmatmul.msk.f32.gmra.mxu1 %vm2307_vm1, %v4953_v39  ;;  %v379_v37 = vld [vmem:[%s5289_s26 + $0x4b8] sm:$0xff] }
 0x457   : > { %4954 = vtanh.f32 %v1639_v40  ;;  %4334 = vmatmul.msk.f32.gmra.mxu3 %vm489_vm0, %v379_v37 }
 0x45b   : > { %v3408_v42 = vpop.f32.mrf.mxu1 }
 0x45c   : > { %v3409_v43 = vadd.f32 %v6161_v24, %v3408_v42  ;;  %v1641_v44 = vpop.f32.mrf.mxu0  ;;  %v1680_v42 = vpop.f32.mrf.mxu3 }
 0x45d   : > { %v4955_v45 = vpop.eup %4954  ;;  %v1642_v46 = vadd.f32 %v6071_v16, %v1641_v44  ;;  %v1672_v44 = vadd.f32 %v6071_v16, %v1671_v20 }
 0x45e   : > { %3967 = vst.msk [vmem:[%s5417_s16 + $0x348] sm:$0xff] %vm3861_vm2, %v3409_v43  ;;  %4560 = vmatmul.msk.f32.gmra.mxu1 %vm2307_vm1, %v4955_v45  ;;  %v380_v43 = vld [vmem:[%s5289_s26 + $0x4c0] sm:$0xff] }
 0x45f   : > { %4956 = vtanh.f32 %v1642_v46  ;;  %4335 = vmatmul.msk.f32.gmra.mxu3 %vm489_vm0, %v380_v43 }
 0x463   : > { %v3411_v48 = vpop.f32.mrf.mxu1 }
 0x464   : > { %v3412_v49 = vadd.f32 %v6161_v24, %v3411_v48  ;;  %v1644_v50 = vpop.f32.mrf.mxu0  ;;  %v1683_v48 = vpop.f32.mrf.mxu3 }
 0x465   : > { %v4957_v51 = vpop.eup %4956  ;;  %v1645_v52 = vadd.f32 %v6071_v16, %v1644_v50  ;;  %v1675_v50 = vadd.f32 %v6071_v16, %v1674_v29  ;;  %v388_v29 = vld [vmem:[%s5289_s26 + $0x500] sm:$0xff] }
 0x466   : > { %3968 = vst.msk [vmem:[%s5417_s16 + $0x350] sm:$0xff] %vm3861_vm2, %v3412_v49  ;;  %4561 = vmatmul.msk.f32.gmra.mxu1 %vm2307_vm1, %v4957_v51  ;;  %v381_v49 = vld [vmem:[%s5289_s26 + $0x4c8] sm:$0xff] }
 0x467   : > { %4958 = vtanh.f32 %v1645_v52  ;;  %4336 = vmatmul.msk.f32.gmra.mxu3 %vm489_vm0, %v381_v49 }
 0x46b   : > { %v3414_v54 = vpop.f32.mrf.mxu1 }
 0x46c   : > { %v3415_v55 = vadd.f32 %v6161_v24, %v3414_v54  ;;  %v1647_v56 = vpop.f32.mrf.mxu0  ;;  %v1686_v54 = vpop.f32.mrf.mxu3 }
 0x46d   : > { %v4959_v57 = vpop.eup %4958  ;;  %v1648_v58 = vadd.f32 %v6071_v16, %v1647_v56  ;;  %v1678_v56 = vadd.f32 %v6071_v16, %v1677_v36 }
 0x46e   : > { %3969 = vst.msk [vmem:[%s5417_s16 + $0x358] sm:$0xff] %vm3861_vm2, %v3415_v55  ;;  %4562 = vmatmul.msk.f32.gmra.mxu1 %vm2307_vm1, %v4959_v57  ;;  %v382_v55 = vld [vmem:[%s5289_s26 + $0x4d0] sm:$0xff] }
 0x46f   : > { %4960 = vtanh.f32 %v1648_v58  ;;  %4337 = vmatmul.msk.f32.gmra.mxu3 %vm489_vm0, %v382_v55 }
 0x473   : > { %v3417_v60 = vpop.f32.mrf.mxu1 }
 0x474   : > { %v3418_v61 = vadd.f32 %v6161_v24, %v3417_v60  ;;  %v1650_v62 = vpop.f32.mrf.mxu0  ;;  %v1689_v60 = vpop.f32.mrf.mxu3 }
 0x475   : > { %v4961_v0 = vpop.eup %4960  ;;  %v1651_v1 = vadd.f32 %v6071_v16, %v1650_v62  ;;  %v1681_v62 = vadd.f32 %v6071_v16, %v1680_v42  ;;  %v1690_v21 = vadd.f32 %v6071_v16, %v1689_v60 }
 0x476   : > { %3970 = vst.msk [vmem:[%s5417_s16 + $0x360] sm:$0xff] %vm3861_vm2, %v3418_v61  ;;  %4563 = vmatmul.msk.f32.gmra.mxu1 %vm2307_vm1, %v4961_v0  ;;  %v383_v61 = vld [vmem:[%s5289_s26 + $0x4d8] sm:$0xff] }
 0x477   : > { %4962 = vtanh.f32 %v1651_v1  ;;  %4338 = vmatmul.msk.f32.gmra.mxu3 %vm489_vm0, %v383_v61 }
 0x47b   : > { %v3420_v3 = vpop.f32.mrf.mxu1 }
 0x47c   : > { %v3421_v4 = vadd.f32 %v6161_v24, %v3420_v3  ;;  %v1653_v5 = vpop.f32.mrf.mxu0  ;;  %v1692_v2 = vpop.f32.mrf.mxu3  ;;  %v384_v3 = vld [vmem:[%s5289_s26 + $0x4e0] sm:$0xff] }
 0x47d   : > { %v4963_v7 = vpop.eup %4962  ;;  %v1654_v8 = vadd.f32 %v6071_v16, %v1653_v5 }
 0x47e   : > { %3971 = vst.msk [vmem:[%s5417_s16 + $0x368] sm:$0xff] %vm3861_vm2, %v3421_v4  ;;  %4564 = vmatmul.msk.f32.gmra.mxu1 %vm2307_vm1, %v4963_v7  ;;  %v1684_v4 = vadd.f32 %v6071_v16, %v1683_v48 }
 0x47f   : > { %4964 = vtanh.f32 %v1654_v8  ;;  %4339 = vmatmul.msk.f32.gmra.mxu3 %vm489_vm0, %v384_v3 }
 0x483   : > { %v3423_v10 = vpop.f32.mrf.mxu1 }
 0x484   : > { %v3424_v11 = vadd.f32 %v6161_v24, %v3423_v10  ;;  %v1656_v12 = vpop.f32.mrf.mxu0  ;;  %v1695_v8 = vpop.f32.mrf.mxu3  ;;  %v1687_v10 = vadd.f32 %v6071_v16, %v1686_v54 }
 0x485   : > { %v4965_v14 = vpop.eup %4964  ;;  %v1657_v15 = vadd.f32 %v6071_v16, %v1656_v12 }
 0x486   : > { %3972 = vst.msk [vmem:[%s5417_s16 + $0x370] sm:$0xff] %vm3861_vm2, %v3424_v11  ;;  %4565 = vmatmul.msk.f32.gmra.mxu1 %vm2307_vm1, %v4965_v14 }
 0x487   : > { %4966 = vtanh.f32 %v1657_v15  ;;  %4340 = vmatmul.msk.f32.gmra.mxu3 %vm489_vm0, %v385_v9  ;;  %v386_v15 = vld [vmem:[%s5289_s26 + $0x4f0] sm:$0xff] }
 0x48b   : > { %v3426_v17 = vpop.f32.mrf.mxu1 }
 0x48c   : > { %v3427_v18 = vadd.f32 %v6161_v24, %v3426_v17  ;;  %v1659_v19 = vpop.f32.mrf.mxu0  ;;  %v1698_v14 = vpop.f32.mrf.mxu3 }
 0x48d   : > { %v4967_v22 = vpop.eup %4966  ;;  %v1660_v26 = vadd.f32 %v6071_v16, %v1659_v19  ;;  %v1699_v36 = vadd.f32 %v6071_v16, %v1698_v14 }
 0x48e   : > { %3973 = vst.msk [vmem:[%s5417_s16 + $0x378] sm:$0xff] %vm3861_vm2, %v3427_v18  ;;  %4566 = vmatmul.msk.f32.gmra.mxu1 %vm2307_vm1, %v4967_v22  ;;  %v387_v22 = vld [vmem:[%s5289_s26 + $0x4f8] sm:$0xff] }
 0x48f   : > { %4968 = vtanh.f32 %v1660_v26  ;;  %4341 = vmatmul.msk.f32.gmra.mxu3 %vm489_vm0, %v386_v15  ;;  %v1693_v26 = vadd.f32 %v6071_v16, %v1692_v2 }
 0x490   : > { %4970 = vtanh.f32 %v1663_v25 }
 0x491   : > { %4972 = vtanh.f32 %v1666_v32 }
 0x492   : > { %4974 = vtanh.f32 %v1669_v38 }
 0x493   : > { %v3429_v27 = vpop.f32.mrf.mxu1  ;;  %4976 = vtanh.f32 %v1672_v44 }
 0x494   : > { %v3430_v28 = vadd.f32 %v6161_v24, %v3429_v27  ;;  %4978 = vtanh.f32 %v1675_v50  ;;  %v1701_v20 = vpop.f32.mrf.mxu3 }
 0x495   : > { %v4969_v30 = vpop.eup %4968  ;;  %4980 = vtanh.f32 %v1678_v56  ;;  %v1702_v42 = vadd.f32 %v6071_v16, %v1701_v20 }
 0x496   : > { %3974 = vst.msk [vmem:[%s5417_s16 + $0x380] sm:$0xff] %vm3861_vm2, %v3430_v28  ;;  %4567 = vmatmul.msk.f32.vlgmr.msra.gmra.mxu2 %vm2307_vm1, %v4969_v30  ;;  %v4971_v33 = vpop.eup %4970  ;;  %4982 = vtanh.f32 %v1681_v62  ;;  %v1696_v30 = vadd.f32 %v6071_v16, %v1695_v8 }
 0x497   : > { %v4973_v39 = vpop.eup %4972  ;;  %4984 = vtanh.f32 %v1684_v4  ;;  %4342 = vmatmul.msk.f32.gmra.mxu3 %vm489_vm0, %v387_v22 }
 0x498   : > { %v4975_v45 = vpop.eup %4974  ;;  %4986 = vtanh.f32 %v1687_v10 }
 0x499   : > { %v4977_v51 = vpop.eup %4976  ;;  %4988 = vtanh.f32 %v1690_v21 }
 0x49a   : > { %v4979_v57 = vpop.eup %4978  ;;  %4990 = vtanh.f32 %v1693_v26 }
 0x49b   : > { %v3432_v34 = vpop.f32.mrf.mxu1  ;;  %v4981_v63 = vpop.eup %4980  ;;  %4992 = vtanh.f32 %v1696_v30 }
 0x49c   : > { %v3433_v35 = vadd.f32 %v6161_v24, %v3432_v34  ;;  %v4983_v5 = vpop.eup %4982  ;;  %v1704_v28 = vpop.f32.mrf.mxu3  ;;  %4994 = vtanh.f32 %v1699_v36 }
 0x49d   : > { %v4985_v11 = vpop.eup %4984  ;;  %4996 = vtanh.f32 %v1702_v42  ;;  %v1705_v48 = vadd.f32 %v6071_v16, %v1704_v28 }
 0x49e   : > { %3975 = vst.msk [vmem:[%s5417_s16 + $0x388] sm:$0xff] %vm3861_vm2, %v3433_v35  ;;  %4568 = vmatmul.msk.f32.gmra.mxu2 %vm2307_vm1, %v4971_v33  ;;  %v4987_v17 = vpop.eup %4986  ;;  %v389_v35 = vld [vmem:[%s5289_s26 + $0x508] sm:$0xff] }
 0x49f   : > { %v4989_v23 = vpop.eup %4988  ;;  %4343 = vmatmul.msk.f32.gmra.mxu3 %vm489_vm0, %v388_v29  ;;  %4998 = vtanh.f32 %v1705_v48 }
 0x4a0   : > { %v4991_v31 = vpop.eup %4990 }
 0x4a1   : > { %v4993_v37 = vpop.eup %4992 }
 0x4a2   : > { %v4995_v43 = vpop.eup %4994 }
 0x4a3   : > { %v3435_v40 = vpop.f32.mrf.mxu1  ;;  %v4997_v49 = vpop.eup %4996 }
 0x4a4   : > { %v3436_v41 = vadd.f32 %v6161_v24, %v3435_v40  ;;  %v1707_v34 = vpop.f32.mrf.mxu3 }
 0x4a5   : > { %v1708_v54 = vadd.f32 %v6071_v16, %v1707_v34  ;;  %v4999_v55 = vpop.eup %4998 }
 0x4a6   : > { %3976 = vst.msk [vmem:[%s5417_s16 + $0x390] sm:$0xff] %vm3861_vm2, %v3436_v41  ;;  %4569 = vmatmul.msk.f32.gmra.mxu2 %vm2307_vm1, %v4973_v39  ;;  %v390_v41 = vld [vmem:[%s5289_s26 + $0x510] sm:$0xff] }
 0x4a7   : > { %4344 = vmatmul.msk.f32.gmra.mxu3 %vm489_vm0, %v389_v35  ;;  %5000 = vtanh.f32 %v1708_v54 }
 0x4ab   : > { %v3438_v46 = vpop.f32.mrf.mxu1 }
 0x4ac   : > { %v3439_v47 = vadd.f32 %v6161_v24, %v3438_v46  ;;  %v1710_v40 = vpop.f32.mrf.mxu3 }
 0x4ad   : > { %v1711_v60 = vadd.f32 %v6071_v16, %v1710_v40  ;;  %v5001_v61 = vpop.eup %5000 }
 0x4ae   : > { %3977 = vst.msk [vmem:[%s5417_s16 + $0x398] sm:$0xff] %vm3861_vm2, %v3439_v47  ;;  %4570 = vmatmul.msk.f32.gmra.mxu2 %vm2307_vm1, %v4975_v45  ;;  %v391_v47 = vld [vmem:[%s5289_s26 + $0x518] sm:$0xff] }
 0x4af   : > { %4345 = vmatmul.msk.f32.gmra.mxu3 %vm489_vm0, %v390_v41  ;;  %5002 = vtanh.f32 %v1711_v60 }
 0x4b3   : > { %v3441_v52 = vpop.f32.mrf.mxu1 }
 0x4b4   : > { %v3442_v53 = vadd.f32 %v6161_v24, %v3441_v52  ;;  %v1713_v46 = vpop.f32.mrf.mxu3 }
 0x4b5   : > { %v5003_v3 = vpop.eup %5002 }
 0x4b6   : > { %3978 = vst.msk [vmem:[%s5417_s16 + $0x3a0] sm:$0xff] %vm3861_vm2, %v3442_v53  ;;  %4571 = vmatmul.msk.f32.gmra.mxu2 %vm2307_vm1, %v4977_v51  ;;  %v392_v53 = vld [vmem:[%s5289_s26 + $0x520] sm:$0xff] }
 0x4b7   : > { %4346 = vmatmul.msk.f32.gmra.mxu3 %vm489_vm0, %v391_v47 }
 0x4bb   : > { %v3444_v58 = vpop.f32.mrf.mxu1 }
 0x4bc   : > { %v3445_v59 = vadd.f32 %v6161_v24, %v3444_v58  ;;  %v1716_v52 = vpop.f32.mrf.mxu3 }
 0x4be   : > { %3979 = vst.msk [vmem:[%s5417_s16 + $0x3a8] sm:$0xff] %vm3861_vm2, %v3445_v59  ;;  %4572 = vmatmul.msk.f32.gmra.mxu2 %vm2307_vm1, %v4979_v57  ;;  %v393_v59 = vld [vmem:[%s5289_s26 + $0x528] sm:$0xff] }
 0x4bf   : > { %4347 = vmatmul.msk.f32.gmra.mxu3 %vm489_vm0, %v392_v53 }
 0x4c3   : > { %v3447_v0 = vpop.f32.mrf.mxu1 }
 0x4c4   : > { %v3448_v1 = vadd.f32 %v6161_v24, %v3447_v0  ;;  %v1719_v58 = vpop.f32.mrf.mxu3 }
 0x4c6   : > { %3980 = vst.msk [vmem:[%s5417_s16 + $0x3b0] sm:$0xff] %vm3861_vm2, %v3448_v1  ;;  %4573 = vmatmul.msk.f32.gmra.mxu2 %vm2307_vm1, %v4981_v63  ;;  %v394_v63 = vld [vmem:[%s5289_s26 + $0x530] sm:$0xff]  ;;  %v1714_v1 = vadd.f32 %v6071_v16, %v1713_v46 }
 0x4c7   : > { %4348 = vmatmul.msk.f32.gmra.mxu3 %vm489_vm0, %v393_v59 }
 0x4c8   : > { %5004 = vtanh.f32 %v1714_v1 }
 0x4cb   : > { %v3450_v6 = vpop.f32.mrf.mxu1 }
 0x4cc   : > { %v3451_v7 = vadd.f32 %v6161_v24, %v3450_v6  ;;  %v1722_v62 = vpop.f32.mrf.mxu3 }
 0x4ce   : > { %3981 = vst.msk [vmem:[%s5417_s16 + $0x3b8] sm:$0xff] %vm3861_vm2, %v3451_v7  ;;  %4574 = vmatmul.msk.f32.gmra.mxu2 %vm2307_vm1, %v4983_v5  ;;  %v395_v5 = vld [vmem:[%s5289_s26 + $0x538] sm:$0xff]  ;;  %v1717_v7 = vadd.f32 %v6071_v16, %v1716_v52  ;;  %v5005_v9 = vpop.eup %5004 }
 0x4cf   : > { %4349 = vmatmul.msk.f32.gmra.mxu3 %vm489_vm0, %v394_v63 }
 0x4d0   : > { %5006 = vtanh.f32 %v1717_v7 }
 0x4d3   : > { %v3453_v12 = vpop.f32.mrf.mxu1 }
 0x4d4   : > { %v3454_v13 = vadd.f32 %v6161_v24, %v3453_v12  ;;  %v1725_v4 = vpop.f32.mrf.mxu3 }
 0x4d6   : > { %3982 = vst.msk [vmem:[%s5417_s16 + $0x3c0] sm:$0xff] %vm3861_vm2, %v3454_v13  ;;  %4575 = vmatmul.msk.f32.gmra.mxu2 %vm2307_vm1, %v4985_v11  ;;  %v396_v11 = vld [vmem:[%s5289_s26 + $0x540] sm:$0xff]  ;;  %v1720_v13 = vadd.f32 %v6071_v16, %v1719_v58  ;;  %v5007_v15 = vpop.eup %5006 }
 0x4d7   : > { %4350 = vmatmul.msk.f32.gmra.mxu3 %vm489_vm0, %v395_v5 }
 0x4d8   : > { %5008 = vtanh.f32 %v1720_v13 }
 0x4db   : > { %v3456_v18 = vpop.f32.mrf.mxu1 }
 0x4dc   : > { %v3457_v19 = vadd.f32 %v6161_v24, %v3456_v18  ;;  %v1728_v10 = vpop.f32.mrf.mxu3 }
 0x4de   : > { %3983 = vst.msk [vmem:[%s5417_s16 + $0x3c8] sm:$0xff] %vm3861_vm2, %v3457_v19  ;;  %4576 = vmatmul.msk.f32.gmra.mxu2 %vm2307_vm1, %v4987_v17  ;;  %v397_v17 = vld [vmem:[%s5289_s26 + $0x548] sm:$0xff]  ;;  %v1723_v19 = vadd.f32 %v6071_v16, %v1722_v62  ;;  %v5009_v22 = vpop.eup %5008 }
 0x4df   : > { %4351 = vmatmul.msk.f32.gmra.mxu3 %vm489_vm0, %v396_v11 }
 0x4e0   : > { %5010 = vtanh.f32 %v1723_v19 }
 0x4e3   : > { %v3459_v25 = vpop.f32.mrf.mxu1 }
 0x4e4   : > { %v3460_v27 = vadd.f32 %v6161_v24, %v3459_v25  ;;  %v1731_v21 = vpop.f32.mrf.mxu3 }
 0x4e6   : > { %3984 = vst.msk [vmem:[%s5417_s16 + $0x3d0] sm:$0xff] %vm3861_vm2, %v3460_v27  ;;  %4577 = vmatmul.msk.f32.gmra.mxu2 %vm2307_vm1, %v4989_v23  ;;  %v398_v23 = vld [vmem:[%s5289_s26 + $0x550] sm:$0xff]  ;;  %v1726_v27 = vadd.f32 %v6071_v16, %v1725_v4  ;;  %v5011_v29 = vpop.eup %5010 }
 0x4e7   : > { %4352 = vmatmul.msk.f32.gmra.mxu3 %vm489_vm0, %v397_v17  ;;  %v6443_v17 = vld [vmem:[%s7157_s2] ss:$0 sm:$0xff] }
 0x4e8   : > { %5012 = vtanh.f32 %v1726_v27 }
 0x4eb   : > { %v3462_v32 = vpop.f32.mrf.mxu1 }
 0x4ec   : > { %v3463_v33 = vadd.f32 %v6161_v24, %v3462_v32  ;;  %v1734_v26 = vpop.f32.mrf.mxu3 }
 0x4ee   : > { %3985 = vst.msk [vmem:[%s5417_s16 + $0x3d8] sm:$0xff] %vm3861_vm2, %v3463_v33  ;;  %4578 = vmatmul.msk.f32.gmra.mxu2 %vm2307_vm1, %v4991_v31  ;;  %v399_v31 = vld [vmem:[%s5289_s26 + $0x558] sm:$0xff]  ;;  %v1729_v33 = vadd.f32 %v6071_v16, %v1728_v10  ;;  %v5013_v35 = vpop.eup %5012 }
 0x4ef   : > { %4353 = vmatmul.msk.f32.gmra.mxu3 %vm489_vm0, %v398_v23 }
 0x4f0   : > { %5014 = vtanh.f32 %v1729_v33 }
 0x4f3   : > { %v3465_v38 = vpop.f32.mrf.mxu1 }
 0x4f4   : > { %v3466_v39 = vadd.f32 %v6161_v24, %v3465_v38  ;;  %v1737_v30 = vpop.f32.mrf.mxu3 }
 0x4f6   : > { %3986 = vst.msk [vmem:[%s5417_s16 + $0x3e0] sm:$0xff] %vm3861_vm2, %v3466_v39  ;;  %4579 = vmatmul.msk.f32.gmra.mxu2 %vm2307_vm1, %v4993_v37  ;;  %v400_v37 = vld [vmem:[%s5289_s26 + $0x560] sm:$0xff]  ;;  %v1732_v39 = vadd.f32 %v6071_v16, %v1731_v21  ;;  %v5015_v41 = vpop.eup %5014 }
 0x4f7   : > { %4354 = vmatmul.msk.f32.gmra.mxu3 %vm489_vm0, %v399_v31 }
 0x4f8   : > { %5016 = vtanh.f32 %v1732_v39 }
 0x4fb   : > { %v3468_v44 = vpop.f32.mrf.mxu1 }
 0x4fc   : > { %v3469_v45 = vadd.f32 %v6161_v24, %v3468_v44  ;;  %v1740_v36 = vpop.f32.mrf.mxu3 }
 0x4fe   : > { %3987 = vst.msk [vmem:[%s5417_s16 + $0x3e8] sm:$0xff] %vm3861_vm2, %v3469_v45  ;;  %4580 = vmatmul.msk.f32.gmra.mxu2 %vm2307_vm1, %v4995_v43  ;;  %v401_v43 = vld [vmem:[%s5289_s26 + $0x568] sm:$0xff]  ;;  %v1735_v45 = vadd.f32 %v6071_v16, %v1734_v26  ;;  %v5017_v47 = vpop.eup %5016 }
 0x4ff   : > { %4355 = vmatmul.msk.f32.gmra.mxu3 %vm489_vm0, %v400_v37 }
 0x500   : > { %5018 = vtanh.f32 %v1735_v45 }
 0x503   : > { %v3471_v50 = vpop.f32.mrf.mxu1 }
 0x504   : > { %v3472_v51 = vadd.f32 %v6161_v24, %v3471_v50  ;;  %v1743_v42 = vpop.f32.mrf.mxu3 }
 0x505   : > { %v1744_v63 = vadd.f32 %v6071_v16, %v1743_v42 }
 0x506   : > { %3988 = vst.msk [vmem:[%s5417_s16 + $0x3f0] sm:$0xff] %vm3861_vm2, %v3472_v51  ;;  %4581 = vmatmul.msk.f32.gmra.mxu2 %vm2307_vm1, %v4997_v49  ;;  %v402_v49 = vld [vmem:[%s5289_s26 + $0x570] sm:$0xff]  ;;  %v1738_v51 = vadd.f32 %v6071_v16, %v1737_v30  ;;  %v5019_v53 = vpop.eup %5018 }
 0x507   : > { %4356 = vmatmul.msk.f32.gmra.mxu3 %vm489_vm0, %v401_v43 }
 0x508   : > { %5020 = vtanh.f32 %v1738_v51 }
 0x50b   : > { %v3474_v56 = vpop.f32.mrf.mxu1 }
 0x50c   : > { %v3475_v57 = vadd.f32 %v6161_v24, %v3474_v56  ;;  %v1746_v48 = vpop.f32.mrf.mxu3 }
 0x50d   : > { %v1747_v5 = vadd.f32 %v6071_v16, %v1746_v48 }
 0x50e   : > { %3989 = vst.msk [vmem:[%s5417_s16 + $0x3f8] sm:$0xff] %vm3861_vm2, %v3475_v57  ;;  %4582 = vmatmul.msk.f32.gmra.mxu2 %vm2307_vm1, %v4999_v55  ;;  %v403_v55 = vld [vmem:[%s5289_s26 + $0x578] sm:$0xff]  ;;  %v1741_v57 = vadd.f32 %v6071_v16, %v1740_v36  ;;  %v5021_v59 = vpop.eup %5020 }
 0x50f   : > { %4357 = vmatmul.msk.f32.gmra.mxu3 %vm489_vm0, %v402_v49 }
 0x510   : > { %5022 = vtanh.f32 %v1741_v57 }
 0x511   : > { %5024 = vtanh.f32 %v1744_v63 }
 0x512   : > { %5026 = vtanh.f32 %v1747_v5 }
 0x514   : > { %v1749_v54 = vpop.f32.mrf.mxu3 }
 0x515   : > { %v1750_v11 = vadd.f32 %v6071_v16, %v1749_v54 }
 0x516   : > { %4583 = vmatmul.msk.f32.gmra.mxu2 %vm2307_vm1, %v5001_v61  ;;  %v404_v61 = vld [vmem:[%s5289_s26 + $0x580] sm:$0xff]  ;;  %v5023_v1 = vpop.eup %5022 }
 0x517   : > { %4358 = vmatmul.msk.f32.gmra.mxu3 %vm489_vm0, %v403_v55  ;;  %v5025_v7 = vpop.eup %5024  ;;  %5028 = vtanh.f32 %v1750_v11 }
 0x518   : > { %v5027_v13 = vpop.eup %5026 }
 0x519   : > { %v3477_v0 = vpop.f32.mrf.mxu2 }
 0x51a   : > { %v3478_v2 = vadd.f32 %v6161_v24, %v3477_v0 }
 0x51c   : > { %3990 = vst.msk [vmem:[%s5417_s16 + $0x400] sm:$0xff] %vm3861_vm2, %v3478_v2  ;;  %v1752_v60 = vpop.f32.mrf.mxu3 }
 0x51d   : > { %v1753_v16 = vadd.f32 %v6443_v17, %v1752_v60  ;;  %v5029_v19 = vpop.eup %5028 }
 0x51e   : > { %4584 = vmatmul.msk.f32.gmra.mxu2 %vm2307_vm1, %v5003_v3  ;;  %v405_v3 = vld [vmem:[%s5289_s26 + $0x588] sm:$0xff] }
 0x51f   : > { %4359 = vmatmul.msk.f32.gmra.mxu3 %vm489_vm0, %v404_v61  ;;  %5030 = vtanh.f32 %v1753_v16 }
 0x521   : > { %v3480_v6 = vpop.f32.mrf.mxu2 }
 0x522   : > { %v3481_v8 = vadd.f32 %v6161_v24, %v3480_v6 }
 0x524   : > { %3991 = vst.msk [vmem:[%s5417_s16 + $0x408] sm:$0xff] %vm3861_vm2, %v3481_v8  ;;  %v1755_v2 = vpop.f32.mrf.mxu3 }
 0x525   : > { %v1756_v23 = vadd.f32 %v6443_v17, %v1755_v2  ;;  %v5031_v27 = vpop.eup %5030 }
 0x526   : > { %4585 = vmatmul.msk.f32.gmra.mxu2 %vm2307_vm1, %v5005_v9  ;;  %v406_v9 = vld [vmem:[%s5289_s26 + $0x590] sm:$0xff] }
 0x527   : > { %4360 = vmatmul.msk.f32.gmra.mxu3 %vm489_vm0, %v405_v3  ;;  %5032 = vtanh.f32 %v1756_v23 }
 0x529   : > { %v3483_v12 = vpop.f32.mrf.mxu2 }
 0x52a   : > { %v3484_v14 = vadd.f32 %v6161_v24, %v3483_v12 }
 0x52c   : > { %3992 = vst.msk [vmem:[%s5417_s16 + $0x410] sm:$0xff] %vm3861_vm2, %v3484_v14  ;;  %v1758_v8 = vpop.f32.mrf.mxu3 }
 0x52d   : > { %v1759_v31 = vadd.f32 %v6443_v17, %v1758_v8  ;;  %v5033_v33 = vpop.eup %5032 }
 0x52e   : > { %4586 = vmatmul.msk.f32.gmra.mxu2 %vm2307_vm1, %v5007_v15  ;;  %v407_v15 = vld [vmem:[%s5289_s26 + $0x598] sm:$0xff] }
 0x52f   : > { %4361 = vmatmul.msk.f32.gmra.mxu3 %vm489_vm0, %v406_v9  ;;  %5034 = vtanh.f32 %v1759_v31 }
 0x531   : > { %v3486_v18 = vpop.f32.mrf.mxu2 }
 0x532   : > { %v3487_v20 = vadd.f32 %v6161_v24, %v3486_v18 }
 0x534   : > { %3993 = vst.msk [vmem:[%s5417_s16 + $0x418] sm:$0xff] %vm3861_vm2, %v3487_v20  ;;  %v1761_v14 = vpop.f32.mrf.mxu3 }
 0x535   : > { %v1762_v37 = vadd.f32 %v6443_v17, %v1761_v14  ;;  %v5035_v39 = vpop.eup %5034 }
 0x536   : > { %4587 = vmatmul.msk.f32.gmra.mxu2 %vm2307_vm1, %v5009_v22  ;;  %v408_v22 = vld [vmem:[%s5289_s26 + $0x5a0] sm:$0xff] }
 0x537   : > { %4362 = vmatmul.msk.f32.gmra.mxu3 %vm489_vm0, %v407_v15  ;;  %5036 = vtanh.f32 %v1762_v37 }
 0x539   : > { %v3489_v25 = vpop.f32.mrf.mxu2 }
 0x53a   : > { %v3490_v28 = vadd.f32 %v6161_v24, %v3489_v25 }
 0x53c   : > { %3994 = vst.msk [vmem:[%s5417_s16 + $0x420] sm:$0xff] %vm3861_vm2, %v3490_v28  ;;  %v1764_v20 = vpop.f32.mrf.mxu3 }
 0x53d   : > { %v1765_v43 = vadd.f32 %v6443_v17, %v1764_v20  ;;  %v5037_v45 = vpop.eup %5036 }
 0x53e   : > { %4588 = vmatmul.msk.f32.gmra.mxu2 %vm2307_vm1, %v5011_v29  ;;  %v409_v29 = vld [vmem:[%s5289_s26 + $0x5a8] sm:$0xff] }
 0x53f   : > { %4363 = vmatmul.msk.f32.gmra.mxu3 %vm489_vm0, %v408_v22  ;;  %5038 = vtanh.f32 %v1765_v43 }
 0x541   : > { %v3492_v32 = vpop.f32.mrf.mxu2 }
 0x542   : > { %v3493_v34 = vadd.f32 %v6161_v24, %v3492_v32 }
 0x544   : > { %3995 = vst.msk [vmem:[%s5417_s16 + $0x428] sm:$0xff] %vm3861_vm2, %v3493_v34  ;;  %v1767_v28 = vpop.f32.mrf.mxu3 }
 0x545   : > { %v1768_v49 = vadd.f32 %v6443_v17, %v1767_v28  ;;  %v5039_v51 = vpop.eup %5038 }
 0x546   : > { %4589 = vmatmul.msk.f32.gmra.mxu2 %vm2307_vm1, %v5013_v35  ;;  %v410_v35 = vld [vmem:[%s5289_s26 + $0x5b0] sm:$0xff] }
 0x547   : > { %4364 = vmatmul.msk.f32.gmra.mxu3 %vm489_vm0, %v409_v29  ;;  %5040 = vtanh.f32 %v1768_v49 }
 0x549   : > { %v3495_v38 = vpop.f32.mrf.mxu2 }
 0x54a   : > { %v3496_v40 = vadd.f32 %v6161_v24, %v3495_v38 }
 0x54c   : > { %3996 = vst.msk [vmem:[%s5417_s16 + $0x430] sm:$0xff] %vm3861_vm2, %v3496_v40  ;;  %v1770_v34 = vpop.f32.mrf.mxu3 }
 0x54d   : > { %v1771_v55 = vadd.f32 %v6443_v17, %v1770_v34  ;;  %v5041_v57 = vpop.eup %5040 }
 0x54e   : > { %4590 = vmatmul.msk.f32.gmra.mxu2 %vm2307_vm1, %v5015_v41  ;;  %v411_v41 = vld [vmem:[%s5289_s26 + $0x5b8] sm:$0xff] }
 0x54f   : > { %4365 = vmatmul.msk.f32.gmra.mxu3 %vm489_vm0, %v410_v35  ;;  %5042 = vtanh.f32 %v1771_v55 }
 0x551   : > { %v3498_v44 = vpop.f32.mrf.mxu2 }
 0x552   : > { %v3499_v46 = vadd.f32 %v6161_v24, %v3498_v44 }
 0x554   : > { %3997 = vst.msk [vmem:[%s5417_s16 + $0x438] sm:$0xff] %vm3861_vm2, %v3499_v46  ;;  %v1773_v40 = vpop.f32.mrf.mxu3 }
 0x555   : > { %v1774_v61 = vadd.f32 %v6443_v17, %v1773_v40  ;;  %v5043_v63 = vpop.eup %5042 }
 0x556   : > { %4591 = vmatmul.msk.f32.gmra.mxu2 %vm2307_vm1, %v5017_v47  ;;  %v412_v47 = vld [vmem:[%s5289_s26 + $0x5c0] sm:$0xff] }
 0x557   : > { %4366 = vmatmul.msk.f32.gmra.mxu3 %vm489_vm0, %v411_v41  ;;  %5044 = vtanh.f32 %v1774_v61 }
 0x559   : > { %v3501_v50 = vpop.f32.mrf.mxu2 }
 0x55a   : > { %v3502_v52 = vadd.f32 %v6161_v24, %v3501_v50 }
 0x55c   : > { %3998 = vst.msk [vmem:[%s5417_s16 + $0x440] sm:$0xff] %vm3861_vm2, %v3502_v52  ;;  %v1776_v46 = vpop.f32.mrf.mxu3 }
 0x55d   : > { %v1777_v3 = vadd.f32 %v6443_v17, %v1776_v46  ;;  %v5045_v5 = vpop.eup %5044 }
 0x55e   : > { %4592 = vmatmul.msk.f32.gmra.mxu2 %vm2307_vm1, %v5019_v53  ;;  %v413_v53 = vld [vmem:[%s5289_s26 + $0x5c8] sm:$0xff] }
 0x55f   : > { %4367 = vmatmul.msk.f32.gmra.mxu3 %vm489_vm0, %v412_v47  ;;  %5046 = vtanh.f32 %v1777_v3 }
 0x561   : > { %v3504_v56 = vpop.f32.mrf.mxu2 }
 0x562   : > { %v3505_v58 = vadd.f32 %v6161_v24, %v3504_v56 }
 0x564   : > { %3999 = vst.msk [vmem:[%s5417_s16 + $0x448] sm:$0xff] %vm3861_vm2, %v3505_v58  ;;  %v1779_v52 = vpop.f32.mrf.mxu3 }
 0x565   : > { %v1780_v9 = vadd.f32 %v6443_v17, %v1779_v52  ;;  %v5047_v11 = vpop.eup %5046 }
 0x566   : > { %4593 = vmatmul.msk.f32.gmra.mxu2 %vm2307_vm1, %v5021_v59  ;;  %v414_v59 = vld [vmem:[%s5289_s26 + $0x5d0] sm:$0xff] }
 0x567   : > { %4368 = vmatmul.msk.f32.gmra.mxu3 %vm489_vm0, %v413_v53  ;;  %5048 = vtanh.f32 %v1780_v9 }
 0x569   : > { %v3507_v62 = vpop.f32.mrf.mxu2 }
 0x56a   : > { %v3508_v0 = vadd.f32 %v6161_v24, %v3507_v62 }
 0x56c   : > { %4000 = vst.msk [vmem:[%s5417_s16 + $0x450] sm:$0xff] %vm3861_vm2, %v3508_v0  ;;  %v1782_v58 = vpop.f32.mrf.mxu3 }
 0x56d   : > { %v1783_v15 = vadd.f32 %v6443_v17, %v1782_v58  ;;  %v5049_v16 = vpop.eup %5048 }
 0x56e   : > { %4594 = vmatmul.msk.f32.gmra.mxu2 %vm2307_vm1, %v5023_v1  ;;  %v415_v1 = vld [vmem:[%s5289_s26 + $0x5d8] sm:$0xff] }
 0x56f   : > { %4369 = vmatmul.msk.f32.gmra.mxu3 %vm489_vm0, %v414_v59  ;;  %5050 = vtanh.f32 %v1783_v15 }
 0x571   : > { %v3510_v4 = vpop.f32.mrf.mxu2 }
 0x572   : > { %v3511_v6 = vadd.f32 %v6161_v24, %v3510_v4 }
 0x574   : > { %4001 = vst.msk [vmem:[%s5417_s16 + $0x458] sm:$0xff] %vm3861_vm2, %v3511_v6  ;;  %v1785_v0 = vpop.f32.mrf.mxu3 }
 0x575   : > { %v1786_v22 = vadd.f32 %v6443_v17, %v1785_v0  ;;  %v5051_v23 = vpop.eup %5050 }
 0x576   : > { %4595 = vmatmul.msk.f32.gmra.mxu2 %vm2307_vm1, %v5025_v7  ;;  %v416_v7 = vld [vmem:[%s5289_s26 + $0x5e0] sm:$0xff] }
 0x577   : > { %4370 = vmatmul.msk.f32.gmra.mxu3 %vm489_vm0, %v415_v1  ;;  %5052 = vtanh.f32 %v1786_v22 }
 0x579   : > { %v3513_v10 = vpop.f32.mrf.mxu2 }
 0x57a   : > { %v3514_v12 = vadd.f32 %v6161_v24, %v3513_v10 }
 0x57c   : > { %4002 = vst.msk [vmem:[%s5417_s16 + $0x460] sm:$0xff] %vm3861_vm2, %v3514_v12  ;;  %v1788_v6 = vpop.f32.mrf.mxu3 }
 0x57d   : > { %v1789_v29 = vadd.f32 %v6443_v17, %v1788_v6  ;;  %v5053_v31 = vpop.eup %5052 }
 0x57e   : > { %4596 = vmatmul.msk.f32.gmra.mxu2 %vm2307_vm1, %v5027_v13  ;;  %v417_v13 = vld [vmem:[%s5289_s26 + $0x5e8] sm:$0xff] }
 0x57f   : > { %4371 = vmatmul.msk.f32.gmra.mxu3 %vm489_vm0, %v416_v7  ;;  %5054 = vtanh.f32 %v1789_v29 }
 0x581   : > { %v3516_v21 = vpop.f32.mrf.mxu2 }
 0x582   : > { %v3517_v18 = vadd.f32 %v6161_v24, %v3516_v21 }
 0x584   : > { %4003 = vst.msk [vmem:[%s5417_s16 + $0x468] sm:$0xff] %vm3861_vm2, %v3517_v18  ;;  %v1791_v12 = vpop.f32.mrf.mxu3 }
 0x585   : > { %v1792_v35 = vadd.f32 %v6443_v17, %v1791_v12  ;;  %v5055_v37 = vpop.eup %5054 }
 0x586   : > { %4597 = vmatmul.msk.f32.gmra.mxu2 %vm2307_vm1, %v5029_v19  ;;  %v418_v19 = vld [vmem:[%s5289_s26 + $0x5f0] sm:$0xff] }
 0x587   : > { %4372 = vmatmul.msk.f32.gmra.mxu3 %vm489_vm0, %v417_v13  ;;  %5056 = vtanh.f32 %v1792_v35 }
 0x589   : > { %v3519_v26 = vpop.f32.mrf.mxu2 }
 0x58a   : > { %v3520_v25 = vadd.f32 %v6161_v24, %v3519_v26  ;;  %v6526_v26 = vld [vmem:[%s7159_s4] ss:$0 sm:$0xff] }
 0x58c   : > { %4004 = vst.msk [vmem:[%s5417_s16 + $0x470] sm:$0xff] %vm3861_vm2, %v3520_v25  ;;  %v1794_v18 = vpop.f32.mrf.mxu3 }
 0x58d   : > { %v1795_v41 = vadd.f32 %v6443_v17, %v1794_v18  ;;  %v5057_v43 = vpop.eup %5056 }
 0x58e   : > { %4598 = vmatmul.msk.f32.gmra.mxu2 %vm2307_vm1, %v5031_v27  ;;  %v419_v27 = vld [vmem:[%s5289_s26 + $0x5f8] sm:$0xff] }
 0x58f   : > { %4373 = vmatmul.msk.f32.gmra.mxu3 %vm489_vm0, %v418_v19  ;;  %5058 = vtanh.f32 %v1795_v41 }
 0x591   : > { %v3522_v30 = vpop.f32.mrf.mxu2 }
 0x592   : > { %v3523_v32 = vadd.f32 %v6161_v24, %v3522_v30 }
 0x594   : > { %4005 = vst.msk [vmem:[%s5417_s16 + $0x478] sm:$0xff] %vm3861_vm2, %v3523_v32  ;;  %v1797_v25 = vpop.f32.mrf.mxu3 }
 0x595   : > { %v1798_v47 = vadd.f32 %v6443_v17, %v1797_v25  ;;  %v5059_v49 = vpop.eup %5058 }
 0x596   : > { %4599 = vmatmul.msk.f32.gmra.mxu2 %vm2307_vm1, %v5033_v33  ;;  %v420_v33 = vld [vmem:[%s5289_s26 + $0x600] sm:$0xff] }
 0x597   : > { %4374 = vmatmul.msk.f32.gmra.mxu3 %vm489_vm0, %v419_v27  ;;  %5060 = vtanh.f32 %v1798_v47 }
 0x599   : > { %v3525_v36 = vpop.f32.mrf.mxu2 }
 0x59a   : > { %v3526_v38 = vadd.f32 %v6161_v24, %v3525_v36 }
 0x59c   : > { %4006 = vst.msk [vmem:[%s5417_s16 + $0x480] sm:$0xff] %vm3861_vm2, %v3526_v38  ;;  %v1800_v32 = vpop.f32.mrf.mxu3 }
 0x59d   : > { %v1801_v53 = vadd.f32 %v6443_v17, %v1800_v32  ;;  %v5061_v55 = vpop.eup %5060 }
 0x59e   : > { %4600 = vmatmul.msk.f32.gmra.mxu2 %vm2307_vm1, %v5035_v39  ;;  %v421_v39 = vld [vmem:[%s5289_s26 + $0x608] sm:$0xff] }
 0x59f   : > { %4375 = vmatmul.msk.f32.gmra.mxu3 %vm489_vm0, %v420_v33  ;;  %5062 = vtanh.f32 %v1801_v53 }
 0x5a1   : > { %v3528_v42 = vpop.f32.mrf.mxu2 }
 0x5a2   : > { %v3529_v44 = vadd.f32 %v6161_v24, %v3528_v42 }
 0x5a4   : > { %4007 = vst.msk [vmem:[%s5417_s16 + $0x488] sm:$0xff] %vm3861_vm2, %v3529_v44  ;;  %v1803_v38 = vpop.f32.mrf.mxu3 }
 0x5a5   : > { %v1804_v59 = vadd.f32 %v6443_v17, %v1803_v38  ;;  %v5063_v61 = vpop.eup %5062 }
 0x5a6   : > { %4601 = vmatmul.msk.f32.gmra.mxu2 %vm2307_vm1, %v5037_v45  ;;  %v422_v45 = vld [vmem:[%s5289_s26 + $0x610] sm:$0xff] }
 0x5a7   : > { %4376 = vmatmul.msk.f32.gmra.mxu3 %vm489_vm0, %v421_v39  ;;  %5064 = vtanh.f32 %v1804_v59 }
 0x5a9   : > { %v3531_v48 = vpop.f32.mrf.mxu2 }
 0x5aa   : > { %v3532_v50 = vadd.f32 %v6161_v24, %v3531_v48 }
 0x5ac   : > { %4008 = vst.msk [vmem:[%s5417_s16 + $0x490] sm:$0xff] %vm3861_vm2, %v3532_v50  ;;  %v1806_v44 = vpop.f32.mrf.mxu3 }
 0x5ad   : > { %v1807_v1 = vadd.f32 %v6443_v17, %v1806_v44  ;;  %v5065_v3 = vpop.eup %5064 }
 0x5ae   : > { %4602 = vmatmul.msk.f32.gmra.mxu2 %vm2307_vm1, %v5039_v51  ;;  %v423_v51 = vld [vmem:[%s5289_s26 + $0x618] sm:$0xff] }
 0x5af   : > { %4377 = vmatmul.msk.f32.gmra.mxu3 %vm489_vm0, %v422_v45  ;;  %5066 = vtanh.f32 %v1807_v1 }
 0x5b1   : > { %v3534_v54 = vpop.f32.mrf.mxu2 }
 0x5b2   : > { %v3535_v56 = vadd.f32 %v6161_v24, %v3534_v54 }
 0x5b4   : > { %4009 = vst.msk [vmem:[%s5417_s16 + $0x498] sm:$0xff] %vm3861_vm2, %v3535_v56  ;;  %v1809_v50 = vpop.f32.mrf.mxu3 }
 0x5b5   : > { %v1810_v7 = vadd.f32 %v6443_v17, %v1809_v50  ;;  %v5067_v9 = vpop.eup %5066 }
 0x5b6   : > { %4603 = vmatmul.msk.f32.gmra.mxu2 %vm2307_vm1, %v5041_v57  ;;  %v424_v57 = vld [vmem:[%s5289_s26 + $0x620] sm:$0xff] }
 0x5b7   : > { %4378 = vmatmul.msk.f32.gmra.mxu3 %vm489_vm0, %v423_v51  ;;  %5068 = vtanh.f32 %v1810_v7 }
 0x5b9   : > { %v3537_v60 = vpop.f32.mrf.mxu2 }
 0x5ba   : > { %v3538_v62 = vadd.f32 %v6161_v24, %v3537_v60 }
 0x5bc   : > { %4010 = vst.msk [vmem:[%s5417_s16 + $0x4a0] sm:$0xff] %vm3861_vm2, %v3538_v62  ;;  %v1812_v56 = vpop.f32.mrf.mxu3 }
 0x5bd   : > { %v1813_v13 = vadd.f32 %v6443_v17, %v1812_v56  ;;  %v5069_v15 = vpop.eup %5068 }
 0x5be   : > { %4604 = vmatmul.msk.f32.gmra.mxu2 %vm2307_vm1, %v5043_v63  ;;  %v425_v63 = vld [vmem:[%s5289_s26 + $0x628] sm:$0xff] }
 0x5bf   : > { %4379 = vmatmul.msk.f32.gmra.mxu3 %vm489_vm0, %v424_v57  ;;  %5070 = vtanh.f32 %v1813_v13 }
 0x5c1   : > { %v3540_v2 = vpop.f32.mrf.mxu2 }
 0x5c2   : > { %v3541_v4 = vadd.f32 %v6161_v24, %v3540_v2 }
 0x5c4   : > { %4011 = vst.msk [vmem:[%s5417_s16 + $0x4a8] sm:$0xff] %vm3861_vm2, %v3541_v4  ;;  %v1815_v62 = vpop.f32.mrf.mxu3 }
 0x5c5   : > { %v1816_v19 = vadd.f32 %v6443_v17, %v1815_v62  ;;  %v5071_v22 = vpop.eup %5070 }
 0x5c6   : > { %4605 = vmatmul.msk.f32.gmra.mxu2 %vm2307_vm1, %v5045_v5  ;;  %v426_v5 = vld [vmem:[%s5289_s26 + $0x630] sm:$0xff] }
 0x5c7   : > { %4380 = vmatmul.msk.f32.gmra.mxu3 %vm489_vm0, %v425_v63  ;;  %5072 = vtanh.f32 %v1816_v19 }
 0x5c9   : > { %v3543_v8 = vpop.f32.mrf.mxu2 }
 0x5ca   : > { %v3544_v10 = vadd.f32 %v6161_v24, %v3543_v8 }
 0x5cc   : > { %4012 = vst.msk [vmem:[%s5417_s16 + $0x4b0] sm:$0xff] %vm3861_vm2, %v3544_v10  ;;  %v1818_v4 = vpop.f32.mrf.mxu3 }
 0x5cd   : > { %v1819_v27 = vadd.f32 %v6443_v17, %v1818_v4  ;;  %v5073_v29 = vpop.eup %5072 }
 0x5ce   : > { %4606 = vmatmul.msk.f32.gmra.mxu2 %vm2307_vm1, %v5047_v11  ;;  %v427_v11 = vld [vmem:[%s5289_s26 + $0x638] sm:$0xff] }
 0x5cf   : > { %4381 = vmatmul.msk.f32.gmra.mxu3 %vm489_vm0, %v426_v5  ;;  %5074 = vtanh.f32 %v1819_v27 }
 0x5d1   : > { %v3546_v14 = vpop.f32.mrf.mxu2 }
 0x5d2   : > { %v3547_v21 = vadd.f32 %v6161_v24, %v3546_v14 }
 0x5d4   : > { %4013 = vst.msk [vmem:[%s5417_s16 + $0x4b8] sm:$0xff] %vm3861_vm2, %v3547_v21  ;;  %v1821_v10 = vpop.f32.mrf.mxu3 }
 0x5d5   : > { %v1822_v33 = vadd.f32 %v6443_v17, %v1821_v10  ;;  %v5075_v35 = vpop.eup %5074 }
 0x5d6   : > { %4607 = vmatmul.msk.f32.gmra.mxu2 %vm2307_vm1, %v5049_v16  ;;  %v428_v16 = vld [vmem:[%s5289_s26 + $0x640] sm:$0xff] }
 0x5d7   : > { %4382 = vmatmul.msk.f32.gmra.mxu3 %vm489_vm0, %v427_v11  ;;  %5076 = vtanh.f32 %v1822_v33 }
 0x5d9   : > { %v3549_v20 = vpop.f32.mrf.mxu2 }
 0x5da   : > { %v3550_v24 = vadd.f32 %v6526_v26, %v3549_v20 }
 0x5dc   : > { %4014 = vst.msk [vmem:[%s5417_s16 + $0x4c0] sm:$0xff] %vm3861_vm2, %v3550_v24  ;;  %v1824_v21 = vpop.f32.mrf.mxu3 }
 0x5dd   : > { %v1825_v39 = vadd.f32 %v6443_v17, %v1824_v21  ;;  %v5077_v41 = vpop.eup %5076 }
 0x5de   : > { %4608 = vmatmul.msk.f32.gmra.mxu2 %vm2307_vm1, %v5051_v23  ;;  %v429_v23 = vld [vmem:[%s5289_s26 + $0x648] sm:$0xff] }
 0x5df   : > { %4383 = vmatmul.msk.f32.gmra.mxu3 %vm489_vm0, %v428_v16  ;;  %5078 = vtanh.f32 %v1825_v39 }
 0x5e1   : > { %v3552_v28 = vpop.f32.mrf.mxu2 }
 0x5e2   : > { %v3553_v30 = vadd.f32 %v6526_v26, %v3552_v28 }
 0x5e4   : > { %4015 = vst.msk [vmem:[%s5417_s16 + $0x4c8] sm:$0xff] %vm3861_vm2, %v3553_v30  ;;  %v1827_v24 = vpop.f32.mrf.mxu3 }
 0x5e5   : > { %v1828_v45 = vadd.f32 %v6443_v17, %v1827_v24  ;;  %v5079_v47 = vpop.eup %5078 }
 0x5e6   : > { %4609 = vmatmul.msk.f32.gmra.mxu2 %vm2307_vm1, %v5053_v31  ;;  %v430_v31 = vld [vmem:[%s5289_s26 + $0x650] sm:$0xff] }
 0x5e7   : > { %4384 = vmatmul.msk.f32.gmra.mxu3 %vm489_vm0, %v429_v23  ;;  %5080 = vtanh.f32 %v1828_v45 }
 0x5e9   : > { %v3555_v34 = vpop.f32.mrf.mxu2 }
 0x5ea   : > { %v3556_v36 = vadd.f32 %v6526_v26, %v3555_v34 }
 0x5ec   : > { %4016 = vst.msk [vmem:[%s5417_s16 + $0x4d0] sm:$0xff] %vm3861_vm2, %v3556_v36  ;;  %v1830_v30 = vpop.f32.mrf.mxu3 }
 0x5ed   : > { %v1831_v51 = vadd.f32 %v6443_v17, %v1830_v30  ;;  %v5081_v53 = vpop.eup %5080 }
 0x5ee   : > { %4610 = vmatmul.msk.f32.gmra.mxu2 %vm2307_vm1, %v5055_v37  ;;  %v431_v37 = vld [vmem:[%s5289_s26 + $0x658] sm:$0xff] }
 0x5ef   : > { %4385 = vmatmul.msk.f32.gmra.mxu3 %vm489_vm0, %v430_v31  ;;  %5082 = vtanh.f32 %v1831_v51 }
 0x5f1   : > { %v3558_v40 = vpop.f32.mrf.mxu2 }
 0x5f2   : > { %v3559_v42 = vadd.f32 %v6526_v26, %v3558_v40 }
 0x5f4   : > { %4017 = vst.msk [vmem:[%s5417_s16 + $0x4d8] sm:$0xff] %vm3861_vm2, %v3559_v42  ;;  %v1833_v36 = vpop.f32.mrf.mxu3 }
 0x5f5   : > { %v1834_v57 = vadd.f32 %v6443_v17, %v1833_v36  ;;  %v5083_v59 = vpop.eup %5082 }
 0x5f6   : > { %4611 = vmatmul.msk.f32.gmra.mxu2 %vm2307_vm1, %v5057_v43  ;;  %v432_v43 = vld [vmem:[%s5289_s26 + $0x660] sm:$0xff] }
 0x5f7   : > { %4386 = vmatmul.msk.f32.gmra.mxu3 %vm489_vm0, %v431_v37  ;;  %5084 = vtanh.f32 %v1834_v57 }
 0x5f9   : > { %v3561_v46 = vpop.f32.mrf.mxu2 }
 0x5fa   : > { %v3562_v48 = vadd.f32 %v6526_v26, %v3561_v46 }
 0x5fc   : > { %4018 = vst.msk [vmem:[%s5417_s16 + $0x4e0] sm:$0xff] %vm3861_vm2, %v3562_v48  ;;  %v1836_v42 = vpop.f32.mrf.mxu3 }
 0x5fd   : > { %v1837_v63 = vadd.f32 %v6443_v17, %v1836_v42  ;;  %v5085_v1 = vpop.eup %5084 }
 0x5fe   : > { %4612 = vmatmul.msk.f32.gmra.mxu2 %vm2307_vm1, %v5059_v49  ;;  %v433_v49 = vld [vmem:[%s5289_s26 + $0x668] sm:$0xff] }
 0x5ff   : > { %4387 = vmatmul.msk.f32.gmra.mxu3 %vm489_vm0, %v432_v43  ;;  %5086 = vtanh.f32 %v1837_v63 }
 0x601   : > { %v3564_v52 = vpop.f32.mrf.mxu2 }
 0x602   : > { %v3565_v54 = vadd.f32 %v6526_v26, %v3564_v52 }
 0x604   : > { %4019 = vst.msk [vmem:[%s5417_s16 + $0x4e8] sm:$0xff] %vm3861_vm2, %v3565_v54  ;;  %v1839_v48 = vpop.f32.mrf.mxu3 }
 0x605   : > { %v1840_v5 = vadd.f32 %v6443_v17, %v1839_v48  ;;  %v5087_v7 = vpop.eup %5086 }
 0x606   : > { %4613 = vmatmul.msk.f32.gmra.mxu2 %vm2307_vm1, %v5061_v55  ;;  %v434_v55 = vld [vmem:[%s5289_s26 + $0x670] sm:$0xff] }
 0x607   : > { %4388 = vmatmul.msk.f32.gmra.mxu3 %vm489_vm0, %v433_v49  ;;  %5088 = vtanh.f32 %v1840_v5 }
 0x609   : > { %v3567_v58 = vpop.f32.mrf.mxu2 }
 0x60a   : > { %v3568_v60 = vadd.f32 %v6526_v26, %v3567_v58 }
 0x60c   : > { %4020 = vst.msk [vmem:[%s5417_s16 + $0x4f0] sm:$0xff] %vm3861_vm2, %v3568_v60  ;;  %v1842_v54 = vpop.f32.mrf.mxu3 }
 0x60d   : > { %v1843_v11 = vadd.f32 %v6443_v17, %v1842_v54  ;;  %v5089_v13 = vpop.eup %5088 }
 0x60e   : > { %4614 = vmatmul.msk.f32.gmra.mxu2 %vm2307_vm1, %v5063_v61  ;;  %v435_v61 = vld [vmem:[%s5289_s26 + $0x678] sm:$0xff] }
 0x60f   : > { %4389 = vmatmul.msk.f32.gmra.mxu3 %vm489_vm0, %v434_v55  ;;  %5090 = vtanh.f32 %v1843_v11 }
 0x611   : > { %v3570_v0 = vpop.f32.mrf.mxu2 }
 0x612   : > { %v3571_v2 = vadd.f32 %v6526_v26, %v3570_v0 }
 0x614   : > { %4021 = vst.msk [vmem:[%s5417_s16 + $0x4f8] sm:$0xff] %vm3861_vm2, %v3571_v2  ;;  %v1845_v60 = vpop.f32.mrf.mxu3 }
 0x615   : > { %v1846_v16 = vadd.f32 %v6443_v17, %v1845_v60  ;;  %v5091_v19 = vpop.eup %5090 }
 0x616   : > { %4615 = vmatmul.msk.f32.gmra.mxu2 %vm2307_vm1, %v5065_v3  ;;  %v436_v3 = vld [vmem:[%s5289_s26 + $0x680] sm:$0xff] }
 0x617   : > { %4390 = vmatmul.msk.f32.gmra.mxu3 %vm489_vm0, %v435_v61  ;;  %5092 = vtanh.f32 %v1846_v16 }
 0x619   : > { %v3573_v6 = vpop.f32.mrf.mxu2 }
 0x61a   : > { %v3574_v8 = vadd.f32 %v6526_v26, %v3573_v6 }
 0x61c   : > { %4022 = vst.msk [vmem:[%s5417_s16 + $0x500] sm:$0xff] %vm3861_vm2, %v3574_v8  ;;  %v1848_v2 = vpop.f32.mrf.mxu3 }
 0x61d   : > { %v1849_v23 = vadd.f32 %v6443_v17, %v1848_v2  ;;  %v5093_v27 = vpop.eup %5092 }
 0x61e   : > { %4616 = vmatmul.msk.f32.gmra.mxu2 %vm2307_vm1, %v5067_v9  ;;  %v437_v9 = vld [vmem:[%s5289_s26 + $0x688] sm:$0xff] }
 0x61f   : > { %4391 = vmatmul.msk.f32.gmra.mxu3 %vm489_vm0, %v436_v3  ;;  %5094 = vtanh.f32 %v1849_v23 }
 0x621   : > { %v3576_v12 = vpop.f32.mrf.mxu2 }
 0x622   : > { %v3577_v14 = vadd.f32 %v6526_v26, %v3576_v12 }
 0x624   : > { %4023 = vst.msk [vmem:[%s5417_s16 + $0x508] sm:$0xff] %vm3861_vm2, %v3577_v14  ;;  %v1851_v8 = vpop.f32.mrf.mxu3 }
 0x625   : > { %v1852_v31 = vadd.f32 %v6443_v17, %v1851_v8  ;;  %v5095_v33 = vpop.eup %5094 }
 0x626   : > { %4617 = vmatmul.msk.f32.gmra.mxu2 %vm2307_vm1, %v5069_v15  ;;  %v438_v15 = vld [vmem:[%s5289_s26 + $0x690] sm:$0xff] }
 0x627   : > { %4392 = vmatmul.msk.f32.gmra.mxu3 %vm489_vm0, %v437_v9  ;;  %5096 = vtanh.f32 %v1852_v31 }
 0x629   : > { %v3579_v18 = vpop.f32.mrf.mxu2 }
 0x62a   : > { %v3580_v20 = vadd.f32 %v6526_v26, %v3579_v18 }
 0x62c   : > { %4024 = vst.msk [vmem:[%s5417_s16 + $0x510] sm:$0xff] %vm3861_vm2, %v3580_v20  ;;  %v1854_v14 = vpop.f32.mrf.mxu3 }
 0x62d   : > { %v1855_v37 = vadd.f32 %v6443_v17, %v1854_v14  ;;  %v5097_v39 = vpop.eup %5096 }
 0x62e   : > { %4618 = vmatmul.msk.f32.gmra.mxu2 %vm2307_vm1, %v5071_v22  ;;  %v439_v22 = vld [vmem:[%s5289_s26 + $0x698] sm:$0xff] }
 0x62f   : > { %4393 = vmatmul.msk.f32.gmra.mxu3 %vm489_vm0, %v438_v15  ;;  %5098 = vtanh.f32 %v1855_v37 }
 0x631   : > { %v3582_v25 = vpop.f32.mrf.mxu2 }
 0x632   : > { %v3583_v28 = vadd.f32 %v6526_v26, %v3582_v25 }
 0x634   : > { %4025 = vst.msk [vmem:[%s5417_s16 + $0x518] sm:$0xff] %vm3861_vm2, %v3583_v28  ;;  %v1857_v20 = vpop.f32.mrf.mxu3 }
 0x635   : > { %v1858_v43 = vadd.f32 %v6443_v17, %v1857_v20  ;;  %v5099_v45 = vpop.eup %5098 }
 0x636   : > { %4619 = vmatmul.msk.f32.gmra.mxu2 %vm2307_vm1, %v5073_v29  ;;  %v440_v29 = vld [vmem:[%s5289_s26 + $0x6a0] sm:$0xff] }
 0x637   : > { %4394 = vmatmul.msk.f32.gmra.mxu3 %vm489_vm0, %v439_v22  ;;  %5100 = vtanh.f32 %v1858_v43 }
 0x639   : > { %v3585_v32 = vpop.f32.mrf.mxu2 }
 0x63a   : > { %v3586_v34 = vadd.f32 %v6526_v26, %v3585_v32 }
 0x63c   : > { %4026 = vst.msk [vmem:[%s5417_s16 + $0x520] sm:$0xff] %vm3861_vm2, %v3586_v34  ;;  %v1860_v28 = vpop.f32.mrf.mxu3 }
 0x63d   : > { %v1861_v49 = vadd.f32 %v6443_v17, %v1860_v28  ;;  %v5101_v51 = vpop.eup %5100 }
 0x63e   : > { %4620 = vmatmul.msk.f32.gmra.mxu2 %vm2307_vm1, %v5075_v35  ;;  %v441_v35 = vld [vmem:[%s5289_s26 + $0x6a8] sm:$0xff] }
 0x63f   : > { %4395 = vmatmul.msk.f32.gmra.mxu3 %vm489_vm0, %v440_v29  ;;  %5102 = vtanh.f32 %v1861_v49 }
 0x641   : > { %v3588_v38 = vpop.f32.mrf.mxu2 }
 0x642   : > { %v3589_v40 = vadd.f32 %v6526_v26, %v3588_v38 }
 0x644   : > { %4027 = vst.msk [vmem:[%s5417_s16 + $0x528] sm:$0xff] %vm3861_vm2, %v3589_v40  ;;  %v1863_v34 = vpop.f32.mrf.mxu3 }
 0x645   : > { %v1864_v55 = vadd.f32 %v6443_v17, %v1863_v34  ;;  %v5103_v57 = vpop.eup %5102 }
 0x646   : > { %4621 = vmatmul.msk.f32.gmra.mxu2 %vm2307_vm1, %v5077_v41  ;;  %v442_v41 = vld [vmem:[%s5289_s26 + $0x6b0] sm:$0xff] }
 0x647   : > { %4396 = vmatmul.msk.f32.gmra.mxu3 %vm489_vm0, %v441_v35  ;;  %5104 = vtanh.f32 %v1864_v55 }
 0x649   : > { %v3591_v44 = vpop.f32.mrf.mxu2 }
 0x64a   : > { %v3592_v46 = vadd.f32 %v6526_v26, %v3591_v44 }
 0x64c   : > { %4028 = vst.msk [vmem:[%s5417_s16 + $0x530] sm:$0xff] %vm3861_vm2, %v3592_v46  ;;  %v1866_v40 = vpop.f32.mrf.mxu3 }
 0x64d   : > { %v1867_v61 = vadd.f32 %v6443_v17, %v1866_v40  ;;  %v5105_v63 = vpop.eup %5104 }
 0x64e   : > { %4622 = vmatmul.msk.f32.gmra.mxu2 %vm2307_vm1, %v5079_v47  ;;  %v443_v47 = vld [vmem:[%s5289_s26 + $0x6b8] sm:$0xff] }
 0x64f   : > { %4397 = vmatmul.msk.f32.gmra.mxu3 %vm489_vm0, %v442_v41  ;;  %5106 = vtanh.f32 %v1867_v61 }
 0x651   : > { %v3594_v50 = vpop.f32.mrf.mxu2 }
 0x652   : > { %v3595_v52 = vadd.f32 %v6526_v26, %v3594_v50 }
 0x654   : > { %4029 = vst.msk [vmem:[%s5417_s16 + $0x538] sm:$0xff] %vm3861_vm2, %v3595_v52  ;;  %v1869_v46 = vpop.f32.mrf.mxu3 }
 0x655   : > { %v1870_v3 = vadd.f32 %v6443_v17, %v1869_v46  ;;  %v5107_v5 = vpop.eup %5106 }
 0x656   : > { %4623 = vmatmul.msk.f32.gmra.mxu2 %vm2307_vm1, %v5081_v53  ;;  %v444_v53 = vld [vmem:[%s5289_s26 + $0x6c0] sm:$0xff] }
 0x657   : > { %4398 = vmatmul.msk.f32.gmra.mxu3 %vm489_vm0, %v443_v47  ;;  %5108 = vtanh.f32 %v1870_v3 }
 0x659   : > { %v3597_v56 = vpop.f32.mrf.mxu2 }
 0x65a   : > { %v3598_v58 = vadd.f32 %v6526_v26, %v3597_v56 }
 0x65c   : > { %4030 = vst.msk [vmem:[%s5417_s16 + $0x540] sm:$0xff] %vm3861_vm2, %v3598_v58  ;;  %v1872_v52 = vpop.f32.mrf.mxu3 }
 0x65d   : > { %v1873_v9 = vadd.f32 %v6443_v17, %v1872_v52  ;;  %v5109_v11 = vpop.eup %5108 }
 0x65e   : > { %4624 = vmatmul.msk.f32.gmra.mxu2 %vm2307_vm1, %v5083_v59  ;;  %v445_v59 = vld [vmem:[%s5289_s26 + $0x6c8] sm:$0xff] }
 0x65f   : > { %4399 = vmatmul.msk.f32.gmra.mxu3 %vm489_vm0, %v444_v53  ;;  %5110 = vtanh.f32 %v1873_v9 }
 0x661   : > { %v3600_v62 = vpop.f32.mrf.mxu2 }
 0x662   : > { %v3601_v0 = vadd.f32 %v6526_v26, %v3600_v62 }
 0x664   : > { %4031 = vst.msk [vmem:[%s5417_s16 + $0x548] sm:$0xff] %vm3861_vm2, %v3601_v0  ;;  %v1875_v58 = vpop.f32.mrf.mxu3 }
 0x665   : > { %v1876_v15 = vadd.f32 %v6443_v17, %v1875_v58  ;;  %v5111_v16 = vpop.eup %5110 }
 0x666   : > { %4625 = vmatmul.msk.f32.gmra.mxu2 %vm2307_vm1, %v5085_v1  ;;  %v446_v1 = vld [vmem:[%s5289_s26 + $0x6d0] sm:$0xff] }
 0x667   : > { %4400 = vmatmul.msk.f32.gmra.mxu3 %vm489_vm0, %v445_v59  ;;  %5112 = vtanh.f32 %v1876_v15 }
 0x669   : > { %v3603_v4 = vpop.f32.mrf.mxu2 }
 0x66a   : > { %v3604_v6 = vadd.f32 %v6526_v26, %v3603_v4 }
 0x66c   : > { %4032 = vst.msk [vmem:[%s5417_s16 + $0x550] sm:$0xff] %vm3861_vm2, %v3604_v6  ;;  %v1878_v0 = vpop.f32.mrf.mxu3 }
 0x66d   : > { %v1879_v22 = vadd.f32 %v6443_v17, %v1878_v0  ;;  %v5113_v23 = vpop.eup %5112 }
 0x66e   : > { %4626 = vmatmul.msk.f32.gmra.mxu2 %vm2307_vm1, %v5087_v7  ;;  %v447_v7 = vld [vmem:[%s5289_s26 + $0x6d8] sm:$0xff] }
 0x66f   : > { %4401 = vmatmul.msk.f32.gmra.mxu3 %vm489_vm0, %v446_v1  ;;  %5114 = vtanh.f32 %v1879_v22 }
 0x671   : > { %v3606_v10 = vpop.f32.mrf.mxu2 }
 0x672   : > { %v3607_v12 = vadd.f32 %v6526_v26, %v3606_v10 }
 0x674   : > { %4033 = vst.msk [vmem:[%s5417_s16 + $0x558] sm:$0xff] %vm3861_vm2, %v3607_v12  ;;  %v1881_v6 = vpop.f32.mrf.mxu3 }
 0x675   : > { %v1882_v29 = vadd.f32 %v6443_v17, %v1881_v6  ;;  %v5115_v31 = vpop.eup %5114 }
 0x676   : > { %4627 = vmatmul.msk.f32.gmra.mxu2 %vm2307_vm1, %v5089_v13  ;;  %v448_v13 = vld [vmem:[%s5289_s26 + $0x6e0] sm:$0xff] }
 0x677   : > { %4402 = vmatmul.msk.f32.gmra.mxu3 %vm489_vm0, %v447_v7  ;;  %5116 = vtanh.f32 %v1882_v29 }
 0x679   : > { %v3609_v21 = vpop.f32.mrf.mxu2 }
 0x67a   : > { %v3610_v18 = vadd.f32 %v6526_v26, %v3609_v21 }
 0x67c   : > { %4034 = vst.msk [vmem:[%s5417_s16 + $0x560] sm:$0xff] %vm3861_vm2, %v3610_v18  ;;  %v1884_v12 = vpop.f32.mrf.mxu3 }
 0x67d   : > { %v1885_v35 = vadd.f32 %v6443_v17, %v1884_v12  ;;  %v5117_v37 = vpop.eup %5116 }
 0x67e   : > { %4628 = vmatmul.msk.f32.gmra.mxu2 %vm2307_vm1, %v5091_v19  ;;  %v449_v19 = vld [vmem:[%s5289_s26 + $0x6e8] sm:$0xff] }
 0x67f   : > { %4403 = vmatmul.msk.f32.gmra.mxu3 %vm489_vm0, %v448_v13  ;;  %5118 = vtanh.f32 %v1885_v35 }
 0x681   : > { %v3612_v24 = vpop.f32.mrf.mxu2 }
 0x682   : > { %v3613_v25 = vadd.f32 %v6526_v26, %v3612_v24 }
 0x684   : > { %4035 = vst.msk [vmem:[%s5417_s16 + $0x568] sm:$0xff] %vm3861_vm2, %v3613_v25  ;;  %v1887_v18 = vpop.f32.mrf.mxu3 }
 0x685   : > { %v1888_v41 = vadd.f32 %v6443_v17, %v1887_v18  ;;  %v5119_v43 = vpop.eup %5118 }
 0x686   : > { %4629 = vmatmul.msk.f32.gmra.mxu2 %vm2307_vm1, %v5093_v27  ;;  %v450_v27 = vld [vmem:[%s5289_s26 + $0x6f0] sm:$0xff] }
 0x687   : > { %4404 = vmatmul.msk.f32.gmra.mxu3 %vm489_vm0, %v449_v19  ;;  %5120 = vtanh.f32 %v1888_v41  ;;  %v6817_v19 = vld [vmem:[%s7157_s2] ss:$0 sm:$0xff] }
 0x689   : > { %v3615_v30 = vpop.f32.mrf.mxu2 }
 0x68a   : > { %v3616_v32 = vadd.f32 %v6526_v26, %v3615_v30 }
 0x68c   : > { %4036 = vst.msk [vmem:[%s5417_s16 + $0x570] sm:$0xff] %vm3861_vm2, %v3616_v32  ;;  %v1890_v25 = vpop.f32.mrf.mxu3 }
 0x68d   : > { %v1891_v47 = vadd.f32 %v6443_v17, %v1890_v25  ;;  %v5121_v49 = vpop.eup %5120 }
 0x68e   : > { %4630 = vmatmul.msk.f32.gmra.mxu2 %vm2307_vm1, %v5095_v33  ;;  %v451_v33 = vld [vmem:[%s5289_s26 + $0x6f8] sm:$0xff] }
 0x68f   : > { %4405 = vmatmul.msk.f32.gmra.mxu3 %vm489_vm0, %v450_v27  ;;  %5122 = vtanh.f32 %v1891_v47 }
 0x691   : > { %v3618_v36 = vpop.f32.mrf.mxu2 }
 0x692   : > { %v3619_v38 = vadd.f32 %v6526_v26, %v3618_v36 }
 0x694   : > { %4037 = vst.msk [vmem:[%s5417_s16 + $0x578] sm:$0xff] %vm3861_vm2, %v3619_v38  ;;  %v1893_v32 = vpop.f32.mrf.mxu3 }
 0x695   : > { %v1894_v53 = vadd.f32 %v6443_v17, %v1893_v32  ;;  %v5123_v55 = vpop.eup %5122 }
 0x696   : > { %4631 = vmatmul.msk.f32.gmra.mxu2 %vm2307_vm1, %v5097_v39  ;;  %v452_v39 = vld [vmem:[%s5289_s26 + $0x700] sm:$0xff] }
 0x697   : > { %4406 = vmatmul.msk.f32.gmra.mxu3 %vm489_vm0, %v451_v33  ;;  %5124 = vtanh.f32 %v1894_v53 }
 0x699   : > { %v3621_v42 = vpop.f32.mrf.mxu2 }
 0x69a   : > { %v3622_v44 = vadd.f32 %v6526_v26, %v3621_v42 }
 0x69c   : > { %4038 = vst.msk [vmem:[%s5417_s16 + $0x580] sm:$0xff] %vm3861_vm2, %v3622_v44  ;;  %v1896_v38 = vpop.f32.mrf.mxu3 }
 0x69d   : > { %v1897_v59 = vadd.f32 %v6443_v17, %v1896_v38  ;;  %v5125_v61 = vpop.eup %5124 }
 0x69e   : > { %4632 = vmatmul.msk.f32.gmra.mxu2 %vm2307_vm1, %v5099_v45  ;;  %v453_v45 = vld [vmem:[%s5289_s26 + $0x708] sm:$0xff] }
 0x69f   : > { %4407 = vmatmul.msk.f32.gmra.mxu3 %vm489_vm0, %v452_v39  ;;  %5126 = vtanh.f32 %v1897_v59 }
 0x6a1   : > { %v3624_v48 = vpop.f32.mrf.mxu2 }
 0x6a2   : > { %v3625_v50 = vadd.f32 %v6526_v26, %v3624_v48 }
 0x6a4   : > { %4039 = vst.msk [vmem:[%s5417_s16 + $0x588] sm:$0xff] %vm3861_vm2, %v3625_v50  ;;  %v1899_v44 = vpop.f32.mrf.mxu3 }
 0x6a5   : > { %v1900_v1 = vadd.f32 %v6443_v17, %v1899_v44  ;;  %v5127_v3 = vpop.eup %5126 }
 0x6a6   : > { %4633 = vmatmul.msk.f32.gmra.mxu2 %vm2307_vm1, %v5101_v51  ;;  %v454_v51 = vld [vmem:[%s5289_s26 + $0x710] sm:$0xff] }
 0x6a7   : > { %4408 = vmatmul.msk.f32.gmra.mxu3 %vm489_vm0, %v453_v45  ;;  %5128 = vtanh.f32 %v1900_v1 }
 0x6a9   : > { %v3627_v54 = vpop.f32.mrf.mxu2 }
 0x6aa   : > { %v3628_v56 = vadd.f32 %v6526_v26, %v3627_v54 }
 0x6ac   : > { %4040 = vst.msk [vmem:[%s5417_s16 + $0x590] sm:$0xff] %vm3861_vm2, %v3628_v56  ;;  %v1902_v50 = vpop.f32.mrf.mxu3 }
 0x6ad   : > { %v1903_v7 = vadd.f32 %v6443_v17, %v1902_v50  ;;  %v5129_v9 = vpop.eup %5128 }
 0x6ae   : > { %4634 = vmatmul.msk.f32.gmra.mxu2 %vm2307_vm1, %v5103_v57  ;;  %v455_v57 = vld [vmem:[%s5289_s26 + $0x718] sm:$0xff] }
 0x6af   : > { %4409 = vmatmul.msk.f32.gmra.mxu3 %vm489_vm0, %v454_v51  ;;  %5130 = vtanh.f32 %v1903_v7 }
 0x6b1   : > { %v3630_v60 = vpop.f32.mrf.mxu2 }
 0x6b2   : > { %v3631_v62 = vadd.f32 %v6526_v26, %v3630_v60 }
 0x6b4   : > { %4041 = vst.msk [vmem:[%s5417_s16 + $0x598] sm:$0xff] %vm3861_vm2, %v3631_v62  ;;  %v1905_v56 = vpop.f32.mrf.mxu3 }
 0x6b5   : > { %v1906_v13 = vadd.f32 %v6443_v17, %v1905_v56  ;;  %v5131_v15 = vpop.eup %5130 }
 0x6b6   : > { %4635 = vmatmul.msk.f32.gmra.mxu2 %vm2307_vm1, %v5105_v63  ;;  %v456_v63 = vld [vmem:[%s5289_s26 + $0x720] sm:$0xff] }
 0x6b7   : > { %4410 = vmatmul.msk.f32.gmra.mxu3 %vm489_vm0, %v455_v57  ;;  %5132 = vtanh.f32 %v1906_v13 }
 0x6b9   : > { %v3633_v2 = vpop.f32.mrf.mxu2 }
 0x6ba   : > { %v3634_v4 = vadd.f32 %v6526_v26, %v3633_v2 }
 0x6bc   : > { %4042 = vst.msk [vmem:[%s5417_s16 + $0x5a0] sm:$0xff] %vm3861_vm2, %v3634_v4  ;;  %v1908_v62 = vpop.f32.mrf.mxu3 }
 0x6bd   : > { %v1909_v17 = vadd.f32 %v6817_v19, %v1908_v62  ;;  %v5133_v22 = vpop.eup %5132 }
 0x6be   : > { %4636 = vmatmul.msk.f32.gmra.mxu2 %vm2307_vm1, %v5107_v5  ;;  %v457_v5 = vld [vmem:[%s5289_s26 + $0x728] sm:$0xff] }
 0x6bf   : > { %4411 = vmatmul.msk.f32.gmra.mxu3 %vm489_vm0, %v456_v63  ;;  %5134 = vtanh.f32 %v1909_v17 }
 0x6c1   : > { %v3636_v8 = vpop.f32.mrf.mxu2 }
 0x6c2   : > { %v3637_v10 = vadd.f32 %v6526_v26, %v3636_v8 }
 0x6c4   : > { %4043 = vst.msk [vmem:[%s5417_s16 + $0x5a8] sm:$0xff] %vm3861_vm2, %v3637_v10  ;;  %v1911_v4 = vpop.f32.mrf.mxu3 }
 0x6c5   : > { %v1912_v27 = vadd.f32 %v6817_v19, %v1911_v4  ;;  %v5135_v29 = vpop.eup %5134 }
 0x6c6   : > { %4637 = vmatmul.msk.f32.gmra.mxu2 %vm2307_vm1, %v5109_v11  ;;  %v458_v11 = vld [vmem:[%s5289_s26 + $0x730] sm:$0xff] }
 0x6c7   : > { %4412 = vmatmul.msk.f32.gmra.mxu3 %vm489_vm0, %v457_v5  ;;  %5136 = vtanh.f32 %v1912_v27 }
 0x6c9   : > { %v3639_v14 = vpop.f32.mrf.mxu2 }
 0x6ca   : > { %v3640_v21 = vadd.f32 %v6526_v26, %v3639_v14 }
 0x6cc   : > { %4044 = vst.msk [vmem:[%s5417_s16 + $0x5b0] sm:$0xff] %vm3861_vm2, %v3640_v21  ;;  %v1914_v10 = vpop.f32.mrf.mxu3 }
 0x6cd   : > { %v1915_v33 = vadd.f32 %v6817_v19, %v1914_v10  ;;  %v5137_v35 = vpop.eup %5136 }
 0x6ce   : > { %4638 = vmatmul.msk.f32.gmra.mxu2 %vm2307_vm1, %v5111_v16  ;;  %v459_v16 = vld [vmem:[%s5289_s26 + $0x738] sm:$0xff] }
 0x6cf   : > { %4413 = vmatmul.msk.f32.gmra.mxu3 %vm489_vm0, %v458_v11  ;;  %5138 = vtanh.f32 %v1915_v33 }
 0x6d1   : > { %v3642_v20 = vpop.f32.mrf.mxu2 }
 0x6d2   : > { %v3643_v24 = vadd.f32 %v6526_v26, %v3642_v20 }
 0x6d4   : > { %4045 = vst.msk [vmem:[%s5417_s16 + $0x5b8] sm:$0xff] %vm3861_vm2, %v3643_v24  ;;  %v1917_v21 = vpop.f32.mrf.mxu3 }
 0x6d5   : > { %v1918_v39 = vadd.f32 %v6817_v19, %v1917_v21  ;;  %v5139_v41 = vpop.eup %5138 }
 0x6d6   : > { %4639 = vmatmul.msk.f32.gmra.mxu2 %vm2307_vm1, %v5113_v23  ;;  %v460_v23 = vld [vmem:[%s5289_s26 + $0x740] sm:$0xff] }
 0x6d7   : > { %4414 = vmatmul.msk.f32.gmra.mxu3 %vm489_vm0, %v459_v16  ;;  %5140 = vtanh.f32 %v1918_v39 }
 0x6d9   : > { %v3645_v28 = vpop.f32.mrf.mxu2 }
 0x6da   : > { %v3646_v30 = vadd.f32 %v6526_v26, %v3645_v28 }
 0x6dc   : > { %4046 = vst.msk [vmem:[%s5417_s16 + $0x5c0] sm:$0xff] %vm3861_vm2, %v3646_v30  ;;  %v1920_v24 = vpop.f32.mrf.mxu3 }
 0x6dd   : > { %v1921_v45 = vadd.f32 %v6817_v19, %v1920_v24  ;;  %v5141_v47 = vpop.eup %5140 }
 0x6de   : > { %4640 = vmatmul.msk.f32.gmra.mxu2 %vm2307_vm1, %v5115_v31  ;;  %v461_v31 = vld [vmem:[%s5289_s26 + $0x748] sm:$0xff] }
 0x6df   : > { %4415 = vmatmul.msk.f32.gmra.mxu3 %vm489_vm0, %v460_v23  ;;  %5142 = vtanh.f32 %v1921_v45 }
 0x6e1   : > { %v3648_v34 = vpop.f32.mrf.mxu2 }
 0x6e2   : > { %v3649_v36 = vadd.f32 %v6526_v26, %v3648_v34 }
 0x6e4   : > { %4047 = vst.msk [vmem:[%s5417_s16 + $0x5c8] sm:$0xff] %vm3861_vm2, %v3649_v36  ;;  %v1923_v30 = vpop.f32.mrf.mxu3 }
 0x6e5   : > { %v1924_v51 = vadd.f32 %v6817_v19, %v1923_v30  ;;  %v5143_v53 = vpop.eup %5142 }
 0x6e6   : > { %4641 = vmatmul.msk.f32.gmra.mxu2 %vm2307_vm1, %v5117_v37  ;;  %v462_v37 = vld [vmem:[%s5289_s26 + $0x750] sm:$0xff] }
 0x6e7   : > { %4416 = vmatmul.msk.f32.gmra.mxu3 %vm489_vm0, %v461_v31  ;;  %5144 = vtanh.f32 %v1924_v51 }
 0x6e9   : > { %v3651_v40 = vpop.f32.mrf.mxu2 }
 0x6ea   : > { %v3652_v42 = vadd.f32 %v6526_v26, %v3651_v40 }
 0x6ec   : > { %4048 = vst.msk [vmem:[%s5417_s16 + $0x5d0] sm:$0xff] %vm3861_vm2, %v3652_v42  ;;  %v1926_v36 = vpop.f32.mrf.mxu3 }
 0x6ed   : > { %v1927_v57 = vadd.f32 %v6817_v19, %v1926_v36  ;;  %v5145_v59 = vpop.eup %5144 }
 0x6ee   : > { %4642 = vmatmul.msk.f32.gmra.mxu2 %vm2307_vm1, %v5119_v43  ;;  %v463_v43 = vld [vmem:[%s5289_s26 + $0x758] sm:$0xff] }
 0x6ef   : > { %4417 = vmatmul.msk.f32.gmra.mxu3 %vm489_vm0, %v462_v37  ;;  %5146 = vtanh.f32 %v1927_v57 }
 0x6f1   : > { %v3654_v46 = vpop.f32.mrf.mxu2 }
 0x6f2   : > { %v3655_v48 = vadd.f32 %v6526_v26, %v3654_v46 }
 0x6f4   : > { %4049 = vst.msk [vmem:[%s5417_s16 + $0x5d8] sm:$0xff] %vm3861_vm2, %v3655_v48  ;;  %v1929_v42 = vpop.f32.mrf.mxu3 }
 0x6f5   : > { %v1930_v63 = vadd.f32 %v6817_v19, %v1929_v42  ;;  %v5147_v1 = vpop.eup %5146 }
 0x6f6   : > { %4643 = vmatmul.msk.f32.gmra.mxu2 %vm2307_vm1, %v5121_v49  ;;  %v464_v49 = vld [vmem:[%s5289_s26 + $0x760] sm:$0xff] }
 0x6f7   : > { %4418 = vmatmul.msk.f32.gmra.mxu3 %vm489_vm0, %v463_v43  ;;  %5148 = vtanh.f32 %v1930_v63 }
 0x6f9   : > { %v3657_v52 = vpop.f32.mrf.mxu2 }
 0x6fa   : > { %v3658_v54 = vadd.f32 %v6526_v26, %v3657_v52 }
 0x6fc   : > { %4050 = vst.msk [vmem:[%s5417_s16 + $0x5e0] sm:$0xff] %vm3861_vm2, %v3658_v54  ;;  %v1932_v48 = vpop.f32.mrf.mxu3 }
 0x6fd   : > { %v1933_v5 = vadd.f32 %v6817_v19, %v1932_v48  ;;  %v5149_v7 = vpop.eup %5148 }
 0x6fe   : > { %4644 = vmatmul.msk.f32.gmra.mxu2 %vm2307_vm1, %v5123_v55  ;;  %v465_v55 = vld [vmem:[%s5289_s26 + $0x768] sm:$0xff] }
 0x6ff   : > { %4419 = vmatmul.msk.f32.gmra.mxu3 %vm489_vm0, %v464_v49  ;;  %5150 = vtanh.f32 %v1933_v5 }
 0x701   : > { %v3660_v58 = vpop.f32.mrf.mxu2 }
 0x702   : > { %v3661_v60 = vadd.f32 %v6526_v26, %v3660_v58 }
 0x704   : > { %4051 = vst.msk [vmem:[%s5417_s16 + $0x5e8] sm:$0xff] %vm3861_vm2, %v3661_v60  ;;  %v1935_v54 = vpop.f32.mrf.mxu3 }
 0x705   : > { %v1936_v11 = vadd.f32 %v6817_v19, %v1935_v54  ;;  %v5151_v13 = vpop.eup %5150 }
 0x706   : > { %4645 = vmatmul.msk.f32.gmra.mxu2 %vm2307_vm1, %v5125_v61  ;;  %v466_v61 = vld [vmem:[%s5289_s26 + $0x770] sm:$0xff] }
 0x707   : > { %4420 = vmatmul.msk.f32.gmra.mxu3 %vm489_vm0, %v465_v55  ;;  %5152 = vtanh.f32 %v1936_v11 }
 0x709   : > { %v3663_v0 = vpop.f32.mrf.mxu2 }
 0x70a   : > { %v3664_v2 = vadd.f32 %v6526_v26, %v3663_v0 }
 0x70c   : > { %4052 = vst.msk [vmem:[%s5417_s16 + $0x5f0] sm:$0xff] %vm3861_vm2, %v3664_v2  ;;  %v1938_v60 = vpop.f32.mrf.mxu3 }
 0x70d   : > { %v1939_v16 = vadd.f32 %v6817_v19, %v1938_v60  ;;  %v5153_v17 = vpop.eup %5152 }
 0x70e   : > { %4646 = vmatmul.msk.f32.gmra.mxu2 %vm2307_vm1, %v5127_v3  ;;  %v467_v3 = vld [vmem:[%s5289_s26 + $0x778] sm:$0xff] }
 0x70f   : > { %4421 = vmatmul.msk.f32.gmra.mxu3 %vm489_vm0, %v466_v61  ;;  %5154 = vtanh.f32 %v1939_v16 }
 0x711   : > { %v3666_v6 = vpop.f32.mrf.mxu2 }
 0x712   : > { %v3667_v8 = vadd.f32 %v6526_v26, %v3666_v6 }
 0x714   : > { %4053 = vst.msk [vmem:[%s5417_s16 + $0x5f8] sm:$0xff] %vm3861_vm2, %v3667_v8  ;;  %v1941_v2 = vpop.f32.mrf.mxu3 }
 0x715   : > { %v1942_v23 = vadd.f32 %v6817_v19, %v1941_v2  ;;  %v5155_v27 = vpop.eup %5154 }
 0x716   : > { %4647 = vmatmul.msk.f32.gmra.mxu2 %vm2307_vm1, %v5129_v9  ;;  %v468_v9 = vld [vmem:[%s5289_s26 + $0x780] sm:$0xff] }
 0x717   : > { %4422 = vmatmul.msk.f32.gmra.mxu3 %vm489_vm0, %v467_v3  ;;  %5156 = vtanh.f32 %v1942_v23 }
 0x719   : > { %v3669_v12 = vpop.f32.mrf.mxu2 }
 0x71a   : > { %v3670_v14 = vadd.f32 %v6526_v26, %v3669_v12 }
 0x71c   : > { %4054 = vst.msk [vmem:[%s5417_s16 + $0x600] sm:$0xff] %vm3861_vm2, %v3670_v14  ;;  %v1944_v8 = vpop.f32.mrf.mxu3 }
 0x71d   : > { %v1945_v31 = vadd.f32 %v6817_v19, %v1944_v8  ;;  %v5157_v33 = vpop.eup %5156 }
 0x71e   : > { %4648 = vmatmul.msk.f32.gmra.mxu2 %vm2307_vm1, %v5131_v15  ;;  %v469_v15 = vld [vmem:[%s5289_s26 + $0x788] sm:$0xff] }
 0x71f   : > { %4423 = vmatmul.msk.f32.gmra.mxu3 %vm489_vm0, %v468_v9  ;;  %5158 = vtanh.f32 %v1945_v31 }
 0x721   : > { %v3672_v18 = vpop.f32.mrf.mxu2 }
 0x722   : > { %v3673_v20 = vadd.f32 %v6526_v26, %v3672_v18 }
 0x724   : > { %4055 = vst.msk [vmem:[%s5417_s16 + $0x608] sm:$0xff] %vm3861_vm2, %v3673_v20  ;;  %v1947_v14 = vpop.f32.mrf.mxu3 }
 0x725   : > { %v1948_v37 = vadd.f32 %v6817_v19, %v1947_v14  ;;  %v5159_v39 = vpop.eup %5158 }
 0x726   : > { %4649 = vmatmul.msk.f32.gmra.mxu2 %vm2307_vm1, %v5133_v22  ;;  %v470_v22 = vld [vmem:[%s5289_s26 + $0x790] sm:$0xff] }
 0x727   : > { %4424 = vmatmul.msk.f32.gmra.mxu3 %vm489_vm0, %v469_v15  ;;  %5160 = vtanh.f32 %v1948_v37 }
 0x729   : > { %v3675_v25 = vpop.f32.mrf.mxu2 }
 0x72a   : > { %v3676_v28 = vadd.f32 %v6526_v26, %v3675_v25  ;;  %v6900_v25 = vld [vmem:[%s7159_s4] ss:$0 sm:$0xff] }
 0x72c   : > { %4056 = vst.msk [vmem:[%s5417_s16 + $0x610] sm:$0xff] %vm3861_vm2, %v3676_v28  ;;  %v1950_v20 = vpop.f32.mrf.mxu3 }
 0x72d   : > { %v1951_v43 = vadd.f32 %v6817_v19, %v1950_v20  ;;  %v5161_v45 = vpop.eup %5160 }
 0x72e   : > { %4650 = vmatmul.msk.f32.gmra.mxu2 %vm2307_vm1, %v5135_v29  ;;  %v471_v29 = vld [vmem:[%s5289_s26 + $0x798] sm:$0xff] }
 0x72f   : > { %4425 = vmatmul.msk.f32.gmra.mxu3 %vm489_vm0, %v470_v22  ;;  %5162 = vtanh.f32 %v1951_v43 }
 0x731   : > { %v3678_v32 = vpop.f32.mrf.mxu2 }
 0x732   : > { %v3679_v34 = vadd.f32 %v6526_v26, %v3678_v32 }
 0x734   : > { %4057 = vst.msk [vmem:[%s5417_s16 + $0x618] sm:$0xff] %vm3861_vm2, %v3679_v34  ;;  %v1953_v28 = vpop.f32.mrf.mxu3 }
 0x735   : > { %v1954_v49 = vadd.f32 %v6817_v19, %v1953_v28  ;;  %v5163_v51 = vpop.eup %5162 }
 0x736   : > { %4651 = vmatmul.msk.f32.gmra.mxu2 %vm2307_vm1, %v5137_v35  ;;  %v472_v35 = vld [vmem:[%s5289_s26 + $0x7a0] sm:$0xff] }
 0x737   : > { %4426 = vmatmul.msk.f32.gmra.mxu3 %vm489_vm0, %v471_v29  ;;  %5164 = vtanh.f32 %v1954_v49 }
 0x739   : > { %v3681_v38 = vpop.f32.mrf.mxu2 }
 0x73a   : > { %v3682_v40 = vadd.f32 %v6526_v26, %v3681_v38 }
 0x73c   : > { %4058 = vst.msk [vmem:[%s5417_s16 + $0x620] sm:$0xff] %vm3861_vm2, %v3682_v40  ;;  %v1956_v34 = vpop.f32.mrf.mxu3 }
 0x73d   : > { %v1957_v55 = vadd.f32 %v6817_v19, %v1956_v34  ;;  %v5165_v57 = vpop.eup %5164 }
 0x73e   : > { %4652 = vmatmul.msk.f32.gmra.mxu2 %vm2307_vm1, %v5139_v41  ;;  %v473_v41 = vld [vmem:[%s5289_s26 + $0x7a8] sm:$0xff] }
 0x73f   : > { %4427 = vmatmul.msk.f32.gmra.mxu3 %vm489_vm0, %v472_v35  ;;  %5166 = vtanh.f32 %v1957_v55 }
 0x741   : > { %v3684_v44 = vpop.f32.mrf.mxu2 }
 0x742   : > { %v3685_v46 = vadd.f32 %v6526_v26, %v3684_v44 }
 0x744   : > { %4059 = vst.msk [vmem:[%s5417_s16 + $0x628] sm:$0xff] %vm3861_vm2, %v3685_v46  ;;  %v1959_v40 = vpop.f32.mrf.mxu3 }
 0x745   : > { %v1960_v61 = vadd.f32 %v6817_v19, %v1959_v40  ;;  %v5167_v63 = vpop.eup %5166 }
 0x746   : > { %4653 = vmatmul.msk.f32.gmra.mxu2 %vm2307_vm1, %v5141_v47  ;;  %v474_v47 = vld [vmem:[%s5289_s26 + $0x7b0] sm:$0xff] }
 0x747   : > { %4428 = vmatmul.msk.f32.gmra.mxu3 %vm489_vm0, %v473_v41  ;;  %5168 = vtanh.f32 %v1960_v61 }
 0x749   : > { %v3687_v50 = vpop.f32.mrf.mxu2 }
 0x74a   : > { %v3688_v52 = vadd.f32 %v6526_v26, %v3687_v50 }
 0x74c   : > { %4060 = vst.msk [vmem:[%s5417_s16 + $0x630] sm:$0xff] %vm3861_vm2, %v3688_v52  ;;  %v1962_v46 = vpop.f32.mrf.mxu3 }
 0x74d   : > { %v1963_v3 = vadd.f32 %v6817_v19, %v1962_v46  ;;  %v5169_v5 = vpop.eup %5168 }
 0x74e   : > { %4654 = vmatmul.msk.f32.gmra.mxu2 %vm2307_vm1, %v5143_v53  ;;  %v475_v53 = vld [vmem:[%s5289_s26 + $0x7b8] sm:$0xff] }
 0x74f   : > { %4429 = vmatmul.msk.f32.gmra.mxu3 %vm489_vm0, %v474_v47  ;;  %5170 = vtanh.f32 %v1963_v3 }
 0x751   : > { %v3690_v56 = vpop.f32.mrf.mxu2 }
 0x752   : > { %v3691_v58 = vadd.f32 %v6526_v26, %v3690_v56 }
 0x754   : > { %4061 = vst.msk [vmem:[%s5417_s16 + $0x638] sm:$0xff] %vm3861_vm2, %v3691_v58  ;;  %v1965_v52 = vpop.f32.mrf.mxu3 }
 0x755   : > { %v1966_v9 = vadd.f32 %v6817_v19, %v1965_v52  ;;  %v5171_v11 = vpop.eup %5170 }
 0x756   : > { %4655 = vmatmul.msk.f32.gmra.mxu2 %vm2307_vm1, %v5145_v59  ;;  %v476_v59 = vld [vmem:[%s5289_s26 + $0x7c0] sm:$0xff] }
 0x757   : > { %4430 = vmatmul.msk.f32.gmra.mxu3 %vm489_vm0, %v475_v53  ;;  %5172 = vtanh.f32 %v1966_v9 }
 0x759   : > { %v3693_v62 = vpop.f32.mrf.mxu2 }
 0x75a   : > { %v3694_v0 = vadd.f32 %v6526_v26, %v3693_v62 }
 0x75c   : > { %4062 = vst.msk [vmem:[%s5417_s16 + $0x640] sm:$0xff] %vm3861_vm2, %v3694_v0  ;;  %v1968_v58 = vpop.f32.mrf.mxu3 }
 0x75d   : > { %v1969_v15 = vadd.f32 %v6817_v19, %v1968_v58  ;;  %v5173_v16 = vpop.eup %5172 }
 0x75e   : > { %4656 = vmatmul.msk.f32.gmra.mxu2 %vm2307_vm1, %v5147_v1  ;;  %v477_v1 = vld [vmem:[%s5289_s26 + $0x7c8] sm:$0xff] }
 0x75f   : > { %4431 = vmatmul.msk.f32.gmra.mxu3 %vm489_vm0, %v476_v59  ;;  %5174 = vtanh.f32 %v1969_v15 }
 0x761   : > { %v3696_v4 = vpop.f32.mrf.mxu2 }
 0x762   : > { %v3697_v6 = vadd.f32 %v6526_v26, %v3696_v4 }
 0x764   : > { %4063 = vst.msk [vmem:[%s5417_s16 + $0x648] sm:$0xff] %vm3861_vm2, %v3697_v6  ;;  %v1971_v0 = vpop.f32.mrf.mxu3 }
 0x765   : > { %v1972_v22 = vadd.f32 %v6817_v19, %v1971_v0  ;;  %v5175_v23 = vpop.eup %5174 }
 0x766   : > { %4657 = vmatmul.msk.f32.gmra.mxu2 %vm2307_vm1, %v5149_v7  ;;  %v478_v7 = vld [vmem:[%s5289_s26 + $0x7d0] sm:$0xff] }
 0x767   : > { %4432 = vmatmul.msk.f32.gmra.mxu3 %vm489_vm0, %v477_v1  ;;  %5176 = vtanh.f32 %v1972_v22 }
 0x769   : > { %v3699_v10 = vpop.f32.mrf.mxu2 }
 0x76a   : > { %v3700_v12 = vadd.f32 %v6526_v26, %v3699_v10 }
 0x76c   : > { %4064 = vst.msk [vmem:[%s5417_s16 + $0x650] sm:$0xff] %vm3861_vm2, %v3700_v12  ;;  %v1974_v6 = vpop.f32.mrf.mxu3 }
 0x76d   : > { %v1975_v29 = vadd.f32 %v6817_v19, %v1974_v6  ;;  %v5177_v31 = vpop.eup %5176 }
 0x76e   : > { %4658 = vmatmul.msk.f32.gmra.mxu2 %vm2307_vm1, %v5151_v13  ;;  %v479_v13 = vld [vmem:[%s5289_s26 + $0x7d8] sm:$0xff] }
 0x76f   : > { %4433 = vmatmul.msk.f32.gmra.mxu3 %vm489_vm0, %v478_v7  ;;  %5178 = vtanh.f32 %v1975_v29 }
 0x771   : > { %v3702_v21 = vpop.f32.mrf.mxu2 }
 0x772   : > { %v3703_v18 = vadd.f32 %v6526_v26, %v3702_v21 }
 0x774   : > { %4065 = vst.msk [vmem:[%s5417_s16 + $0x658] sm:$0xff] %vm3861_vm2, %v3703_v18  ;;  %v1977_v12 = vpop.f32.mrf.mxu3 }
 0x775   : > { %v1978_v35 = vadd.f32 %v6817_v19, %v1977_v12  ;;  %v5179_v37 = vpop.eup %5178 }
 0x776   : > { %4659 = vmatmul.msk.f32.gmra.mxu2 %vm2307_vm1, %v5153_v17  ;;  %v480_v17 = vld [vmem:[%s5289_s26 + $0x7e0] sm:$0xff] }
 0x777   : > { %4434 = vmatmul.msk.f32.gmra.mxu3 %vm489_vm0, %v479_v13  ;;  %5180 = vtanh.f32 %v1978_v35 }
 0x779   : > { %v3705_v24 = vpop.f32.mrf.mxu2 }
 0x77a   : > { %v3706_v26 = vadd.f32 %v6900_v25, %v3705_v24 }
 0x77c   : > { %4066 = vst.msk [vmem:[%s5417_s16 + $0x660] sm:$0xff] %vm3861_vm2, %v3706_v26  ;;  %v1980_v18 = vpop.f32.mrf.mxu3 }
 0x77d   : > { %v1981_v41 = vadd.f32 %v6817_v19, %v1980_v18  ;;  %v5181_v43 = vpop.eup %5180 }
 0x77e   : > { %4660 = vmatmul.msk.f32.gmra.mxu2 %vm2307_vm1, %v5155_v27  ;;  %v481_v27 = vld [vmem:[%s5289_s26 + $0x7e8] sm:$0xff] }
 0x77f   : > { %4435 = vmatmul.msk.f32.gmra.mxu3 %vm489_vm0, %v480_v17  ;;  %5182 = vtanh.f32 %v1981_v41 }
 0x781   : > { %v3708_v30 = vpop.f32.mrf.mxu2 }
 0x782   : > { %v3709_v32 = vadd.f32 %v6900_v25, %v3708_v30 }
 0x784   : > { %4067 = vst.msk [vmem:[%s5417_s16 + $0x668] sm:$0xff] %vm3861_vm2, %v3709_v32  ;;  %v1983_v26 = vpop.f32.mrf.mxu3 }
 0x785   : > { %v1984_v46 = vadd.f32 %v6817_v19, %v1983_v26 }
 0x786   : > { %4661 = vmatmul.msk.f32.gmra.mxu2 %vm2307_vm1, %v5157_v33  ;;  %v482_v33 = vld [vmem:[%s5289_s26 + $0x7f0] sm:$0xff] }
 0x787   : > { %4436 = vmatmul.msk.f32.gmra.mxu3 %vm489_vm0, %v481_v27  ;;  %5184 = vtanh.f32 %v1984_v46 }
 0x789   : > { %v3711_v36 = vpop.f32.mrf.mxu2 }
 0x78a   : > { %v3712_v38 = vadd.f32 %v6900_v25, %v3711_v36 }
 0x78c   : > { %4068 = vst.msk [vmem:[%s5417_s16 + $0x670] sm:$0xff] %vm3861_vm2, %v3712_v38  ;;  %v1986_v32 = vpop.f32.mrf.mxu3 }
 0x78e   : > { %4662 = vmatmul.msk.f32.gmra.mxu2 %vm2307_vm1, %v5159_v39  ;;  %v483_v39 = vld [vmem:[%s5289_s26 + $0x7f8] sm:$0xff] }
 0x78f   : > { %4437 = vmatmul.msk.f32.gmra.mxu3 %vm489_vm0, %v482_v33 }
 0x791   : > { %v3714_v42 = vpop.f32.mrf.mxu2 }
 0x792   : > { %v3715_v44 = vadd.f32 %v6900_v25, %v3714_v42 }
 0x794   : > { %4069 = vst.msk [vmem:[%s5417_s16 + $0x678] sm:$0xff] %vm3861_vm2, %v3715_v44  ;;  %v1989_v38 = vpop.f32.mrf.mxu3 }
 0x796   : > { %4663 = vmatmul.msk.f32.gmra.mxu2 %vm2307_vm1, %v5161_v45 }
 0x797   : > { %4438 = vmatmul.msk.f32.gmra.mxu3 %vm489_vm0, %v483_v39 }
 0x799   : > { %v3717_v48 = vpop.f32.mrf.mxu2 }
 0x79a   : > { %v3718_v50 = vadd.f32 %v6900_v25, %v3717_v48  ;;  %v5183_v48 = vpop.eup %5182 }
 0x79b   : > { %v5185_v53 = vpop.eup %5184 }
 0x79c   : > { %4070 = vst.msk [vmem:[%s5417_s16 + $0x680] sm:$0xff] %vm3861_vm2, %v3718_v50  ;;  %v1992_v44 = vpop.f32.mrf.mxu3 }
 0x79d   : > { %v1993_v61 = vadd.f32 %v6817_v19, %v1992_v44 }
 0x79e   : > { %4664 = vmatmul.msk.f32.gmra.mxu2 %vm2307_vm1, %v5163_v51  ;;  %v1987_v51 = vadd.f32 %v6817_v19, %v1986_v32 }
 0x7a0   : > { %5186 = vtanh.f32 %v1987_v51 }
 0x7a1   : > { %v3720_v54 = vpop.f32.mrf.mxu2 }
 0x7a2   : > { %v3721_v56 = vadd.f32 %v6900_v25, %v3720_v54 }
 0x7a4   : > { %4071 = vst.msk [vmem:[%s5417_s16 + $0x688] sm:$0xff] %vm3861_vm2, %v3721_v56  ;;  %v1995_v49 = vpop.f32.mrf.mxu3  ;;  %v1990_v56 = vadd.f32 %v6817_v19, %v1989_v38 }
 0x7a6   : > { %4665 = vmatmul.msk.f32.gmra.mxu2 %vm2307_vm1, %v5165_v57  ;;  %v5187_v58 = vpop.eup %5186  ;;  %5188 = vtanh.f32 %v1990_v56 }
 0x7a7   : > { %5190 = vtanh.f32 %v1993_v61 }
 0x7a9   : > { %v3723_v60 = vpop.f32.mrf.mxu2 }
 0x7aa   : > { %v3724_v62 = vadd.f32 %v6900_v25, %v3723_v60 }
 0x7ac   : > { %4072 = vst.msk [vmem:[%s5417_s16 + $0x690] sm:$0xff] %vm3861_vm2, %v3724_v62  ;;  %v1998_v54 = vpop.f32.mrf.mxu3 }
 0x7ad   : > { %v1999_v7 = vadd.f32 %v6817_v19, %v1998_v54 }
 0x7ae   : > { %4666 = vmatmul.msk.f32.gmra.mxu2 %vm2307_vm1, %v5167_v63  ;;  %v5189_v63 = vpop.eup %5188 }
 0x7b1   : > { %v3726_v2 = vpop.f32.mrf.mxu2 }
 0x7b2   : > { %v3727_v4 = vadd.f32 %v6900_v25, %v3726_v2  ;;  %v1996_v2 = vadd.f32 %v6817_v19, %v1995_v49 }
 0x7b4   : > { %4073 = vst.msk [vmem:[%s5417_s16 + $0x698] sm:$0xff] %vm3861_vm2, %v3727_v4  ;;  %v2001_v59 = vpop.f32.mrf.mxu3  ;;  %v5191_v4 = vpop.eup %5190  ;;  %5192 = vtanh.f32 %v1996_v2 }
 0x7b5   : > { %5194 = vtanh.f32 %v1999_v7 }
 0x7b6   : > { %4667 = vmatmul.msk.f32.gmra.mxu2 %vm2307_vm1, %v5169_v5 }
 0x7b9   : > { %v3729_v8 = vpop.f32.mrf.mxu2 }
 0x7ba   : > { %v3730_v10 = vadd.f32 %v6900_v25, %v3729_v8  ;;  %v5193_v9 = vpop.eup %5192 }
 0x7bc   : > { %4074 = vst.msk [vmem:[%s5417_s16 + $0x6a0] sm:$0xff] %vm3861_vm2, %v3730_v10  ;;  %v2004_v0 = vpop.f32.mrf.mxu3 }
 0x7be   : > { %4668 = vmatmul.msk.f32.gmra.mxu2 %vm2307_vm1, %v5171_v11  ;;  %v2002_v11 = vadd.f32 %v6817_v19, %v2001_v59 }
 0x7c0   : > { %5196 = vtanh.f32 %v2002_v11 }
 0x7c1   : > { %v3732_v14 = vpop.f32.mrf.mxu2 }
 0x7c2   : > { %v3733_v21 = vadd.f32 %v6900_v25, %v3732_v14  ;;  %v5195_v14 = vpop.eup %5194 }
 0x7c4   : > { %4075 = vst.msk [vmem:[%s5417_s16 + $0x6a8] sm:$0xff] %vm3861_vm2, %v3733_v21  ;;  %v2007_v5 = vpop.f32.mrf.mxu3  ;;  %v2005_v21 = vadd.f32 %v6817_v19, %v2004_v0 }
 0x7c5   : > { %v2008_v22 = vadd.f32 %v6817_v19, %v2007_v5 }
 0x7c6   : > { %4669 = vmatmul.msk.f32.gmra.mxu2 %vm2307_vm1, %v5173_v16  ;;  %v5197_v18 = vpop.eup %5196  ;;  %5198 = vtanh.f32 %v2005_v21 }
 0x7c7   : > { %5200 = vtanh.f32 %v2008_v22 }
 0x7c9   : > { %v3735_v20 = vpop.f32.mrf.mxu2 }
 0x7ca   : > { %v3736_v24 = vadd.f32 %v6900_v25, %v3735_v20 }
 0x7cc   : > { %4076 = vst.msk [vmem:[%s5417_s16 + $0x6b0] sm:$0xff] %vm3861_vm2, %v3736_v24  ;;  %v2010_v13 = vpop.f32.mrf.mxu3 }
 0x7ce   : > { %4670 = vmatmul.msk.f32.gmra.mxu2 %vm2307_vm1, %v5175_v23  ;;  %v5199_v23 = vpop.eup %5198 }
 0x7d1   : > { %v3738_v28 = vpop.f32.mrf.mxu2 }
 0x7d2   : > { %v3739_v30 = vadd.f32 %v6900_v25, %v3738_v28  ;;  %v2011_v28 = vadd.f32 %v6817_v19, %v2010_v13 }
 0x7d4   : > { %4077 = vst.msk [vmem:[%s5417_s16 + $0x6b8] sm:$0xff] %vm3861_vm2, %v3739_v30  ;;  %v2013_v17 = vpop.f32.mrf.mxu3  ;;  %v5201_v30 = vpop.eup %5200  ;;  %5202 = vtanh.f32 %v2011_v28 }
 0x7d5   : > { %v2014_v33 = vadd.f32 %v6817_v19, %v2013_v17 }
 0x7d6   : > { %4671 = vmatmul.msk.f32.gmra.mxu2 %vm2307_vm1, %v5177_v31 }
 0x7d7   : > { %5204 = vtanh.f32 %v2014_v33 }
 0x7d9   : > { %v3741_v34 = vpop.f32.mrf.mxu2 }
 0x7da   : > { %v3742_v36 = vadd.f32 %v6900_v25, %v3741_v34  ;;  %v5203_v35 = vpop.eup %5202 }
 0x7dc   : > { %4078 = vst.msk [vmem:[%s5417_s16 + $0x6c0] sm:$0xff] %vm3861_vm2, %v3742_v36  ;;  %v2016_v26 = vpop.f32.mrf.mxu3 }
 0x7de   : > { %4672 = vmatmul.msk.f32.gmra.mxu2 %vm2307_vm1, %v5179_v37  ;;  %v2017_v37 = vadd.f32 %v6817_v19, %v2016_v26 }
 0x7e0   : > { %5206 = vtanh.f32 %v2017_v37 }
 0x7e1   : > { %v3744_v40 = vpop.f32.mrf.mxu2 }
 0x7e2   : > { %v3745_v42 = vadd.f32 %v6900_v25, %v3744_v40  ;;  %v5205_v40 = vpop.eup %5204 }
 0x7e4   : > { %4079 = vst.msk [vmem:[%s5417_s16 + $0x6c8] sm:$0xff] %vm3861_vm2, %v3745_v42  ;;  %v2019_v31 = vpop.f32.mrf.mxu3 }
 0x7e5   : > { %v2020_v42 = vadd.f32 %v6817_v19, %v2019_v31 }
 0x7e6   : > { %4673 = vmatmul.msk.f32.gmra.mxu2 %vm2307_vm1, %v5181_v43  ;;  %v5207_v44 = vpop.eup %5206 }
 0x7e7   : > { %5208 = vtanh.f32 %v2020_v42 }
 0x7e9   : > { %v3747_v45 = vpop.f32.mrf.mxu2 }
 0x7ea   : > { %v3748_v47 = vadd.f32 %v6900_v25, %v3747_v45 }
 0x7ec   : > { %4080 = vst.msk [vmem:[%s5417_s16 + $0x6d0] sm:$0xff] %vm3861_vm2, %v3748_v47  ;;  %v2022_v39 = vpop.f32.mrf.mxu3 }
 0x7ed   : > { %v2023_v47 = vadd.f32 %v6817_v19, %v2022_v39  ;;  %v5209_v49 = vpop.eup %5208 }
 0x7ee   : > { %4674 = vmatmul.msk.f32.gmra.mxu2 %vm2307_vm1, %v5183_v48 }
 0x7ef   : > { %5210 = vtanh.f32 %v2023_v47 }
 0x7f1   : > { %v3750_v50 = vpop.f32.mrf.mxu2 }
 0x7f2   : > { %v3751_v52 = vadd.f32 %v6900_v25, %v3750_v50 }
 0x7f4   : > { %4081 = vst.msk [vmem:[%s5417_s16 + $0x6d8] sm:$0xff] %vm3861_vm2, %v3751_v52  ;;  %v2025_v45 = vpop.f32.mrf.mxu3 }
 0x7f5   : > { %v2026_v52 = vadd.f32 %v6817_v19, %v2025_v45  ;;  %v5211_v54 = vpop.eup %5210 }
 0x7f6   : > { %4675 = vmatmul.msk.f32.gmra.mxu2 %vm2307_vm1, %v5185_v53 }
 0x7f7   : > { %5212 = vtanh.f32 %v2026_v52 }
 0x7f9   : > { %v3753_v55 = vpop.f32.mrf.mxu2 }
 0x7fa   : > { %v3754_v57 = vadd.f32 %v6900_v25, %v3753_v55 }
 0x7fc   : > { %4082 = vst.msk [vmem:[%s5417_s16 + $0x6e0] sm:$0xff] %vm3861_vm2, %v3754_v57  ;;  %v2028_v50 = vpop.f32.mrf.mxu3 }
 0x7fd   : > { %v2029_v57 = vadd.f32 %v6817_v19, %v2028_v50  ;;  %v5213_v59 = vpop.eup %5212 }
 0x7fe   : > { %4676 = vmatmul.msk.f32.gmra.mxu2 %vm2307_vm1, %v5187_v58 }
 0x7ff   : > { %5214 = vtanh.f32 %v2029_v57 }
 0x801   : > { %v3756_v60 = vpop.f32.mrf.mxu2 }
 0x802   : > { %v3757_v62 = vadd.f32 %v6900_v25, %v3756_v60 }
 0x804   : > { %4083 = vst.msk [vmem:[%s5417_s16 + $0x6e8] sm:$0xff] %vm3861_vm2, %v3757_v62  ;;  %v2031_v55 = vpop.f32.mrf.mxu3 }
 0x805   : > { %v2032_v61 = vadd.f32 %v6817_v19, %v2031_v55  ;;  %v5215_v0 = vpop.eup %5214 }
 0x806   : > { %4677 = vmatmul.msk.f32.gmra.mxu2 %vm2307_vm1, %v5189_v63 }
 0x807   : > { %5216 = vtanh.f32 %v2032_v61 }
 0x809   : > { %v3759_v1 = vpop.f32.mrf.mxu2 }
 0x80a   : > { %v3760_v3 = vadd.f32 %v6900_v25, %v3759_v1 }
 0x80c   : > { %4084 = vst.msk [vmem:[%s5417_s16 + $0x6f0] sm:$0xff] %vm3861_vm2, %v3760_v3  ;;  %v2034_v63 = vpop.f32.mrf.mxu3 }
 0x80d   : > { %v2035_v2 = vadd.f32 %v6817_v19, %v2034_v63 }
 0x80e   : > { %4678 = vmatmul.msk.f32.gmra.mxu2 %vm2307_vm1, %v5191_v4  ;;  %v5217_v4 = vpop.eup %5216 }
 0x80f   : > { %5218 = vtanh.f32 %v2035_v2 }
 0x811   : > { %v3762_v6 = vpop.f32.mrf.mxu2 }
 0x812   : > { %v3763_v8 = vadd.f32 %v6900_v25, %v3762_v6 }
 0x814   : > { %4085 = vst.msk [vmem:[%s5417_s16 + $0x6f8] sm:$0xff] %vm3861_vm2, %v3763_v8  ;;  %v2037_v5 = vpop.f32.mrf.mxu3 }
 0x815   : > { %v2038_v7 = vadd.f32 %v6817_v19, %v2037_v5 }
 0x816   : > { %4679 = vmatmul.msk.f32.gmra.mxu2 %vm2307_vm1, %v5193_v9  ;;  %v5219_v9 = vpop.eup %5218 }
 0x817   : > { %5220 = vtanh.f32 %v2038_v7 }
 0x819   : > { %v3765_v10 = vpop.f32.mrf.mxu2 }
 0x81a   : > { %v3766_v12 = vadd.f32 %v6900_v25, %v3765_v10 }
 0x81c   : > { %4086 = vst.msk [vmem:[%s5417_s16 + $0x700] sm:$0xff] %vm3861_vm2, %v3766_v12  ;;  %v2040_v10 = vpop.f32.mrf.mxu3 }
 0x81d   : > { %v2041_v12 = vadd.f32 %v6817_v19, %v2040_v10 }
 0x81e   : > { %4680 = vmatmul.msk.f32.gmra.mxu2 %vm2307_vm1, %v5195_v14  ;;  %v5221_v14 = vpop.eup %5220 }
 0x81f   : > { %5222 = vtanh.f32 %v2041_v12 }
 0x821   : > { %v3768_v15 = vpop.f32.mrf.mxu2 }
 0x822   : > { %v3769_v16 = vadd.f32 %v6900_v25, %v3768_v15 }
 0x824   : > { %4087 = vst.msk [vmem:[%s5417_s16 + $0x708] sm:$0xff] %vm3861_vm2, %v3769_v16 }
 0x825   : > { %v5223_v16 = vpop.eup %5222 }
 0x826   : > { %4681 = vmatmul.msk.f32.gmra.mxu2 %vm2307_vm1, %v5197_v18 }
 0x829   : > { %v3771_v20 = vpop.f32.mrf.mxu2 }
 0x82a   : > { %v3772_v24 = vadd.f32 %v6900_v25, %v3771_v20 }
 0x82c   : > { %4088 = vst.msk [vmem:[%s5417_s16 + $0x710] sm:$0xff] %vm3861_vm2, %v3772_v24 }
 0x82e   : > { %4682 = vmatmul.msk.f32.gmra.mxu2 %vm2307_vm1, %v5199_v23 }
 0x831   : > { %v3774_v27 = vpop.f32.mrf.mxu2 }
 0x832   : > { %v3775_v29 = vadd.f32 %v6900_v25, %v3774_v27 }
 0x834   : > { %4089 = vst.msk [vmem:[%s5417_s16 + $0x718] sm:$0xff] %vm3861_vm2, %v3775_v29 }
 0x836   : > { %4683 = vmatmul.msk.f32.gmra.mxu2 %vm2307_vm1, %v5201_v30 }
 0x839   : > { %v3777_v32 = vpop.f32.mrf.mxu2 }
 0x83a   : > { %v3778_v34 = vadd.f32 %v6900_v25, %v3777_v32 }
 0x83c   : > { %4090 = vst.msk [vmem:[%s5417_s16 + $0x720] sm:$0xff] %vm3861_vm2, %v3778_v34 }
 0x83e   : > { %4684 = vmatmul.msk.f32.gmra.mxu2 %vm2307_vm1, %v5203_v35 }
 0x841   : > { %v3780_v36 = vpop.f32.mrf.mxu2 }
 0x842   : > { %v3781_v38 = vadd.f32 %v6900_v25, %v3780_v36 }
 0x844   : > { %4091 = vst.msk [vmem:[%s5417_s16 + $0x728] sm:$0xff] %vm3861_vm2, %v3781_v38 }
 0x846   : > { %4685 = vmatmul.msk.f32.gmra.mxu2 %vm2307_vm1, %v5205_v40 }
 0x849   : > { %v3783_v41 = vpop.f32.mrf.mxu2 }
 0x84a   : > { %v3784_v43 = vadd.f32 %v6900_v25, %v3783_v41 }
 0x84c   : > { %4092 = vst.msk [vmem:[%s5417_s16 + $0x730] sm:$0xff] %vm3861_vm2, %v3784_v43 }
 0x84e   : > { %4686 = vmatmul.msk.f32.gmra.mxu2 %vm2307_vm1, %v5207_v44 }
 0x851   : > { %v3786_v46 = vpop.f32.mrf.mxu2 }
 0x852   : > { %v3787_v48 = vadd.f32 %v6900_v25, %v3786_v46 }
 0x854   : > { %4093 = vst.msk [vmem:[%s5417_s16 + $0x738] sm:$0xff] %vm3861_vm2, %v3787_v48 }
 0x856   : > { %4687 = vmatmul.msk.f32.gmra.mxu2 %vm2307_vm1, %v5209_v49 }
 0x859   : > { %v3789_v51 = vpop.f32.mrf.mxu2 }
 0x85a   : > { %v3790_v53 = vadd.f32 %v6900_v25, %v3789_v51 }
 0x85c   : > { %4094 = vst.msk [vmem:[%s5417_s16 + $0x740] sm:$0xff] %vm3861_vm2, %v3790_v53 }
 0x85e   : > { %4688 = vmatmul.msk.f32.gmra.mxu2 %vm2307_vm1, %v5211_v54 }
 0x861   : > { %v3792_v56 = vpop.f32.mrf.mxu2 }
 0x862   : > { %v3793_v58 = vadd.f32 %v6900_v25, %v3792_v56 }
 0x864   : > { %4095 = vst.msk [vmem:[%s5417_s16 + $0x748] sm:$0xff] %vm3861_vm2, %v3793_v58 }
 0x866   : > { %4689 = vmatmul.msk.f32.gmra.mxu2 %vm2307_vm1, %v5213_v59 }
 0x869   : > { %v3795_v60 = vpop.f32.mrf.mxu2 }
 0x86a   : > { %v3796_v62 = vadd.f32 %v6900_v25, %v3795_v60 }
 0x86c   : > { %4096 = vst.msk [vmem:[%s5417_s16 + $0x750] sm:$0xff] %vm3861_vm2, %v3796_v62 }
 0x86e   : > { %4690 = vmatmul.msk.f32.gmra.mxu2 %vm2307_vm1, %v5215_v0 }
 0x871   : > { %v3798_v1 = vpop.f32.mrf.mxu2 }
 0x872   : > { %v3799_v3 = vadd.f32 %v6900_v25, %v3798_v1 }
 0x874   : > { %4097 = vst.msk [vmem:[%s5417_s16 + $0x758] sm:$0xff] %vm3861_vm2, %v3799_v3 }
 0x876   : > { %4691 = vmatmul.msk.f32.gmra.mxu2 %vm2307_vm1, %v5217_v4 }
 0x879   : > { %v3801_v6 = vpop.f32.mrf.mxu2 }
 0x87a   : > { %v3802_v8 = vadd.f32 %v6900_v25, %v3801_v6 }
 0x87c   : > { %4098 = vst.msk [vmem:[%s5417_s16 + $0x760] sm:$0xff] %vm3861_vm2, %v3802_v8 }
 0x87e   : > { %4692 = vmatmul.msk.f32.gmra.mxu2 %vm2307_vm1, %v5219_v9 }
 0x881   : > { %v3804_v11 = vpop.f32.mrf.mxu2 }
 0x882   : > { %v3805_v13 = vadd.f32 %v6900_v25, %v3804_v11 }
 0x884   : > { %4099 = vst.msk [vmem:[%s5417_s16 + $0x768] sm:$0xff] %vm3861_vm2, %v3805_v13 }
 0x886   : > { %4693 = vmatmul.msk.f32.gmra.mxu2 %vm2307_vm1, %v5221_v14 }
 0x889   : > { %v3807_v15 = vpop.f32.mrf.mxu2 }
 0x88a   : > { %v3808_v21 = vadd.f32 %v6900_v25, %v3807_v15 }
 0x88c   : > { %4100 = vst.msk [vmem:[%s5417_s16 + $0x770] sm:$0xff] %vm3861_vm2, %v3808_v21 }
 0x88e   : > { %4694 = vmatmul.msk.f32.gmra.mxu2 %vm2307_vm1, %v5223_v16 }
 0x891   : > { %v3810_v19 = vpop.f32.mrf.mxu2 }
 0x892   : > { %v3811_v18 = vadd.f32 %v6900_v25, %v3810_v19 }
 0x894   : > { %4101 = vst.msk [vmem:[%s5417_s16 + $0x778] sm:$0xff] %vm3861_vm2, %v3811_v18 }
 0x899   : > { %v3813_v17 = vpop.f32.mrf.mxu2 }
 0x89a   : > { %v3814_v20 = vadd.f32 %v6900_v25, %v3813_v17 }
 0x89c   : > { %4102 = vst.msk [vmem:[%s5417_s16 + $0x780] sm:$0xff] %vm3861_vm2, %v3814_v20 }
 0x8a1   : > { %v3816_v22 = vpop.f32.mrf.mxu2 }
 0x8a2   : > { %v3817_v24 = vadd.f32 %v6900_v25, %v3816_v22 }
 0x8a4   : > { %4103 = vst.msk [vmem:[%s5417_s16 + $0x788] sm:$0xff] %vm3861_vm2, %v3817_v24 }
 0x8a9   : > { %v3819_v23 = vpop.f32.mrf.mxu2 }
 0x8aa   : > { %v3820_v26 = vadd.f32 %v6900_v25, %v3819_v23 }
 0x8ac   : > { %4104 = vst.msk [vmem:[%s5417_s16 + $0x790] sm:$0xff] %vm3861_vm2, %v3820_v26 }
 0x8b1   : > { %v3822_v27 = vpop.f32.mrf.mxu2 }
 0x8b2   : > { %v3823_v28 = vadd.f32 %v6900_v25, %v3822_v27 }
 0x8b4   : > { %4105 = vst.msk [vmem:[%s5417_s16 + $0x798] sm:$0xff] %vm3861_vm2, %v3823_v28 }
 0x8b9   : > { %v3825_v29 = vpop.f32.mrf.mxu2 }
 0x8ba   : > { %v3826_v30 = vadd.f32 %v6900_v25, %v3825_v29 }
 0x8bc   : > { %4106 = vst.msk [vmem:[%s5417_s16 + $0x7a0] sm:$0xff] %vm3861_vm2, %v3826_v30 }
 0x8c1   : > { %v3828_v31 = vpop.f32.mrf.mxu2 }
 0x8c2   : > { %v3829_v32 = vadd.f32 %v6900_v25, %v3828_v31 }
 0x8c4   : > { %4107 = vst.msk [vmem:[%s5417_s16 + $0x7a8] sm:$0xff] %vm3861_vm2, %v3829_v32 }
 0x8c9   : > { %v3831_v33 = vpop.f32.mrf.mxu2 }
 0x8ca   : > { %v3832_v34 = vadd.f32 %v6900_v25, %v3831_v33 }
 0x8cc   : > { %4108 = vst.msk [vmem:[%s5417_s16 + $0x7b0] sm:$0xff] %vm3861_vm2, %v3832_v34 }
 0x8d1   : > { %v3834_v35 = vpop.f32.mrf.mxu2 }
 0x8d2   : > { %v3835_v36 = vadd.f32 %v6900_v25, %v3834_v35 }
 0x8d4   : > { %4109 = vst.msk [vmem:[%s5417_s16 + $0x7b8] sm:$0xff] %vm3861_vm2, %v3835_v36 }
 0x8d9   : > { %v3837_v37 = vpop.f32.mrf.mxu2 }
 0x8da   : > { %v3838_v38 = vadd.f32 %v6900_v25, %v3837_v37 }
 0x8dc   : > { %4110 = vst.msk [vmem:[%s5417_s16 + $0x7c0] sm:$0xff] %vm3861_vm2, %v3838_v38 }
 0x8e1   : > { %v3840_v39 = vpop.f32.mrf.mxu2 }
 0x8e2   : > { %v3841_v40 = vadd.f32 %v6900_v25, %v3840_v39 }
 0x8e4   : > { %4111 = vst.msk [vmem:[%s5417_s16 + $0x7c8] sm:$0xff] %vm3861_vm2, %v3841_v40 }
 0x8e9   : > { %v3843_v41 = vpop.f32.mrf.mxu2 }
 0x8ea   : > { %v3844_v42 = vadd.f32 %v6900_v25, %v3843_v41 }
 0x8ec   : > { %4112 = vst.msk [vmem:[%s5417_s16 + $0x7d0] sm:$0xff] %vm3861_vm2, %v3844_v42 }
 0x8f1   : > { %v3846_v43 = vpop.f32.mrf.mxu2 }
 0x8f2   : > { %v3847_v44 = vadd.f32 %v6900_v25, %v3846_v43 }
 0x8f4   : > { %4113 = vst.msk [vmem:[%s5417_s16 + $0x7d8] sm:$0xff] %vm3861_vm2, %v3847_v44 }
 0x8f9   : > { %v3849_v45 = vpop.f32.mrf.mxu2 }
 0x8fa   : > { %v3850_v46 = vadd.f32 %v6900_v25, %v3849_v45 }
 0x8fc   : > { %4114 = vst.msk [vmem:[%s5417_s16 + $0x7e0] sm:$0xff] %vm3861_vm2, %v3850_v46 }
 0x901   : > { %v3852_v47 = vpop.f32.mrf.mxu2 }
 0x902   : > { %v3853_v48 = vadd.f32 %v6900_v25, %v3852_v47 }
 0x904   : > { %4115 = vst.msk [vmem:[%s5417_s16 + $0x7e8] sm:$0xff] %vm3861_vm2, %v3853_v48 }
 0x909   : > { %v3855_v49 = vpop.f32.mrf.mxu2 }
 0x90a   : > { %v3856_v50 = vadd.f32 %v6900_v25, %v3855_v49 }
 0x90c   : > { %4116 = vst.msk [vmem:[%s5417_s16 + $0x7f0] sm:$0xff] %vm3861_vm2, %v3856_v50 }
 0x911   : > { %v3858_v51 = vpop.f32.mrf.mxu2 }
 0x912   : > { %v3859_v52 = vadd.f32 %v6900_v25, %v3858_v51 }
 0x914   : > { %4117 = vst.msk [vmem:[%s5417_s16 + $0x7f8] sm:$0xff] %vm3861_vm2, %v3859_v52 }
 0x915 PF: > { %s15_s18 = sadd.s32 1, %s5238_s18  }
 0x916   : > { %p12_p4 = scmp.ge.s32.totalorder %s15_s18, 4  }
 0x918   :  { %14 = sbr.rel (!%p12_p4) target bundleno = 1 (0x1), region = 70 }

</bundles_post_ra>
